<compile_context>
chip_gen: v5e
topology: v5e:2x2
jax: 0.10.0
libtpu: 0.0.40
codegen_flags: <defaults>
</compile_context>

<pallas_src>
import jax
import jax.numpy as jnp
from jax.experimental import pallas as pl
from jax.experimental.pallas import tpu as pltpu

B = 8         # graphs per call (batch)
TB = 4        # graphs per grid step (grid = (B // TB,))
N = 16        # nodes per graph
E = 64        # edges per graph
D = 32        # feature_dims
R = D // 4    # low-rank dim (rank_factor = 4)

LN_EPS = 1e-5    # nn.LayerNorm default eps
GATE_EPS = 1e-6

# Packed parameter slab layout: [P_ROWS, 4*D] = [72, 128] f32
#   rows 0:D        w_node  (columns: e_src | Bh | e_dst | src_upd)
#   rows D:2D       w_edge  (lanes 0:D)
#   row  2D         b_node  (128 lanes)
#   row  2D+1       b_edge            (lanes 0:D)
#   row  2D+2/2D+3  LN-nodes gamma / beta (lanes 0:D)
#   row  2D+4/2D+5  LN-edges gamma / beta (lanes 0:D)
P_ROWS = 72


def _layernorm(v, gamma, beta):
    # single pass: var = E[x^2] - mean^2
    mean = jnp.mean(v, axis=-1, keepdims=True)
    var = jnp.mean(v * v, axis=-1, keepdims=True) - mean * mean
    return (v - mean) * jax.lax.rsqrt(var + LN_EPS) * gamma + beta


def _silu(v):
    return v * jax.nn.sigmoid(v)


def egg_conv_kernel(node_ref, edge_ref, inc_ref, p_ref, x_out_ref, y_out_ref):
    node = node_ref[...]                                # [TB, N, D]  f32
    edge = edge_ref[...]                                # [TB, E, D]  f32
    inc = inc_ref[...].astype(jnp.float32)              # [TB, E, 2N] bf16 0/1 -> f32 (exact)
    p = p_ref[...]                                      # [P_ROWS, 4D] packed params

    # ---- carve the packed parameter slab (static slices, no extra DMAs) ----
    w_node = p[0:D, :]                                  # [D, 4D]
    w_edge = p[D:2 * D, 0:D]                            # [D, D]
    b_node = p[2 * D:2 * D + 1, :]                      # [1, 4D]
    b_edge = p[2 * D + 1:2 * D + 2, 0:D]                # [1, D]
    g_nodes = p[2 * D + 2:2 * D + 3, 0:D]
    be_nodes = p[2 * D + 3:2 * D + 4, 0:D]
    g_edges = p[2 * D + 4:2 * D + 5, 0:D]
    be_edges = p[2 * D + 5:2 * D + 6, 0:D]

    # ---- fused projections: two 2-D matmuls with large row counts ----------
    node_proj = jnp.dot(node.reshape(TB * N, D), w_node,
                        preferred_element_type=jnp.float32) + b_node   # [TB*N, 4D]
    node_proj = node_proj.reshape(TB, N, 4 * D)
    e_edge = jnp.dot(edge.reshape(TB * E, D), w_edge,
                     preferred_element_type=jnp.float32) + b_edge      # [TB*E, D]
    e_edge = e_edge.reshape(TB, E, D)

    src_oh = inc[:, :, 0:N]                             # [TB, E, N]
    dst_oh = inc[:, :, N:2 * N]                         # [TB, E, N]

    # ---- gather (u_add_v + u_mul_e): two batched matmuls, no concats -------
    # node_proj cols [0:2D] are already [e_src | Bh] -> src-side gather weight.
    gath_src = jnp.einsum('ben,bnf->bef', src_oh, node_proj[:, :, 0:2 * D],
                          preferred_element_type=jnp.float32)          # [TB,E,2D]
    gath_dst = jnp.einsum('ben,bnf->bef', dst_oh, node_proj[:, :, 2 * D:3 * D],
                          preferred_element_type=jnp.float32)          # [TB,E,D]

    m = gath_src[:, :, 0:D] + gath_dst + e_edge         # [TB, E, D]
    bh_e = gath_src[:, :, D:2 * D]                      # Bh[src(e)]
    sigma = jax.nn.sigmoid(m)

    # ---- scatter (fn.sum to dst nodes): dst one-hot only, shared LHS -------
    sum_sigma = jnp.einsum('ben,bed->bnd', dst_oh, sigma,
                           preferred_element_type=jnp.float32)         # [TB,N,D]
    sum_sigma_h = jnp.einsum('ben,bed->bnd', dst_oh, sigma * bh_e,
                             preferred_element_type=jnp.float32)       # [TB,N,D]
    h = sum_sigma_h * pl.reciprocal(sum_sigma + GATE_EPS, approx=False)

    # ---- node update --------------------------------------------------------
    x = node_proj[:, :, 3 * D:4 * D] + h                # src_update(node) + h
    x = _layernorm(x, g_nodes, be_nodes)
    x_out_ref[...] = node + _silu(x)                    # residual

    # ---- edge update --------------------------------------------------------
    y = _layernorm(m, g_edges, be_edges)
    y_out_ref[...] = edge + _silu(y)                    # residual


def _pack_params(params):
    """Fold the 5 LowRankLinear layers into dense weights and pack everything
    into one lane-dense [P_ROWS, 128] f32 slab."""
    w1, w2, b, ln_g, ln_b = params
    w_dense = jnp.matmul(w1, w2)                        # [5, D, D]
    # projection column order: e_src | Bh | e_dst | src_upd
    # param order: 0=src_gate, 1=dst_gate, 2=edge_gate, 3=src_update, 4=dst_update
    order = (0, 4, 1, 3)
    w_node = jnp.concatenate([w_dense[i] for i in order], axis=1)      # [D, 4D]
    b_node = jnp.concatenate([b[i] for i in order], axis=0)            # [4D]

    p = jnp.zeros((P_ROWS, 4 * D), jnp.float32)
    p = p.at[0:D, :].set(w_node)
    p = p.at[D:2 * D, 0:D].set(w_dense[2])              # edge_gate weight
    p = p.at[2 * D, :].set(b_node)
    p = p.at[2 * D + 1, 0:D].set(b[2])                  # edge_gate bias
    p = p.at[2 * D + 2, 0:D].set(ln_g[0])
    p = p.at[2 * D + 3, 0:D].set(ln_b[0])
    p = p.at[2 * D + 4, 0:D].set(ln_g[1])
    p = p.at[2 * D + 5, 0:D].set(ln_b[1])
    return p


@jax.jit
def edge_gated_graph_conv(node_feats, edge_feats, src_idx, dst_idx, params):
    """node_feats [B,N,D] f32, edge_feats [B,E,D] f32, src/dst_idx [B,E] int."""
    b_graphs = node_feats.shape[0]
    assert b_graphs % TB == 0, "batch must be divisible by the graph tile"
    nb = b_graphs // TB

    p_slab = _pack_params(params)

    # bf16 incidence (0/1 exact): [src_oh | dst_oh] per graph, half the DMA bytes.
    src_oh = jax.nn.one_hot(src_idx, N, dtype=jnp.bfloat16)            # [B, E, N]
    dst_oh = jax.nn.one_hot(dst_idx, N, dtype=jnp.bfloat16)            # [B, E, N]
    inc = jnp.concatenate([src_oh, dst_oh], axis=-1)                   # [B, E, 2N]

    flops = 2 * b_graphs * (N * D * 4 * D        # node projection
                            + E * D * D          # edge projection
                            + E * N * 2 * D      # src gather
                            + E * N * D          # dst gather
                            + 2 * E * N * D)     # two scatters
    transcendentals = b_graphs * (2 * E * D + N * D)
    bytes_accessed = (2 * b_graphs * N * D * 4 + 2 * b_graphs * E * D * 4
                      + b_graphs * E * 2 * N * 2 + P_ROWS * 4 * D * 4)

    return pl.pallas_call(
        egg_conv_kernel,
        out_shape=(jax.ShapeDtypeStruct((b_graphs, N, D), jnp.float32),
                   jax.ShapeDtypeStruct((b_graphs, E, D), jnp.float32)),
        grid=(nb,),
        in_specs=[
            pl.BlockSpec((TB, N, D), lambda g: (g, 0, 0)),
            pl.BlockSpec((TB, E, D), lambda g: (g, 0, 0)),
            pl.BlockSpec((TB, E, 2 * N), lambda g: (g, 0, 0)),
            pl.BlockSpec((P_ROWS, 4 * D), lambda g: (0, 0)),
        ],
        out_specs=(
            pl.BlockSpec((TB, N, D), lambda g: (g, 0, 0)),
            pl.BlockSpec((TB, E, D), lambda g: (g, 0, 0)),
        ),
        input_output_aliases={0: 0, 1: 1},          # residual outputs reuse input buffers
        compiler_params=pltpu.CompilerParams(
            dimension_semantics=("parallel",)),      # shards batch grid across v7x's 2 TCs
        cost_estimate=pl.CostEstimate(flops=flops,
                                      transcendentals=transcendentals,
                                      bytes_accessed=bytes_accessed),
    )(node_feats, edge_feats, inc, p_slab)


def reference(node_feats, edge_feats, src_idx, dst_idx, params):
    """Pure-JAX reference with the original (two-step low-rank) semantics,
    vmapped over the graph batch."""
    w1, w2, b, ln_g, ln_b = params

    def lowrank(x, i):
        return (x @ w1[i]) @ w2[i] + b[i]

    def ln(v, g, bb):
        mean = v.mean(-1, keepdims=True)
        var = ((v - mean) ** 2).mean(-1, keepdims=True)
        return (v - mean) / jnp.sqrt(var + LN_EPS) * g + bb

    def single(nf, ef, si, di):
        e_src = lowrank(nf, 0)
        e_dst = lowrank(nf, 1)
        e_edge = lowrank(ef, 2)
        src_upd = lowrank(nf, 3)
        bh = lowrank(nf, 4)

        m = e_src[si] + e_dst[di] + e_edge
        sigma = jax.nn.sigmoid(m)
        sum_sigma_h = jax.ops.segment_sum(sigma * bh[si], di, num_segments=N)
        sum_sigma = jax.ops.segment_sum(sigma, di, num_segments=N)
        h = sum_sigma_h / (sum_sigma + GATE_EPS)

        x = src_upd + h
        x = ln(x, ln_g[0], ln_b[0])
        x = x * jax.nn.sigmoid(x)
        x = nf + x

        y = ln(m, ln_g[1], ln_b[1])
        y = y * jax.nn.sigmoid(y)
        y = ef + y
        return x, y

    return jax.vmap(single)(node_feats, edge_feats, src_idx, dst_idx)


if __name__ == "__main__":
    key = jax.random.PRNGKey(0)
    keys = jax.random.split(key, 10)

    node_feats = jax.random.normal(keys[0], (B, N, D), dtype=jnp.float32)
    edge_feats = jax.random.normal(keys[1], (B, E, D), dtype=jnp.float32)
    src_idx = jax.random.randint(keys[2], (B, E), 0, N)
    dst_idx = jax.random.randint(keys[3], (B, E), 0, N)

    # 5 LowRankLinear layers (src_gate, dst_gate, edge_gate, src_update, dst_update)
    w1 = 0.2 * jax.random.normal(keys[4], (5, D, R), dtype=jnp.float32)   # no bias
    w2 = 0.2 * jax.random.normal(keys[5], (5, R, D), dtype=jnp.float32)   # with bias
    b = 0.1 * jax.random.normal(keys[6], (5, D), dtype=jnp.float32)
    # 2 LayerNorms (nodes, edges)
    ln_g = jnp.ones((2, D), dtype=jnp.float32) + 0.05 * jax.random.normal(
        keys[7], (2, D), dtype=jnp.float32)
    ln_b = 0.05 * jax.random.normal(keys[8], (2, D), dtype=jnp.float32)
    params = (w1, w2, b, ln_g, ln_b)

    x_ref, y_ref = reference(node_feats, edge_feats, src_idx, dst_idx, params)

    x_out, y_out = edge_gated_graph_conv(node_feats, edge_feats, src_idx,
                                         dst_idx, params)
    jax.block_until_ready((x_out, y_out))

    assert jnp.allclose(x_out, x_ref, atol=1e-4, rtol=1e-4), "node output mismatch"
    assert jnp.allclose(y_out, y_ref, atol=1e-4, rtol=1e-4), "edge output mismatch"

    print("KERNEL_OK")
</pallas_src>

<mosaic_0001>
module attributes {stable_mosaic.version = 11 : i64} {
  func.func @egg_conv_kernel(%arg0: i32, %arg1: memref<4x16x32xf32, #tpu.memory_space<vmem>>, %arg2: memref<4x64x32xf32, #tpu.memory_space<vmem>>, %arg3: memref<4x64x32xbf16, #tpu.memory_space<vmem>>, %arg4: memref<72x128xf32, #tpu.memory_space<vmem>>, %arg5: memref<4x16x32xf32, #tpu.memory_space<vmem>>, %arg6: memref<4x64x32xf32, #tpu.memory_space<vmem>>) attributes {dimension_semantics = [#tpu.dimension_semantics<parallel>], iteration_bounds = array<i64: 2>, scalar_prefetch = 0 : i64, scratch_operands = 0 : i64, tpu.core_type = #tpu.core_type<tc>, window_params = [{transform_indices = @transform_0, window_bounds = array<i64: 4, 16, 32>}, {transform_indices = @transform_1, window_bounds = array<i64: 4, 64, 32>}, {transform_indices = @transform_2, window_bounds = array<i64: 4, 64, 32>}, {pipeline_mode = #tpu.pipeline_mode<synchronous>, transform_indices = @transform_3, window_bounds = array<i64: 72, 128>}, {transform_indices = @transform_4, window_bounds = array<i64: 4, 16, 32>}, {transform_indices = @transform_5, window_bounds = array<i64: 4, 64, 32>}]} {
    %c0 = arith.constant 0 : index
    %c0_0 = arith.constant 0 : index
    %c0_1 = arith.constant 0 : index
    %0 = vector.load %arg1[%c0, %c0_0, %c0_1] : memref<4x16x32xf32, #tpu.memory_space<vmem>>, vector<4x16x32xf32>
    %c0_2 = arith.constant 0 : index
    %c0_3 = arith.constant 0 : index
    %c0_4 = arith.constant 0 : index
    %1 = vector.load %arg2[%c0_2, %c0_3, %c0_4] : memref<4x64x32xf32, #tpu.memory_space<vmem>>, vector<4x64x32xf32>
    %c0_5 = arith.constant 0 : index
    %c0_6 = arith.constant 0 : index
    %c0_7 = arith.constant 0 : index
    %2 = vector.load %arg3[%c0_5, %c0_6, %c0_7] : memref<4x64x32xbf16, #tpu.memory_space<vmem>>, vector<4x64x32xbf16>
    %3 = arith.extf %2 : vector<4x64x32xbf16> to vector<4x64x32xf32>
    %c0_8 = arith.constant 0 : index
    %c0_9 = arith.constant 0 : index
    %4 = vector.load %arg4[%c0_8, %c0_9] : memref<72x128xf32, #tpu.memory_space<vmem>>, vector<72x128xf32>
    %5 = vector.extract_strided_slice %4 {offsets = [0, 0], sizes = [32, 128], strides = [1, 1]} : vector<72x128xf32> to vector<32x128xf32>
    %6 = vector.extract_strided_slice %4 {offsets = [32, 0], sizes = [32, 32], strides = [1, 1]} : vector<72x128xf32> to vector<32x32xf32>
    %7 = vector.extract_strided_slice %4 {offsets = [64, 0], sizes = [1, 128], strides = [1, 1]} : vector<72x128xf32> to vector<1x128xf32>
    %8 = vector.extract_strided_slice %4 {offsets = [65, 0], sizes = [1, 32], strides = [1, 1]} : vector<72x128xf32> to vector<1x32xf32>
    %9 = vector.extract_strided_slice %4 {offsets = [66, 0], sizes = [1, 32], strides = [1, 1]} : vector<72x128xf32> to vector<1x32xf32>
    %10 = vector.extract_strided_slice %4 {offsets = [67, 0], sizes = [1, 32], strides = [1, 1]} : vector<72x128xf32> to vector<1x32xf32>
    %11 = vector.extract_strided_slice %4 {offsets = [68, 0], sizes = [1, 32], strides = [1, 1]} : vector<72x128xf32> to vector<1x32xf32>
    %12 = vector.extract_strided_slice %4 {offsets = [69, 0], sizes = [1, 32], strides = [1, 1]} : vector<72x128xf32> to vector<1x32xf32>
    %13 = vector.shape_cast %0 : vector<4x16x32xf32> to vector<64x32xf32>
    %cst = arith.constant dense<0.000000e+00> : vector<64x128xf32>
    %14 = tpu.matmul %13, %5, %cst {dimension_numbers = #tpu.dot_dimension_numbers<[1], [0], [0], [1], [0, 0, 1, 1], [], []>} : vector<64x32xf32>, vector<32x128xf32>, vector<64x128xf32> -> vector<64x128xf32>
    %15 = vector.broadcast %7 : vector<1x128xf32> to vector<64x128xf32>
    %16 = arith.addf %14, %15 : vector<64x128xf32>
    %17 = vector.shape_cast %16 : vector<64x128xf32> to vector<4x16x128xf32>
    %18 = vector.shape_cast %1 : vector<4x64x32xf32> to vector<256x32xf32>
    %cst_10 = arith.constant dense<0.000000e+00> : vector<256x32xf32>
    %19 = tpu.matmul %18, %6, %cst_10 {dimension_numbers = #tpu.dot_dimension_numbers<[1], [0], [0], [1], [0, 0, 1, 1], [], []>} : vector<256x32xf32>, vector<32x32xf32>, vector<256x32xf32> -> vector<256x32xf32>
    %20 = vector.broadcast %8 : vector<1x32xf32> to vector<256x32xf32>
    %21 = arith.addf %19, %20 : vector<256x32xf32>
    %22 = vector.shape_cast %21 : vector<256x32xf32> to vector<4x64x32xf32>
    %23 = vector.extract_strided_slice %3 {offsets = [0, 0, 0], sizes = [4, 64, 16], strides = [1, 1, 1]} : vector<4x64x32xf32> to vector<4x64x16xf32>
    %24 = vector.extract_strided_slice %3 {offsets = [0, 0, 16], sizes = [4, 64, 16], strides = [1, 1, 1]} : vector<4x64x32xf32> to vector<4x64x16xf32>
    %25 = vector.extract_strided_slice %17 {offsets = [0, 0, 0], sizes = [4, 16, 64], strides = [1, 1, 1]} : vector<4x16x128xf32> to vector<4x16x64xf32>
    "tpu.trace_start"() <{level = 10 : i32, message = "ben,bnf->bef"}> : () -> ()
    %cst_11 = arith.constant dense<0.000000e+00> : vector<4x64x64xf32>
    %26 = tpu.matmul %23, %25, %cst_11 {dimension_numbers = #tpu.dot_dimension_numbers<[2], [1], [1], [2], [0, 0, 0, 1, 1, 2], [0], [0]>} : vector<4x64x16xf32>, vector<4x16x64xf32>, vector<4x64x64xf32> -> vector<4x64x64xf32>
    "tpu.trace_stop"() : () -> ()
    %27 = vector.extract_strided_slice %17 {offsets = [0, 0, 64], sizes = [4, 16, 32], strides = [1, 1, 1]} : vector<4x16x128xf32> to vector<4x16x32xf32>
    "tpu.trace_start"() <{level = 10 : i32, message = "ben,bnf->bef"}> : () -> ()
    %cst_12 = arith.constant dense<0.000000e+00> : vector<4x64x32xf32>
    %28 = tpu.matmul %24, %27, %cst_12 {dimension_numbers = #tpu.dot_dimension_numbers<[2], [1], [1], [2], [0, 0, 0, 1, 1, 2], [0], [0]>} : vector<4x64x16xf32>, vector<4x16x32xf32>, vector<4x64x32xf32> -> vector<4x64x32xf32>
    "tpu.trace_stop"() : () -> ()
    %29 = vector.extract_strided_slice %26 {offsets = [0, 0, 0], sizes = [4, 64, 32], strides = [1, 1, 1]} : vector<4x64x64xf32> to vector<4x64x32xf32>
    %30 = arith.addf %29, %28 : vector<4x64x32xf32>
    %31 = arith.addf %30, %22 : vector<4x64x32xf32>
    %32 = vector.extract_strided_slice %26 {offsets = [0, 0, 32], sizes = [4, 64, 32], strides = [1, 1, 1]} : vector<4x64x64xf32> to vector<4x64x32xf32>
    %33 = arith.negf %31 : vector<4x64x32xf32>
    %34 = math.exp %33 : vector<4x64x32xf32>
    %cst_13 = arith.constant 1.000000e+00 : f32
    %35 = vector.broadcast %cst_13 : f32 to vector<4x64x32xf32>
    %36 = arith.addf %35, %34 : vector<4x64x32xf32>
    %37 = arith.divf %35, %36 : vector<4x64x32xf32>
    "tpu.trace_start"() <{level = 10 : i32, message = "ben,bed->bnd"}> : () -> ()
    %cst_14 = arith.constant dense<0.000000e+00> : vector<4x16x32xf32>
    %38 = tpu.matmul %24, %37, %cst_14 {dimension_numbers = #tpu.dot_dimension_numbers<[1], [1], [2], [2], [0, 0, 0, 2, 1, 2], [0], [0]>} : vector<4x64x16xf32>, vector<4x64x32xf32>, vector<4x16x32xf32> -> vector<4x16x32xf32>
    "tpu.trace_stop"() : () -> ()
    %39 = arith.mulf %37, %32 : vector<4x64x32xf32>
    "tpu.trace_start"() <{level = 10 : i32, message = "ben,bed->bnd"}> : () -> ()
    %cst_15 = arith.constant dense<0.000000e+00> : vector<4x16x32xf32>
    %40 = tpu.matmul %24, %39, %cst_15 {dimension_numbers = #tpu.dot_dimension_numbers<[1], [1], [2], [2], [0, 0, 0, 2, 1, 2], [0], [0]>} : vector<4x64x16xf32>, vector<4x64x32xf32>, vector<4x16x32xf32> -> vector<4x16x32xf32>
    "tpu.trace_stop"() : () -> ()
    %cst_16 = arith.constant 9.99999997E-7 : f32
    %41 = vector.broadcast %cst_16 : f32 to vector<4x16x32xf32>
    %42 = arith.addf %38, %41 : vector<4x16x32xf32>
    %43 = tpu.reciprocal %42 : vector<4x16x32xf32> -> vector<4x16x32xf32>
    %44 = arith.mulf %40, %43 : vector<4x16x32xf32>
    %45 = vector.extract_strided_slice %17 {offsets = [0, 0, 96], sizes = [4, 16, 32], strides = [1, 1, 1]} : vector<4x16x128xf32> to vector<4x16x32xf32>
    %46 = arith.addf %45, %44 : vector<4x16x32xf32>
    %cst_17 = arith.constant dense<0.000000e+00> : vector<4x16xf32>
    %47 = vector.multi_reduction <add>, %46, %cst_17 [2] : vector<4x16x32xf32> to vector<4x16xf32>
    %48 = vector.shape_cast %47 : vector<4x16xf32> to vector<4x16x1xf32>
    %cst_18 = arith.constant 3.200000e+01 : f32
    %49 = vector.broadcast %cst_18 : f32 to vector<4x16x1xf32>
    %50 = arith.divf %48, %49 : vector<4x16x1xf32>
    %51 = arith.mulf %46, %46 : vector<4x16x32xf32>
    %cst_19 = arith.constant dense<0.000000e+00> : vector<4x16xf32>
    %52 = vector.multi_reduction <add>, %51, %cst_19 [2] : vector<4x16x32xf32> to vector<4x16xf32>
    %53 = vector.shape_cast %52 : vector<4x16xf32> to vector<4x16x1xf32>
    %cst_20 = arith.constant 3.200000e+01 : f32
    %54 = vector.broadcast %cst_20 : f32 to vector<4x16x1xf32>
    %55 = arith.divf %53, %54 : vector<4x16x1xf32>
    %56 = arith.mulf %50, %50 : vector<4x16x1xf32>
    %57 = arith.subf %55, %56 : vector<4x16x1xf32>
    %58 = vector.broadcast %50 : vector<4x16x1xf32> to vector<4x16x32xf32>
    %59 = arith.subf %46, %58 : vector<4x16x32xf32>
    %cst_21 = arith.constant 9.99999974E-6 : f32
    %60 = vector.broadcast %cst_21 : f32 to vector<4x16x1xf32>
    %61 = arith.addf %57, %60 : vector<4x16x1xf32>
    %62 = math.rsqrt %61 : vector<4x16x1xf32>
    %63 = vector.broadcast %62 : vector<4x16x1xf32> to vector<4x16x32xf32>
    %64 = arith.mulf %59, %63 : vector<4x16x32xf32>
    %65 = vector.shape_cast %9 : vector<1x32xf32> to vector<1x1x32xf32>
    %66 = vector.broadcast %65 : vector<1x1x32xf32> to vector<4x16x32xf32>
    %67 = arith.mulf %64, %66 : vector<4x16x32xf32>
    %68 = vector.shape_cast %10 : vector<1x32xf32> to vector<1x1x32xf32>
    %69 = vector.broadcast %68 : vector<1x1x32xf32> to vector<4x16x32xf32>
    %70 = arith.addf %67, %69 : vector<4x16x32xf32>
    %71 = arith.negf %70 : vector<4x16x32xf32>
    %72 = math.exp %71 : vector<4x16x32xf32>
    %cst_22 = arith.constant 1.000000e+00 : f32
    %73 = vector.broadcast %cst_22 : f32 to vector<4x16x32xf32>
    %74 = arith.addf %73, %72 : vector<4x16x32xf32>
    %75 = arith.divf %73, %74 : vector<4x16x32xf32>
    %76 = arith.mulf %70, %75 : vector<4x16x32xf32>
    %77 = arith.addf %0, %76 : vector<4x16x32xf32>
    %c0_23 = arith.constant 0 : index
    %c0_24 = arith.constant 0 : index
    %c0_25 = arith.constant 0 : index
    %78 = vector.load %arg5[%c0_23, %c0_24, %c0_25] : memref<4x16x32xf32, #tpu.memory_space<vmem>>, vector<4x16x32xf32>
    tpu.vector_store %arg5[%c0_23, %c0_24, %c0_25], %77 {strides = array<i32>} : memref<4x16x32xf32, #tpu.memory_space<vmem>>, vector<4x16x32xf32>,
    %cst_26 = arith.constant dense<0.000000e+00> : vector<4x64xf32>
    %79 = vector.multi_reduction <add>, %31, %cst_26 [2] : vector<4x64x32xf32> to vector<4x64xf32>
    %80 = vector.shape_cast %79 : vector<4x64xf32> to vector<4x64x1xf32>
    %cst_27 = arith.constant 3.200000e+01 : f32
    %81 = vector.broadcast %cst_27 : f32 to vector<4x64x1xf32>
    %82 = arith.divf %80, %81 : vector<4x64x1xf32>
    %83 = arith.mulf %31, %31 : vector<4x64x32xf32>
    %cst_28 = arith.constant dense<0.000000e+00> : vector<4x64xf32>
    %84 = vector.multi_reduction <add>, %83, %cst_28 [2] : vector<4x64x32xf32> to vector<4x64xf32>
    %85 = vector.shape_cast %84 : vector<4x64xf32> to vector<4x64x1xf32>
    %cst_29 = arith.constant 3.200000e+01 : f32
    %86 = vector.broadcast %cst_29 : f32 to vector<4x64x1xf32>
    %87 = arith.divf %85, %86 : vector<4x64x1xf32>
    %88 = arith.mulf %82, %82 : vector<4x64x1xf32>
    %89 = arith.subf %87, %88 : vector<4x64x1xf32>
    %90 = vector.broadcast %82 : vector<4x64x1xf32> to vector<4x64x32xf32>
    %91 = arith.subf %31, %90 : vector<4x64x32xf32>
    %cst_30 = arith.constant 9.99999974E-6 : f32
    %92 = vector.broadcast %cst_30 : f32 to vector<4x64x1xf32>
    %93 = arith.addf %89, %92 : vector<4x64x1xf32>
    %94 = math.rsqrt %93 : vector<4x64x1xf32>
    %95 = vector.broadcast %94 : vector<4x64x1xf32> to vector<4x64x32xf32>
    %96 = arith.mulf %91, %95 : vector<4x64x32xf32>
    %97 = vector.shape_cast %11 : vector<1x32xf32> to vector<1x1x32xf32>
    %98 = vector.broadcast %97 : vector<1x1x32xf32> to vector<4x64x32xf32>
    %99 = arith.mulf %96, %98 : vector<4x64x32xf32>
    %100 = vector.shape_cast %12 : vector<1x32xf32> to vector<1x1x32xf32>
    %101 = vector.broadcast %100 : vector<1x1x32xf32> to vector<4x64x32xf32>
    %102 = arith.addf %99, %101 : vector<4x64x32xf32>
    %103 = arith.negf %102 : vector<4x64x32xf32>
    %104 = math.exp %103 : vector<4x64x32xf32>
    %cst_31 = arith.constant 1.000000e+00 : f32
    %105 = vector.broadcast %cst_31 : f32 to vector<4x64x32xf32>
    %106 = arith.addf %105, %104 : vector<4x64x32xf32>
    %107 = arith.divf %105, %106 : vector<4x64x32xf32>
    %108 = arith.mulf %102, %107 : vector<4x64x32xf32>
    %109 = arith.addf %1, %108 : vector<4x64x32xf32>
    %c0_32 = arith.constant 0 : index
    %c0_33 = arith.constant 0 : index
    %c0_34 = arith.constant 0 : index
    %110 = vector.load %arg6[%c0_32, %c0_33, %c0_34] : memref<4x64x32xf32, #tpu.memory_space<vmem>>, vector<4x64x32xf32>
    tpu.vector_store %arg6[%c0_32, %c0_33, %c0_34], %109 {strides = array<i32>} : memref<4x64x32xf32, #tpu.memory_space<vmem>>, vector<4x64x32xf32>,
    return
  }
  func.func @transform_0(%arg0: i32) -> (i32, i32, i32) {
    %c0_i32 = arith.constant 0 : i32
    %c0_i32_0 = arith.constant 0 : i32
    %c0_i32_1 = arith.constant 0 : i32
    return %arg0, %c0_i32, %c0_i32_0 : i32, i32, i32
  }
  func.func @transform_1(%arg0: i32) -> (i32, i32, i32) {
    %c0_i32 = arith.constant 0 : i32
    %c0_i32_0 = arith.constant 0 : i32
    %c0_i32_1 = arith.constant 0 : i32
    return %arg0, %c0_i32, %c0_i32_0 : i32, i32, i32
  }
  func.func @transform_2(%arg0: i32) -> (i32, i32, i32) {
    %c0_i32 = arith.constant 0 : i32
    %c0_i32_0 = arith.constant 0 : i32
    %c0_i32_1 = arith.constant 0 : i32
    return %arg0, %c0_i32, %c0_i32_0 : i32, i32, i32
  }
  func.func @transform_3(%arg0: i32) -> (i32, i32) {
    %c0_i32 = arith.constant 0 : i32
    %c0_i32_0 = arith.constant 0 : i32
    %c0_i32_1 = arith.constant 0 : i32
    return %c0_i32, %c0_i32_0 : i32, i32
  }
  func.func @transform_4(%arg0: i32) -> (i32, i32, i32) {
    %c0_i32 = arith.constant 0 : i32
    %c0_i32_0 = arith.constant 0 : i32
    %c0_i32_1 = arith.constant 0 : i32
    return %arg0, %c0_i32, %c0_i32_0 : i32, i32, i32
  }
  func.func @transform_5(%arg0: i32) -> (i32, i32, i32) {
    %c0_i32 = arith.constant 0 : i32
    %c0_i32_0 = arith.constant 0 : i32
    %c0_i32_1 = arith.constant 0 : i32
    return %arg0, %c0_i32, %c0_i32_0 : i32, i32, i32
  }
}

</mosaic_0001>

<bundles_post_ra>
// kernel: edge_gated_graph_conv.1
= control target key start
LH: loop header
LB: loop body
LE: loop exit
PB: predicated region body
PF: predicated region fallthrough
CT: control target
= control target key end

     0   :  { %s5697_s18 = smov 0   ;;  %s9730_s0 = inlined_call_operand.vmem [shape: f32[8,16,32], index: 0, kind: input, shape index: {}, may-alias: {0,4}]   ;;  %s9731_s1 = inlined_call_operand.vmem [shape: f32[8,64,32], index: 1, kind: input, shape index: {}, may-alias: {1,5}]   ;;  %s9732_s2 = inlined_call_operand.vmem [shape: bf16[8,64,32], index: 2, kind: input, shape index: {}]   ;;  %s9733_s3 = inlined_call_operand.vmem [shape: f32[72,128], index: 3, kind: input, shape index: {}]   ;;  %s9734_s4 = inlined_call_operand.vmem [shape: f32[8,16,32], index: 4, kind: output, shape index: {0}, may-alias: {0,4}]   ;;  %s9735_s5 = inlined_call_operand.vmem [shape: f32[8,64,32], index: 5, kind: output, shape index: {1}, may-alias: {1,5}]  }
   0x1 LB: > { %s4788_s19 = sadd.s32 4294967295, %s5660_s18   ;;  %p4792_p0 = scmp.ge.s32.totalorder %s5660_s18, 1  ;;  %s5660_s18 = sphi %s5697_s18, %s16_s18  }
   0x2   : > { %p216_p1 = scmp.lt.s32.totalorder %s5660_s18, 3 }
   0x4   : > { %p217_p2 = pnand %p4792_p0, %p216_p1 }
   0x6   : > { %220 = sbr.rel (%p217_p2) target bundleno = 1645 (0x66d), region = 36 }
   0xb   : > { %v406_v0 = vld [vmem:[%s9733_s3 + $0x18] sm:$0xff]  ;;  %v405_v1 = vld [vmem:[%s9733_s3 + $0x10] sm:$0xff]  ;;  %s4793_s24 = sshll.u32 %s4788_s19, 2  ;;  %v404_v2 = vld [vmem:[%s9733_s3 + $0x8] sm:$0xff]  ;;  %vm413_vm0 = vcmask 261120   ;;  %s5662_s12 = smov 112  }
   0xc   : > { %450 = vmatpush.msra.mxu0 %v406_v0  ;;  %p265_p3 = scmp.lt.s32.totalorder %s4793_s24, 7  ;;  %v403_v3 = vld [vmem:[%s9733_s3] sm:$0xff]  ;;  %vm689_vm1 = vcmask 130048   ;;  %s5663_s30 = smov 64  }
   0xd   : > { %s5664_s6 = smov 96  }
   0xe   : > { %451 = vmatpush.msra.mxu0 %v405_v1  ;;  %s10312_s24 = smov (!%p265_p3, %s4793_s24), 7 }
   0xf   : > { %s5002_s29 = sshll.u32 %s10312_s24, 4  ;;  %s5004_s8 = sshll.u32 %s10312_s24, 5 }
  0x10   : > { %452 = vmatpush.msra.mxu0 %v404_v2  ;;  %s5725_s7 = scalar_lea.vmem %s9730_s0, %s5002_s29  ;;  %s5740_s11 = scalar_lea.vmem %s9732_s2, %s5004_s8  ;;  %v410_v2 = vld [vmem:[%s9733_s3 + $0x38] sm:$0xff] }
  0x11   : > { %v299_v4 = vld [vmem:[%s5725_s7] sm:$0xff]  ;;  %v300_v5 = vld [vmem:[%s5725_s7 + $0x8] sm:$0xff]  ;;  %v5732_v6 = vld [vmem:[%s5725_s7 + $0x10] sm:$0xff]  ;;  %s5003_s13 = sshll.u32 %s10312_s24, 6  ;;  %5086 = vmatpush.msra.mxu1 %v410_v2  ;;  %s9668_s16 = scalar_lea.vmem %s9734_s4, %s5002_s29 }
  0x12   : > { %453 = vmatpush.msra.mxu0 %v403_v3  ;;  %9903 = vst [vmem:[#allocation2_spill] sm:$0xff] %v5732_v6  ;;  %v302_v7 = vld [vmem:[%s5725_s7 + $0x18] sm:$0xff]  ;;  %v5745_v8 = vld [vmem:[%s5740_s11] sm:$0xff]   ;;  %v5748_v9 = vld [vmem:[%s5740_s11 + $0x8] sm:$0xff]   ;;  %s5909_s19 = scalar_lea.vmem %s9731_s1, %s5003_s13 }
  0x13   : > { %4808 = vmatmul.msk.f32.vlgmr.msra.gmra.mxu0 %vm413_vm0, %v299_v4  ;;  %v5009_v10 = vunpack.c.l.bf16 %v5745_v8  ;;  %v5010_v11 = vunpack.c.h.bf16 %v5745_v8  ;;  %v5753_v12 = vld [vmem:[%s5740_s11 + $0x18] sm:$0xff]   ;;  %v5756_v13 = vld [vmem:[%s5740_s11 + $0x28] sm:$0xff]   ;;  %v5013_v14 = vunpack.c.l.bf16 %v5748_v9  ;;  %v5014_v15 = vunpack.c.h.bf16 %v5748_v9  ;;  %v5765_v17 = vld [vmem:[%s5740_s11 + $0x10] sm:$0xff]  }
  0x14   : > { %v5021_v19 = vunpack.c.l.bf16 %v5753_v12  ;;  %v5022_v20 = vunpack.c.h.bf16 %v5753_v12  ;;  %v5774_v21 = vld [vmem:[%s5725_s7 + $0x20] sm:$0xff]  ;;  %v5029_v22 = vunpack.c.l.bf16 %v5756_v13  ;;  %v5030_v23 = vunpack.c.h.bf16 %v5756_v13  ;;  %v5799_v31 = vld [vmem:[%s5740_s11 + $0x38] sm:$0xff]   ;;  %v5816_v36 = vld [vmem:[%s5725_s7 + $0x28] sm:$0xff]  ;;  %588 = vmatpush.msrb.mxu0 %v410_v2 }
  0x15   : > { %v5104_v16 = vpack.i.bf16 %v5010_v11, %v5009_v10  ;;  %v5109_v18 = vpack.i.bf16 %v5014_v15, %v5013_v14  ;;  %9904 = vst [vmem:[#allocation3_spill] sm:$0xff] %v5774_v21  ;;  %v5780_v24 = vld [vmem:[%s5740_s11 + $0x20] sm:$0xff]   ;;  %v5017_v25 = vunpack.c.l.bf16 %v5765_v17  ;;  %v5018_v26 = vunpack.c.h.bf16 %v5765_v17  ;;  %v5822_v39 = vld [vmem:[%s5740_s11 + $0x30] sm:$0xff]   ;;  %v5841_v46 = vld [vmem:[%s5740_s11 + $0x48] sm:$0xff]  }
  0x16   : > { %v5119_v27 = vpack.i.bf16 %v5022_v20, %v5021_v19  ;;  %v5025_v28 = vunpack.c.l.bf16 %v5780_v24  ;;  %v5026_v29 = vunpack.c.h.bf16 %v5780_v24  ;;  %v5129_v30 = vpack.i.bf16 %v5030_v23, %v5029_v22  ;;  %v5806_v33 = vld [vmem:[%s5740_s11 + $0x40] sm:$0xff]   ;;  %9905 = vst [vmem:[#allocation4_spill] sm:$0xff] %v5816_v36  ;;  %v5844_v47 = vld [vmem:[%s5740_s11 + $0x68] sm:$0xff]   ;;  %v5851_v49 = vld [vmem:[%s5725_s7 + $0x30] sm:$0xff] }
  0x17   : > { %5105 = vrot.lane.b32.xlu0 %v5104_v16, %s5662_s12  ;;  %5110 = vrot.lane.b32.xlu1 %v5109_v18, %s5662_s12  ;;  %v5114_v32 = vpack.i.bf16 %v5018_v26, %v5017_v25  ;;  %v5809_v34 = vld [vmem:[%s5740_s11 + $0x60] sm:$0xff]   ;;  %v5037_v37 = vunpack.c.l.bf16 %v5799_v31  ;;  %v5038_v38 = vunpack.c.h.bf16 %v5799_v31  ;;  %v5041_v40 = vunpack.c.l.bf16 %v5806_v33  ;;  %9906 = vst [vmem:[#allocation5_spill] sm:$0xff] %v5851_v49  ;;  %v5871_v56 = vld [vmem:[%s5725_s7 + $0x38] sm:$0xff] }
  0x18   : > { %5120 = vrot.lane.b32.xlu2 %v5119_v27, %s5662_s12  ;;  %v5124_v35 = vpack.i.bf16 %v5026_v29, %v5025_v28  ;;  %v5057_v41 = vunpack.c.l.bf16 %v5809_v34  ;;  %v5033_v42 = vunpack.c.l.bf16 %v5822_v39  ;;  %v5034_v43 = vunpack.c.h.bf16 %v5822_v39  ;;  %9907 = vst [vmem:[#allocation6_spill] sm:$0xff] %v5871_v56  ;;  %v5878_v57 = vld [vmem:[%s5740_s11 + $0x58] sm:$0xff]   ;;  %v5881_v58 = vld [vmem:[%s5740_s11 + $0x70] sm:$0xff]   ;;  %v408_v27 = vld [vmem:[%s9733_s3 + $0x28] sm:$0xff] }
  0x19   : > { %v5139_v44 = vpack.i.bf16 %v5038_v38, %v5037_v37  ;;  %v5046_v50 = vunpack.c.h.bf16 %v5841_v46  ;;  %v5062_v51 = vunpack.c.h.bf16 %v5844_v47  ;;  %v5042_v52 = vunpack.c.h.bf16 %v5806_v33  ;;  %v5891_v62 = vld [vmem:[%s5740_s11 + $0x50] sm:$0xff]   ;;  %v5915_v4 = vld [vmem:[%s5740_s11 + $0x78] sm:$0xff]  }
  0x1a   : > { %v5144_v45 = vpack.i.bf16 %v5057_v41, %v5041_v40  ;;  %v5134_v48 = vpack.i.bf16 %v5034_v43, %v5033_v42  ;;  %v5058_v53 = vunpack.c.h.bf16 %v5809_v34  ;;  %v5054_v59 = vunpack.c.h.bf16 %v5878_v57  ;;  %v409_v3 = vld [vmem:[%s9733_s3 + $0x30] sm:$0xff]  ;;  %v6122_v31 = vld [vmem:[%s5909_s19 + $0x78] sm:$0xff] }
  0x1b   : > { %4809 = vmatmul.msk.f32.gmra.mxu0 %vm413_vm0, %v300_v5  ;;  %v5159_v54 = vpack.i.bf16 %v5062_v51, %v5046_v50  ;;  %v5066_v60 = vunpack.c.h.bf16 %v5881_v58  ;;  %v5049_v63 = vunpack.c.l.bf16 %v5891_v62  ;;  %v5065_v0 = vunpack.c.l.bf16 %v5881_v58  ;;  %5087 = vmatpush.msra.mxu1 %v409_v3  ;;  %9923 = vst [vmem:[#allocation22_spill] sm:$0xff] %v6122_v31  ;;  %v6270_v58 = vld [vmem:[%s5909_s19 + $0xa8] sm:$0xff] }
  0x1c   : > { %v5149_v55 = vpack.i.bf16 %v5058_v53, %v5042_v52  ;;  %v5045_v5 = vunpack.c.l.bf16 %v5841_v46  ;;  %v5069_v16 = vunpack.c.l.bf16 %v5915_v4  ;;  %v9744_v18 = vunpack.c.h.bf16 %v5915_v4  ;;  %589 = vmatpush.msrb.mxu0 %v409_v3  ;;  %9929 = vst [vmem:[#allocation28_spill] sm:$0xff] %v6270_v58 }
  0x1d   : > { %v5174_v61 = vpack.i.bf16 %v5054_v59, %v5066_v60  ;;  %v5164_v1 = vpack.i.bf16 %v5065_v0, %v5049_v63  ;;  %5088 = vmatpush.msra.mxu1 %v408_v27  ;;  %v5050_v2 = vunpack.c.h.bf16 %v5891_v62  ;;  %v5053_v3 = vunpack.c.l.bf16 %v5878_v57 }
  0x1e   : > { %590 = vmatpush.msrb.mxu0 %v408_v27 }
  0x1f   : > { %5130 = vrot.lane.b32.xlu0 %v5129_v30, %s5662_s12  ;;  %5115 = vrot.lane.b32.xlu1 %v5114_v32, %s5662_s12  ;;  %v407_v30 = vld [vmem:[%s9733_s3 + $0x20] sm:$0xff] }
  0x20   : > { %5125 = vrot.lane.b32.xlu2 %v5124_v35, %s5662_s12  ;;  %v5179_v35 = vpack.i.bf16 %v9744_v18, %v5069_v16  ;;  %5089 = vmatpush.msra.mxu1 %v407_v30 }
  0x21   : > { %591 = vmatpush.msrb.mxu0 %v407_v30 }
  0x23   : > { %4810 = vmatmul.msk.f32.gmra.mxu0 %vm413_vm0, %v5732_v6 }
  0x27   : > { %5140 = vrot.lane.b32.xlu0 %v5139_v44, %s5662_s12  ;;  %5145 = vrot.lane.b32.xlu1 %v5144_v45, %s5662_s12  ;;  %v309_v44 = vld [vmem:[%s5909_s19 + $0x10] sm:$0xff]  ;;  %v310_v45 = vld [vmem:[%s5909_s19 + $0x18] sm:$0xff] }
  0x28   : > { %5135 = vrot.lane.b32.xlu2 %v5134_v48, %s5662_s12  ;;  %4818 = vmatmul.msk.f32.vlgmr.msra.gmra.mxu1 %vm413_vm0, %v309_v44  ;;  %v312_v44 = vld [vmem:[%s5909_s19 + $0x28] sm:$0xff] }
  0x2b   : > { %4811 = vmatmul.msk.f32.gmra.mxu0 %vm413_vm0, %v302_v7  ;;  %v5061_v7 = vunpack.c.l.bf16 %v5844_v47 }
  0x2d   : > { %v5154_v32 = vpack.i.bf16 %v5061_v7, %v5045_v5 }
  0x2f   : > { %5160 = vrot.lane.b32.xlu0 %v5159_v54, %s5662_s12  ;;  %5150 = vrot.lane.b32.xlu1 %v5149_v55, %s5662_s12  ;;  %v5944_v54 = vld [vmem:[%s9733_s3 + $0x40] sm:$0xff] }
  0x30   : > { %5155 = vrot.lane.b32.xlu2 %v5154_v32, %s5662_s12  ;;  %4819 = vmatmul.msk.f32.gmra.mxu1 %vm413_vm0, %v310_v45  ;;  %v311_v55 = vld [vmem:[%s5909_s19 + $0x20] sm:$0xff]  ;;  %v5169_v32 = vpack.i.bf16 %v5053_v3, %v5050_v2 }
  0x33   : > { %4812 = vmatmul.msk.f32.gmra.mxu0 %vm413_vm0, %v5774_v21 }
  0x37   : > { %5175 = vrot.lane.b32.xlu0 %v5174_v61, %s5662_s12  ;;  %5165 = vrot.lane.b32.xlu1 %v5164_v1, %s5662_s12  ;;  %v412_v61 = vperm.slane %v5944_v54, 0 }
  0x38   : > { %4820 = vmatmul.msk.f32.gmra.mxu1 %vm413_vm0, %v311_v55  ;;  %5170 = vrot.lane.b32.xlu2 %v5169_v32, %s5662_s12 }
  0x3b   : > { %4813 = vmatmul.msk.f32.gmra.mxu0 %vm413_vm0, %v5816_v36 }
  0x3f   : > { %5180 = vrot.lane.b32.xlu1 %v5179_v35, %s5662_s12  ;;  %s8115_s12 = scalar_lea.vmem %s9735_s5, %s5003_s13  ;;  %s5666_s13 = smov 32  }
  0x40   : > { %4821 = vmatmul.msk.f32.gmra.mxu1 %vm413_vm0, %v312_v44 }
  0x43   : > { %4814 = vmatmul.msk.f32.gmra.mxu0 %vm413_vm0, %v5851_v49  ;;  %v6398_v49 = vld [vmem:[%s5909_s19 + $0xd8] sm:$0xff] }
  0x44   : > { %9947 = vst [vmem:[#allocation34_spill] sm:$0xff] %v6398_v49 }
  0x4b   : > { %4815 = vmatmul.msk.f32.gmra.mxu0 %vm413_vm0, %v5871_v56 }
  0x72   : > { %v6046_v13 = vpop.permute.xlu2 %5120 }
  0x89   : > { %v6056_v17 = vpop.permute.xlu1 %5110 }
  0x90   : > { %v455_v48 = vpop.f32.mrf.mxu0 }
  0x91   : > { %v5951_v27 = vadd.f32 %v455_v48, %v412_v61  ;;  %v313_v48 = vld [vmem:[%s5909_s19 + $0x30] sm:$0xff]  ;;  %v6075_v12 = vpop.permute.xlu1 %5115 }
  0x92   : > { %4822 = vmatmul.msk.f32.gmra.mxu1 %vm413_vm0, %v313_v48 }
  0x93   : > { %9908 = vst [vmem:[#allocation7_spill] sm:$0xff] %v5951_v27 }
  0x98   : > { %v458_v1 = vpop.f32.mrf.mxu0 }
  0x99   : > { %v5953_v30 = vadd.f32 %v458_v1, %v412_v61 }
  0x9b   : > { %9909 = vst [vmem:[#allocation8_spill] sm:$0xff] %v5953_v30  ;;  %728 = vmatpush.msra.mxu2 %v5953_v30  ;;  %v5184_v35 = vpack.i.bf16 %v5951_v27, %v5953_v30 }
  0x9d   : > { %5185 = vrot.lane.b32.xlu0 %v5184_v35, %s5663_s30  ;;  %729 = vmatpush.msra.mxu2 %v5951_v27  ;;  %v314_v35 = vld [vmem:[%s5909_s19 + $0x38] sm:$0xff] }
  0x9e   : > { %4848 = vmatmul.msk.f32.vlgmr.msra.gmra.mxu2 %vm689_vm1, %v5009_v10  ;;  %4823 = vmatmul.msk.f32.gmra.mxu1 %vm413_vm0, %v314_v35  ;;  %v307_v35 = vld [vmem:[%s5909_s19] sm:$0xff] }
  0x9f   : > { %4816 = vmatmul.msk.f32.vlgmr.msrb.gmra.mxu0 %vm413_vm0, %v307_v35 }
  0xa0   : > { %v461_v45 = vpop.f32.mrf.mxu0 }
  0xa1   : > { %v5975_v1 = vadd.f32 %v461_v45, %v412_v61  ;;  %v6009_v45 = vld [vmem:[%s5909_s19 + $0x48] sm:$0xff] }
  0xa2   : > { %9915 = vst [vmem:[#allocation14_spill] sm:$0xff] %v6009_v45 }
  0xa3   : > { %9910 = vst [vmem:[#allocation9_spill] sm:$0xff] %v5975_v1 }
  0xa5   : > { %v6186_v46 = vpop.f32.mrf.mxu1 }
  0xa6   : > { %4849 = vmatmul.msk.f32.gmra.mxu2 %vm689_vm1, %v5010_v11  ;;  %v5993_v11 = vld [vmem:[%s5909_s19 + $0x40] sm:$0xff] }
  0xa7   : > { %9912 = vst [vmem:[#allocation11_spill] sm:$0xff] %v5993_v11  ;;  %4824 = vmatmul.msk.f32.gmra.mxu1 %vm413_vm0, %v5993_v11 }
  0xa8   : > { %v464_v55 = vpop.f32.mrf.mxu0 }
  0xa9   : > { %v5977_v32 = vadd.f32 %v464_v55, %v412_v61  ;;  %v6042_v55 = vld [vmem:[%s5909_s19 + $0x58] sm:$0xff] }
  0xaa   : > { %9919 = vst [vmem:[#allocation18_spill] sm:$0xff] %v6042_v55 }
  0xab   : > { %9911 = vst [vmem:[#allocation10_spill] sm:$0xff] %v5977_v32  ;;  %793 = vmatpush.msra.mxu3 %v5977_v32  ;;  %v5189_v10 = vpack.i.bf16 %v5975_v1, %v5977_v32  ;;  %v6479_v32 = vld [vmem:[%s5909_s19 + $0xf8] sm:$0xff] }
  0xac   : > { %9963 = vst [vmem:[#allocation39_spill] sm:$0xff] %v6479_v32 }
  0xad   : > { %5190 = vrot.lane.b32.xlu1 %v5189_v10, %s5663_s30  ;;  %794 = vmatpush.msra.mxu3 %v5975_v1 }
  0xae   : > { %4850 = vmatmul.msk.f32.gmra.mxu2 %vm689_vm1, %v5013_v14  ;;  %4856 = vmatmul.msk.f32.vlgmr.msra.gmra.mxu3 %vm689_vm1, %v5025_v28 }
  0xaf   : > { %4825 = vmatmul.msk.f32.gmra.mxu1 %vm413_vm0, %v6009_v45 }
  0xb0   : > { %v467_v8 = vpop.f32.mrf.mxu0 }
  0xb1   : > { %v6005_v28 = vadd.f32 %v467_v8, %v412_v61  ;;  %v6106_v8 = vpop.permute.xlu1 %5145 }
  0xb3   : > { %9914 = vst [vmem:[#allocation13_spill] sm:$0xff] %v6005_v28 }
  0xb6   : > { %4851 = vmatmul.msk.f32.gmra.mxu2 %vm689_vm1, %v5014_v15  ;;  %4857 = vmatmul.msk.f32.gmra.mxu3 %vm689_vm1, %v5026_v29  ;;  %v6025_v29 = vld [vmem:[%s5909_s19 + $0x50] sm:$0xff] }
  0xb7   : > { %9917 = vst [vmem:[#allocation16_spill] sm:$0xff] %v6025_v29  ;;  %4826 = vmatmul.msk.f32.gmra.mxu1 %vm413_vm0, %v6025_v29 }
  0xb8   : > { %v470_v14 = vpop.f32.mrf.mxu0 }
  0xb9   : > { %v6003_v44 = vadd.f32 %v470_v14, %v412_v61 }
  0xbb   : > { %9913 = vst [vmem:[#allocation12_spill] sm:$0xff] %v6003_v44  ;;  %858 = vmatpush.msrb.mxu2 %v6003_v44 }
  0xbd   : > { %859 = vmatpush.msrb.mxu2 %v6005_v28 }
  0xbe   : > { %4852 = vmatmul.msk.f32.gmra.mxu2 %vm689_vm1, %v5017_v25  ;;  %4858 = vmatmul.msk.f32.gmra.mxu3 %vm689_vm1, %v5029_v22 }
  0xbf   : > { %4827 = vmatmul.msk.f32.gmra.mxu1 %vm413_vm0, %v6042_v55 }
  0xc0   : > { %v473_v9 = vpop.f32.mrf.mxu0 }
  0xc1   : > { %v6020_v15 = vadd.f32 %v473_v9, %v412_v61  ;;  %v6148_v9 = vld [vmem:[%s5909_s19 + $0x80] sm:$0xff] }
  0xc2   : > { %9924 = vst [vmem:[#allocation23_spill] sm:$0xff] %v6148_v9 }
  0xc3   : > { %9916 = vst [vmem:[#allocation15_spill] sm:$0xff] %v6020_v15  ;;  %v5220_v24 = vpack.i.bf16 %v6020_v15, %v6005_v28 }
  0xc5   : > { %5221 = vrot.lane.b32.xlu0 %v5220_v24, %s5663_s30  ;;  %v6172_v24 = vld [vmem:[%s5909_s19 + $0x88] sm:$0xff] }
  0xc6   : > { %4853 = vmatmul.msk.f32.gmra.mxu2 %vm689_vm1, %v5018_v26  ;;  %4859 = vmatmul.msk.f32.gmra.mxu3 %vm689_vm1, %v5030_v23  ;;  %v6059_v23 = vld [vmem:[%s5909_s19 + $0x60] sm:$0xff]  ;;  %v6071_v26 = vpop.permute.xlu0 %5105  ;;  %9925 = vst [vmem:[#allocation24_spill] sm:$0xff] %v6172_v24 }
  0xc7   : > { %9920 = vst [vmem:[#allocation19_spill] sm:$0xff] %v6059_v23  ;;  %4828 = vmatmul.msk.f32.gmra.mxu1 %vm413_vm0, %v6059_v23 }
  0xc8   : > { %v476_v22 = vpop.f32.mrf.mxu0 }
  0xc9   : > { %v6036_v25 = vadd.f32 %v476_v22, %v412_v61  ;;  %v5107_v61 = vunpack.i.l.bf16 %v6071_v26  ;;  %v308_v22 = vld [vmem:[%s5909_s19 + $0x8] sm:$0xff] }
  0xca   : > { %4817 = vmatmul.msk.f32.gmra.mxu0 %vm413_vm0, %v308_v22  ;;  %v9743_v22 = vunpack.i.h.bf16 %v6056_v17 }
  0xcb   : > { %9918 = vst [vmem:[#allocation17_spill] sm:$0xff] %v6036_v25  ;;  %923 = vmatpush.msrb.mxu3 %v6036_v25  ;;  %v5225_v48 = vpack.i.bf16 %v6036_v25, %v6003_v44 }
  0xcd   : > { %5226 = vrot.lane.b32.xlu2 %v5225_v48, %s5663_s30  ;;  %924 = vmatpush.msrb.mxu3 %v6020_v15 }
  0xce   : > { %4854 = vmatmul.msk.f32.gmra.mxu2 %vm689_vm1, %v5021_v19  ;;  %4860 = vmatmul.msk.f32.gmra.mxu3 %vm689_vm1, %v5033_v42  ;;  %v6067_v19 = vpop.permute.xlu2 %5125  ;;  %v6113_v14 = vpop.permute.xlu0 %5130 }
  0xcf   : > { %v5127_v42 = vunpack.i.l.bf16 %v6067_v19  ;;  %v9738_v10 = vunpack.i.h.bf16 %v6067_v19  ;;  %v9737_v33 = vunpack.i.l.bf16 %v6113_v14 }
  0xd1   : > { %v5194_v39 = vpack.i.bf16 %v5127_v42, %v5107_v61 }
  0xd6   : > { %4855 = vmatmul.msk.f32.gmra.mxu2 %vm689_vm1, %v5022_v20  ;;  %4861 = vmatmul.msk.f32.gmra.mxu3 %vm689_vm1, %v5034_v43  ;;  %v6078_v20 = vld [vmem:[%s5909_s19 + $0x68] sm:$0xff]  ;;  %v5108_v43 = vunpack.i.h.bf16 %v6071_v26  ;;  %v6136_v48 = vpop.permute.xlu2 %5135  ;;  %v6140_v35 = vpop.permute.xlu0 %5140 }
  0xd7   : > { %9921 = vst [vmem:[#allocation20_spill] sm:$0xff] %v6078_v20  ;;  %4829 = vmatmul.msk.f32.gmra.mxu1 %vm413_vm0, %v6078_v20  ;;  %v9752_v18 = vunpack.i.h.bf16 %v6140_v35  ;;  %v9949_v21 = vunpack.i.h.bf16 %v6136_v48 }
  0xde   : > { %4864 = vmatmul.msk.f32.vlgmr.msrb.gmra.mxu2 %vm689_vm1, %v5041_v40  ;;  %4862 = vmatmul.msk.f32.gmra.mxu3 %vm689_vm1, %v5037_v37  ;;  %v6097_v40 = vld [vmem:[%s5909_s19 + $0x70] sm:$0xff]  ;;  %v5196_v37 = vpack.i.bf16 %v9738_v10, %v5108_v43  ;;  %v6167_v34 = vpop.permute.xlu0 %5160 }
  0xdf   : > { %9922 = vst [vmem:[#allocation21_spill] sm:$0xff] %v6097_v40  ;;  %4830 = vmatmul.msk.f32.gmra.mxu1 %vm413_vm0, %v6097_v40 }
  0xe2   : > { %5195 = vxpose.xlu1.b32.start [1/8] (short) (narrow) %v5194_v39, 16  ;;  %v6138_v39 = vpop.permute.xlu1 %5150 }
  0xe3   : > { %v9957_v15 = vunpack.i.h.bf16 %v6138_v39 }
  0xe6   : > { %4865 = vmatmul.msk.f32.gmra.mxu2 %vm689_vm1, %v5042_v52  ;;  %4863 = vmatmul.msk.f32.gmra.mxu3 %vm689_vm1, %v5038_v38  ;;  %v5112_v52 = vunpack.i.l.bf16 %v6056_v17  ;;  %v6196_v10 = vpop.permute.xlu0 %5175 }
  0xe7   : > { %4831 = vmatmul.msk.f32.gmra.mxu1 %vm413_vm0, %v6122_v31  ;;  %v9965_v30 = vunpack.i.h.bf16 %v6196_v10 }
  0xe8   : > { %v5198_v38 = vpack.i.bf16 %v9737_v33, %v5112_v52  ;;  %v6194_v33 = vld [vmem:[%s5909_s19 + $0x90] sm:$0xff] }
  0xe9   : > { %9926 = vst [vmem:[#allocation25_spill] sm:$0xff] %v6194_v33 }
  0xea   : > { %5197 = vxpose.xlu1.b32.cont [2/8] (short) (narrow) %v5196_v37, 16  ;;  %v9736_v37 = vunpack.i.h.bf16 %v6113_v14 }
  0xee   : > { %4866 = vmatmul.msk.f32.gmra.mxu2 %vm689_vm1, %v5045_v5  ;;  %4872 = vmatmul.msk.f32.vlgmr.msrb.gmra.mxu3 %vm689_vm1, %v5057_v41  ;;  %v6162_v5 = vpop.permute.xlu2 %5155  ;;  %v9742_v41 = vunpack.i.l.bf16 %v6075_v12 }
  0xef   : > { %4832 = vmatmul.msk.f32.gmra.mxu1 %vm413_vm0, %v6148_v9 }
  0xf2   : > { %5199 = vxpose.xlu1.b32.cont [3/8] (short) (narrow) %v5198_v38, 16  ;;  %v5200_v38 = vpack.i.bf16 %v9736_v37, %v9743_v22  ;;  %v6212_v37 = vpop.f32.mrf.mxu1  ;;  %v9753_v22 = vunpack.i.h.bf16 %v6046_v13 }
  0xf3   : > { %5231 = vxpose.xlu2.b32.start [1/8] (short) (narrow) %v6106_v8, 16 }
  0xf6   : > { %4867 = vmatmul.msk.f32.gmra.mxu2 %vm689_vm1, %v5046_v50  ;;  %4873 = vmatmul.msk.f32.gmra.mxu3 %vm689_vm1, %v5058_v53  ;;  %v9739_v53 = vunpack.i.l.bf16 %v6136_v48  ;;  %v6210_v50 = vpop.permute.xlu1 %5165 }
  0xf7   : > { %4833 = vmatmul.msk.f32.gmra.mxu1 %vm413_vm0, %v6172_v24 }
  0xfa   : > { %5201 = vxpose.xlu1.b32.cont [4/8] (short) (narrow) %v5200_v38, 16  ;;  %v5202_v38 = vpack.i.bf16 %v9739_v53, %v9742_v41  ;;  %v6220_v53 = vld [vmem:[%s5909_s19 + $0x98] sm:$0xff] }
  0xfb   : > { %5233 = vxpose.xlu2.b32.cont [2/8] (short) (narrow) %v6138_v39, 16  ;;  %9927 = vst [vmem:[#allocation26_spill] sm:$0xff] %v6220_v53 }
  0xfe   : > { %4868 = vmatmul.msk.f32.gmra.mxu2 %vm689_vm1, %v5049_v63  ;;  %4874 = vmatmul.msk.f32.gmra.mxu3 %vm689_vm1, %v5061_v7  ;;  %v9740_v63 = vunpack.i.h.bf16 %v6136_v48  ;;  %v9741_v7 = vunpack.i.h.bf16 %v6075_v12 }
  0xff   : > { %4834 = vmatmul.msk.f32.gmra.mxu1 %vm413_vm0, %v6194_v33 }
 0x102   : > { %5203 = vxpose.xlu1.b32.cont [5/8] (short) (narrow) %v5202_v38, 16  ;;  %v5204_v38 = vpack.i.bf16 %v9740_v63, %v9741_v7  ;;  %v6234_v63 = vpop.permute.xlu2 %5170 }
 0x103   : > { %5235 = vxpose.xlu2.b32.cont [3/8] (short) (narrow) %v6162_v5, 16  ;;  %v9747_v41 = vunpack.i.l.bf16 %v6234_v63 }
 0x106   : > { %4869 = vmatmul.msk.f32.gmra.mxu2 %vm689_vm1, %v5050_v2  ;;  %4875 = vmatmul.msk.f32.gmra.mxu3 %vm689_vm1, %v5062_v51  ;;  %v9754_v51 = vunpack.i.l.bf16 %v6046_v13  ;;  %v9745_v2 = vunpack.i.l.bf16 %v6140_v35 }
 0x107   : > { %4835 = vmatmul.msk.f32.gmra.mxu1 %vm413_vm0, %v6220_v53 }
 0x108   : > { %v5206_v47 = vpack.i.bf16 %v9745_v2, %v9754_v51  ;;  %v6244_v2 = vld [vmem:[%s5909_s19 + $0xa0] sm:$0xff]  ;;  %v9940_v51 = vunpack.i.h.bf16 %v6075_v12 }
 0x109   : > { %9928 = vst [vmem:[#allocation27_spill] sm:$0xff] %v6244_v2 }
 0x10a   : > { %5205 = vxpose.xlu1.b32.cont [6/8] (short) (narrow) %v5204_v38, 16 }
 0x10b   : > { %5237 = vxpose.xlu2.b32.cont [4/8] (short) (narrow) %v6167_v34, 16 }
 0x10e   : > { %4870 = vmatmul.msk.f32.gmra.mxu2 %vm689_vm1, %v5053_v3  ;;  %4876 = vmatmul.msk.f32.gmra.mxu3 %vm689_vm1, %v5065_v0  ;;  %v6236_v3 = vpop.f32.mrf.mxu1  ;;  %v9746_v0 = vunpack.i.l.bf16 %v6196_v10 }
 0x10f   : > { %v5186_v38 = vpop.permute.xlu0 %5185  ;;  %4836 = vmatmul.msk.f32.gmra.mxu1 %vm413_vm0, %v6244_v2 }
 0x110   : > { %v5187_v62 = vunpack.i.l.bf16 %v5186_v38  ;;  %v5188_v7 = vunpack.i.h.bf16 %v5186_v38 }
 0x112   : > { %5207 = vxpose.xlu1.b32.cont [7/8] (short) (narrow) %v5206_v47, 16  ;;  %1004 = vmatpush.msra.mxu0 %v5187_v62  ;;  %v6249_v62 = vpop.permute.xlu1 %5180 }
 0x113   : > { %5239 = vxpose.xlu2.b32.cont [5/8] (short) (narrow) %v6210_v50, 16  ;;  %v9970_v27 = vunpack.i.l.bf16 %v6249_v62 }
 0x114   : > { %1005 = vmatpush.msra.mxu0 %v5188_v7  ;;  %v5240_v7 = vpack.i.bf16 %v9746_v0, %v9747_v41  ;;  %v9749_v41 = vunpack.i.h.bf16 %v6249_v62 }
 0x115   : > { %4880 = vmatmul.msk.f32.vlgmr.msra.gmra.mxu0 %vm689_vm1, %v5107_v61  ;;  %v5208_v61 = vpack.i.bf16 %v9752_v18, %v9753_v22  ;;  %v9938_v22 = vunpack.i.l.bf16 %v6106_v8 }
 0x116   : > { %4871 = vmatmul.msk.f32.gmra.mxu2 %vm689_vm1, %v5054_v59  ;;  %4877 = vmatmul.msk.f32.gmra.mxu3 %vm689_vm1, %v5066_v60  ;;  %v6267_v57 = vpop.f32.mrf.mxu1  ;;  %v9751_v59 = vunpack.i.h.bf16 %v6234_v63  ;;  %v9748_v60 = vunpack.i.l.bf16 %v6249_v62 }
 0x117   : > { %4837 = vmatmul.msk.f32.gmra.mxu1 %vm413_vm0, %v6270_v58 }
 0x11a   : > { %5209 = vxpose.xlu1.b32.end [8/8] (short) (narrow) %v5208_v61, 16 }
 0x11b   : > { %5241 = vxpose.xlu2.b32.cont [6/8] (short) (narrow) %v5240_v7, 16  ;;  %v5242_v7 = vpack.i.bf16 %v9748_v60, %v9751_v59 }
 0x11d   : > { %4881 = vmatmul.msk.f32.gmra.mxu0 %vm689_vm1, %v5108_v43  ;;  %v6291_v43 = vld [vmem:[%s5909_s19 + $0xb0] sm:$0xff] }
 0x11e   : > { %4878 = vmatmul.msk.f32.gmra.mxu3 %vm689_vm1, %v5069_v16  ;;  %v6288_v26 = vpop.f32.mrf.mxu1  ;;  %9930 = vst [vmem:[#allocation29_spill] sm:$0xff] %v6291_v43  ;;  %v9750_v16 = vunpack.i.h.bf16 %v6196_v10 }
 0x11f   : > { %v5191_v47 = vpop.permute.xlu1 %5190  ;;  %4838 = vmatmul.msk.f32.gmra.mxu1 %vm413_vm0, %v6291_v43 }
 0x120   : > { %v5192_v38 = vunpack.i.l.bf16 %v5191_v47  ;;  %v5193_v0 = vunpack.i.h.bf16 %v5191_v47  ;;  %v9931_v47 = vunpack.c.h.bf16 %v5915_v4 }
 0x121   : > { %v6286_v61 = vpop.f32.mrf.mxu2 }
 0x122   : > { %1085 = vmatpush.msra.mxu2 %v5192_v38 }
 0x123   : > { %5243 = vxpose.xlu2.b32.cont [7/8] (short) (narrow) %v5242_v7, 16 }
 0x124   : > { %1086 = vmatpush.msra.mxu2 %v5193_v0 }
 0x125   : > { %4882 = vmatmul.msk.f32.gmra.mxu0 %vm689_vm1, %v5112_v52  ;;  %4888 = vmatmul.msk.f32.vlgmr.msra.gmra.mxu2 %vm689_vm1, %v5127_v42  ;;  %v5244_v52 = vpack.i.bf16 %v9749_v41, %v9750_v16  ;;  %v6317_v42 = vld [vmem:[%s5909_s19 + $0xb8] sm:$0xff]  ;;  %v6334_v41 = vld [vmem:[%s5909_s19 + $0xc0] sm:$0xff] }
 0x126   : > { %4879 = vmatmul.msk.f32.gmra.mxu3 %vm689_vm1, %v9931_v47  ;;  %v6314_v4 = vpop.f32.mrf.mxu1  ;;  %9932 = vst [vmem:[#allocation30_spill] sm:$0xff] %v6317_v42  ;;  %v9933_v47 = vunpack.i.h.bf16 %v6056_v17  ;;  %v9936_v17 = vunpack.i.l.bf16 %v6075_v12 }
 0x127   : > { %v5227_v0 = vpop.permute.xlu2 %5226  ;;  %4839 = vmatmul.msk.f32.gmra.mxu1 %vm413_vm0, %v6317_v42  ;;  %9935 = vst [vmem:[#allocation31_spill] sm:$0xff] %v6334_v41 }
 0x128   : > { %v5229_v38 = vunpack.i.h.bf16 %v5227_v0  ;;  %v5228_v7 = vunpack.i.l.bf16 %v5227_v0  ;;  %v9934_v0 = vunpack.i.h.bf16 %v6067_v19  ;;  %v9937_v19 = vunpack.i.l.bf16 %v6113_v14 }
 0x129   : > { %v6310_v60 = vpop.f32.mrf.mxu2 }
 0x12a   : > { %1166 = vmatpush.msra.mxu3 %v5228_v7  ;;  %1247 = vmatpush.msrb.mxu0 %v5229_v38 }
 0x12b   : > { %5245 = vxpose.xlu2.b32.end [8/8] (short) (narrow) %v5244_v52, 16  ;;  %1980 = vrot.lane.b32.xlu0 %v6310_v60, %s5664_s6 }
 0x12d   : > { %4883 = vmatmul.msk.f32.gmra.mxu0 %vm689_vm1, %v9933_v47  ;;  %4889 = vmatmul.msk.f32.gmra.mxu2 %vm689_vm1, %v9934_v0 }
 0x12e   : > { %v6331_v52 = vpop.f32.mrf.mxu1 }
 0x12f   : > { %4840 = vmatmul.msk.f32.gmra.mxu1 %vm413_vm0, %v6334_v41 }
 0x131   : > { %v6327_v38 = vpop.f32.mrf.mxu2  ;;  %v6329_v7 = vpop.f32.mrf.mxu3 }
 0x135   : > { %4884 = vmatmul.msk.f32.gmra.mxu0 %vm689_vm1, %v9936_v17  ;;  %4890 = vmatmul.msk.f32.gmra.mxu2 %vm689_vm1, %v9937_v19  ;;  %v6354_v19 = vld [vmem:[%s5909_s19 + $0xc8] sm:$0xff] }
 0x136   : > { %v6351_v17 = vpop.f32.mrf.mxu1  ;;  %9939 = vst [vmem:[#allocation32_spill] sm:$0xff] %v6354_v19 }
 0x137   : > { %v5222_v47 = vpop.permute.xlu0 %5221  ;;  %4841 = vmatmul.msk.f32.gmra.mxu1 %vm413_vm0, %v6354_v19 }
 0x138   : > { %v5224_v0 = vunpack.i.h.bf16 %v5222_v47  ;;  %v5223_v16 = vunpack.i.l.bf16 %v5222_v47  ;;  %v9941_v47 = vunpack.i.h.bf16 %v6113_v14  ;;  %v6376_v14 = vld [vmem:[%s5909_s19 + $0xd0] sm:$0xff] }
 0x139   : > { %v6344_v59 = vpop.f32.mrf.mxu2  ;;  %v6346_v18 = vpop.f32.mrf.mxu3  ;;  %9943 = vst [vmem:[#allocation33_spill] sm:$0xff] %v6376_v14 }
 0x13a   : > { %1167 = vmatpush.msra.mxu3 %v5223_v16  ;;  %1248 = vmatpush.msrb.mxu0 %v5224_v0 }
 0x13b   : > { %4896 = vmatmul.msk.f32.vlgmr.msra.gmra.mxu3 %vm689_vm1, %v9938_v22  ;;  %v9942_v22 = vunpack.i.l.bf16 %v6138_v39 }
 0x13d   : > { %4885 = vmatmul.msk.f32.gmra.mxu0 %vm689_vm1, %v9940_v51  ;;  %4891 = vmatmul.msk.f32.gmra.mxu2 %vm689_vm1, %v9941_v47  ;;  %v9944_v51 = vunpack.i.l.bf16 %v6046_v13  ;;  %v9945_v47 = vunpack.i.l.bf16 %v6136_v48  ;;  %v9952_v48 = vunpack.i.l.bf16 %v6140_v35 }
 0x13e   : > { %v6373_v12 = vpop.f32.mrf.mxu1 }
 0x13f   : > { %4842 = vmatmul.msk.f32.gmra.mxu1 %vm413_vm0, %v6376_v14  ;;  %v9971_v14 = vunpack.i.h.bf16 %v6249_v62  ;;  %v6548_v62 = vperm.slane %v5944_v54, 1 }
 0x141   : > { %v6364_v16 = vpop.f32.mrf.mxu2  ;;  %v6366_v0 = vpop.f32.mrf.mxu3 }
 0x142   : > { %1986 = vrot.lane.b32.xlu0 %v6364_v16, %s5664_s6 }
 0x143   : > { %4897 = vmatmul.msk.f32.gmra.mxu3 %vm689_vm1, %v9942_v22  ;;  %v9946_v22 = vunpack.i.l.bf16 %v6162_v5 }
 0x145   : > { %4886 = vmatmul.msk.f32.gmra.mxu0 %vm689_vm1, %v9944_v51  ;;  %4892 = vmatmul.msk.f32.gmra.mxu2 %vm689_vm1, %v9945_v47  ;;  %v9948_v47 = vunpack.i.h.bf16 %v6046_v13  ;;  %v6418_v13 = vld [vmem:[%s5909_s19 + $0xe0] sm:$0xff] }
 0x146   : > { %v6395_v51 = vpop.f32.mrf.mxu1  ;;  %9951 = vst [vmem:[#allocation35_spill] sm:$0xff] %v6418_v13 }
 0x147   : > { %4843 = vmatmul.msk.f32.gmra.mxu1 %vm413_vm0, %v6398_v49 }
 0x149   : > { %v6386_v56 = vpop.f32.mrf.mxu2  ;;  %v6388_v36 = vpop.f32.mrf.mxu3 }
 0x14a   : > { %1998 = vrot.lane.b32.xlu0 %v6366_v0, %s5664_s6 }
 0x14b   : > { %4898 = vmatmul.msk.f32.gmra.mxu3 %vm689_vm1, %v9946_v22  ;;  %v9950_v22 = vunpack.i.l.bf16 %v6167_v34 }
 0x14d   : > { %4887 = vmatmul.msk.f32.gmra.mxu0 %vm689_vm1, %v9948_v47  ;;  %4893 = vmatmul.msk.f32.gmra.mxu2 %vm689_vm1, %v9949_v21  ;;  %v9953_v21 = vunpack.i.h.bf16 %v6106_v8  ;;  %v6440_v8 = vld [vmem:[%s5909_s19 + $0xe8] sm:$0xff] }
 0x14e   : > { %v6415_v28 = vpop.f32.mrf.mxu1  ;;  %9955 = vst [vmem:[#allocation36_spill] sm:$0xff] %v6440_v8 }
 0x14f   : > { %4844 = vmatmul.msk.f32.gmra.mxu1 %vm413_vm0, %v6418_v13 }
 0x151   : > { %v6408_v6 = vpop.f32.mrf.mxu2  ;;  %v6410_v44 = vpop.f32.mrf.mxu3 }
 0x153   : > { %4899 = vmatmul.msk.f32.gmra.mxu3 %vm689_vm1, %v9950_v22  ;;  %v9954_v22 = vunpack.i.l.bf16 %v6210_v50 }
 0x155   : > { %4894 = vmatmul.msk.f32.gmra.mxu2 %vm689_vm1, %v9952_v48  ;;  %4904 = vmatmul.msk.f32.vlgmr.msrb.gmra.mxu0 %vm689_vm1, %v9953_v21  ;;  %v9956_v21 = vunpack.i.h.bf16 %v6140_v35 }
 0x156   : > { %v6437_v48 = vpop.f32.mrf.mxu1 }
 0x157   : > { %4845 = vmatmul.msk.f32.gmra.mxu1 %vm413_vm0, %v6440_v8 }
 0x159   : > { %v6428_v47 = vpop.f32.mrf.mxu2  ;;  %v6430_v25 = vpop.f32.mrf.mxu3 }
 0x15a   : > { %1992 = vrot.lane.b32.xlu0 %v6428_v47, %s5664_s6 }
 0x15b   : > { %4900 = vmatmul.msk.f32.gmra.mxu3 %vm689_vm1, %v9954_v22  ;;  %v9958_v22 = vunpack.i.l.bf16 %v6234_v63 }
 0x15d   : > { %4895 = vmatmul.msk.f32.gmra.mxu2 %vm689_vm1, %v9956_v21  ;;  %4905 = vmatmul.msk.f32.gmra.mxu0 %vm689_vm1, %v9957_v15  ;;  %v6462_v21 = vld [vmem:[%s5909_s19 + $0xf0] sm:$0xff]  ;;  %v9960_v15 = vunpack.i.h.bf16 %v6162_v5  ;;  %v9964_v5 = vunpack.i.h.bf16 %v6167_v34  ;;  %v9966_v34 = vunpack.i.h.bf16 %v6210_v50 }
 0x15e   : > { %v6459_v35 = vpop.f32.mrf.mxu1  ;;  %9959 = vst [vmem:[#allocation37_spill] sm:$0xff] %v6462_v21 }
 0x15f   : > { %4846 = vmatmul.msk.f32.gmra.mxu1 %vm413_vm0, %v6462_v21 }
 0x161   : > { %v6450_v42 = vpop.f32.mrf.mxu2  ;;  %v6452_v1 = vpop.f32.mrf.mxu3 }
 0x162   : > { %2004 = vrot.lane.b32.xlu0 %v6430_v25, %s5664_s6 }
 0x163   : > { %4901 = vmatmul.msk.f32.gmra.mxu3 %vm689_vm1, %v9958_v22  ;;  %v9962_v22 = vunpack.i.h.bf16 %v6234_v63 }
 0x165   : > { %4906 = vmatmul.msk.f32.gmra.mxu0 %vm689_vm1, %v9960_v15 }
 0x166   : > { %v6484_v15 = vpop.f32.mrf.mxu1 }
 0x167   : > { %4847 = vmatmul.msk.f32.gmra.mxu1 %vm413_vm0, %v6479_v32  ;;  %v593_v32 = vpop.f32.mrf.mxu0 }
 0x168   : > { %v594_v40 = vadd.f32 %v593_v32, %v6548_v62 }
 0x169   : > { %v6469_v39 = vpop.f32.mrf.mxu2  ;;  %v6471_v8 = vpop.f32.mrf.mxu3 }
 0x16a   : > { %9961 = vst [vmem:[#allocation38_spill] sm:$0xff] %v6471_v8  ;;  %2010 = vrot.lane.b32.xlu0 %v6450_v42, %s5664_s6 }
 0x16b   : > { %4902 = vmatmul.msk.f32.gmra.mxu3 %vm689_vm1, %v9962_v22 }
 0x16d   : > { %4907 = vmatmul.msk.f32.gmra.mxu0 %vm689_vm1, %v9964_v5 }
 0x16e   : > { %v6500_v63 = vpop.f32.mrf.mxu1 }
 0x171   : > { %v6488_v21 = vpop.f32.mrf.mxu2  ;;  %v6490_v13 = vpop.f32.mrf.mxu3 }
 0x173   : > { %4903 = vmatmul.msk.f32.gmra.mxu3 %vm689_vm1, %v9965_v30  ;;  %v9967_v30 = vunpack.i.l.bf16 %v6196_v10  ;;  %v596_v10 = vpop.f32.mrf.mxu0 }
 0x174   : > { %1982 = vrot.lane.b32.xlu1 %v6327_v38, %s5664_s6  ;;  %v597_v19 = vadd.f32 %v596_v10, %v6548_v62 }
 0x175   : > { %4908 = vmatmul.msk.f32.gmra.mxu0 %vm689_vm1, %v9966_v34 }
 0x176   : > { %v6515_v34 = vpop.f32.mrf.mxu1 }
 0x179   : > { %v6502_v22 = vpop.f32.mrf.mxu2  ;;  %v6504_v5 = vpop.f32.mrf.mxu3 }
 0x17a   : > { %2016 = vrot.lane.b32.xlu0 %v6502_v22, %s5664_s6 }
 0x17c   : > { %1994 = vrot.lane.b32.xlu1 %v6329_v7, %s5664_s6 }
 0x17d   : > { %4909 = vmatmul.msk.f32.gmra.mxu0 %vm689_vm1, %v9967_v30 }
 0x17e   : > { %v6528_v30 = vpop.f32.mrf.mxu1 }
 0x181   : > { %v6513_v50 = vpop.f32.mrf.mxu2  ;;  %v6519_v43 = vpop.f32.mrf.mxu3 }
 0x182   : > { %9968 = vst [vmem:[#allocation40_spill] sm:$0xff] %v6513_v50  ;;  %2028 = vrot.lane.b32.xlu0 %v6504_v5, %s5664_s6 }
 0x183   : > { %9969 = vst [vmem:[#allocation41_spill] sm:$0xff] %v6519_v43 }
 0x184   : > { %1988 = vrot.lane.b32.xlu1 %v6386_v56, %s5664_s6 }
 0x185   : > { %4910 = vmatmul.msk.f32.gmra.mxu0 %vm689_vm1, %v9970_v27 }
 0x186   : > { %v6545_v27 = vpop.f32.mrf.mxu1 }
 0x189   : > { %v6526_v49 = vpop.f32.mrf.mxu2  ;;  %v6535_v58 = vpop.f32.mrf.mxu3 }
 0x18c   : > { %2000 = vrot.lane.b32.xlu1 %v6388_v36, %s5664_s6 }
 0x18d   : > { %4911 = vmatmul.msk.f32.gmra.mxu0 %vm689_vm1, %v9971_v14 }
 0x191   : > { %v6537_v2 = vpop.f32.mrf.mxu2  ;;  %v6550_v14 = vpop.f32.mrf.mxu3 }
 0x192   : > { %9972 = vst [vmem:[#allocation42_spill] sm:$0xff] %v6537_v2  ;;  %v1007_v31 = vpop.f32.mrf.mxu0  ;;  %2022 = vrot.lane.b32.xlu0 %v6537_v2, %s5664_s6 }
 0x193   : > { %9973 = vst [vmem:[#allocation43_spill] sm:$0xff] %v6550_v14  ;;  %v1274_v53 = vadd.f32 %v1007_v31, %v6286_v61  ;;  %v2911_v31 = vperm.slane %v5944_v54, 3 }
 0x194   : > { %1978 = vrot.lane.b32.xlu2 %v6286_v61, %s5664_s6  ;;  %2006 = vrot.lane.b32.xlu1 %v6452_v1, %s5664_s6  ;;  %v6569_v61 = vpop.f32.mrf.mxu1 }
 0x195   : > { %v6562_v33 = vadd.f32 %v1274_v53, %v594_v40 }
 0x197   : > { %9974 = vst [vmem:[#allocation44_spill] sm:$0xff] %v6562_v33 }
 0x199   : > { %v6566_v32 = vpop.f32.mrf.mxu2  ;;  %v6571_v10 = vpop.f32.mrf.mxu3 }
 0x19a   : > { %v1010_v20 = vpop.f32.mrf.mxu0  ;;  %2034 = vrot.lane.b32.xlu0 %v6550_v14, %s5664_s6  ;;  %9976 = vst [vmem:[#allocation46_spill] sm:$0xff] %v6566_v32  ;;  %v6621_v14 = vpop.trf.xlu1 }
 0x19b   : > { %v1275_v41 = vadd.f32 %v1010_v20, %v6310_v60  ;;  %9977 = vst [vmem:[#allocation47_spill] sm:$0xff] %v6571_v10  ;;  %v4912_v20 = vmul.f32 -1.442695, %v6562_v33 }
 0x19c   : > { %1984 = vrot.lane.b32.xlu2 %v6344_v59, %s5664_s6  ;;  %2012 = vrot.lane.b32.xlu1 %v6469_v39, %s5664_s6  ;;  %9983 = vst [vmem:[#allocation53_spill] sm:$0xff] %v6621_v14 }
 0x19d   : > { %v6564_v24 = vadd.f32 %v1275_v41, %v597_v19  ;;  %5256 = vpow2.f32 %v4912_v20  ;;  %v618_v41 = vadd.f32 %v6331_v52, %v6548_v62  ;;  %v6583_v19 = vpop.f32.mrf.mxu1 }
 0x19f   : > { %9975 = vst [vmem:[#allocation45_spill] sm:$0xff] %v6564_v24  ;;  %v4913_v60 = vmul.f32 -1.442695, %v6564_v24 }
 0x1a1   : > { %5258 = vpow2.f32 %v4913_v60  ;;  %v6585_v9 = vpop.f32.mrf.mxu3 }
 0x1a2   : > { %v1013_v23 = vpop.f32.mrf.mxu0  ;;  %2913 = vrot.lane.b32.xlu0 %v2911_v31, %s5664_s6  ;;  %9978 = vst [vmem:[#allocation48_spill] sm:$0xff] %v6585_v9 }
 0x1a3   : > { %v5257_v31 = vpop.eup %5256  ;;  %v1276_v29 = vadd.f32 %v1013_v23, %v6327_v38  ;;  %v606_v38 = vadd.f32 %v6236_v3, %v6548_v62 }
 0x1a4   : > { %1996 = vrot.lane.b32.xlu2 %v6346_v18, %s5664_s6  ;;  %2018 = vrot.lane.b32.xlu1 %v6513_v50, %s5664_s6  ;;  %v6596_v52 = vadd.f32 1.0, %v5257_v31 }
 0x1a6   : > { %5260 = vrcp.f32 %v6596_v52  ;;  %vm1471_vm2 = vweird.f32 %v6596_v52 }
 0x1a7   : > { %v5259_v11 = vpop.eup %5258 }
 0x1a8   : > { %v1088_v40 = vpop.f32.mrf.mxu2  ;;  %v6598_v20 = vadd.f32 1.0, %v5259_v11 }
 0x1a9   : > { %v1282_v53 = vadd.f32 %v1088_v40, %v6329_v7  ;;  %v600_v7 = vadd.f32 %v6186_v46, %v6548_v62  ;;  %v6608_v46 = vpop.f32.mrf.mxu1  ;;  %v6614_v11 = vpop.f32.mrf.mxu3 }
 0x1aa   : > { %v1016_v55 = vpop.f32.mrf.mxu0  ;;  %5262 = vrcp.f32 %v6598_v20  ;;  %9981 = vst [vmem:[#allocation51_spill] sm:$0xff] %v6614_v11  ;;  %vm1486_vm6 = vweird.f32 %v6598_v20 }
 0x1ab   : > { %v6588_v45 = vadd.f32 %v1282_v53, %v618_v41  ;;  %v6600_v60 = vadd.f32 %v1276_v29, %v600_v7  ;;  %v1277_v2 = vadd.f32 %v1016_v55, %v6344_v59  ;;  %v621_v55 = vadd.f32 %v6351_v17, %v6548_v62 }
 0x1ac   : > { %1990 = vrot.lane.b32.xlu2 %v6408_v6, %s5664_s6  ;;  %2030 = vrot.lane.b32.xlu1 %v6519_v43, %s5664_s6  ;;  %v6618_v3 = vpop.eup %5260  ;;  %v6641_v43 = vadd.f32 %v6314_v4, %v6548_v62 }
 0x1ad   : > { %9979 = vst [vmem:[#allocation49_spill] sm:$0xff] %v6588_v45  ;;  %v4914_v41 = vmul.f32 -1.442695, %v6600_v60  ;;  %vm1472_vm4 = vweird.f32 %v6618_v3 }
 0x1ae   : > { %9980 = vst [vmem:[#allocation50_spill] sm:$0xff] %v6600_v60  ;;  %vm6769_vm7 = vmor %vm1471_vm2, %vm1472_vm4 }
 0x1af   : > { %5264 = vpow2.f32 %v4914_v41  ;;  %v6633_v41 = vadd.f32 %v6267_v57, %v6548_v62  ;;  %v6651_v57 = vadd.f32 %v6395_v51, %v6548_v62 }
 0x1b0   : > { %v1091_v40 = vpop.f32.mrf.mxu2 }
 0x1b2   : > { %v1019_v23 = vpop.f32.mrf.mxu0 }
 0x1b3   : > { %v1278_v53 = vadd.f32 %v1019_v23, %v6364_v16  ;;  %v6623_v16 = vpop.eup %5262  ;;  %v624_v23 = vadd.f32 %v6373_v12, %v6548_v62  ;;  %v642_v12 = vadd.f32 %v6500_v63, %v6548_v62  ;;  %v6688_v63 = vadd.f32 %v6515_v34, %v6548_v62 }
 0x1b4   : > { %2002 = vrot.lane.b32.xlu2 %v6410_v44, %s5664_s6  ;;  %2024 = vrot.lane.b32.xlu1 %v6566_v32, %s5664_s6  ;;  %v1482_v4 = vmul.f32 %v6623_v16, %v6598_v20  ;;  %v6702_v34 = vadd.f32 %v6545_v27, %v6548_v62  ;;  %v1475_v27 = vand.u32 2147483647, %v6596_v52  ;;  %vm1487_vm3 = vweird.f32 %v6623_v16 }
 0x1b5   : > { %v6616_v29 = vadd.f32 %v1278_v53, %v606_v38  ;;  %v603_v38 = vadd.f32 %v6212_v37, %v6548_v62  ;;  %v6637_v53 = vadd.f32 %v6288_v26, %v6548_v62  ;;  %v1467_v37 = vmul.f32 %v6618_v3, %v6596_v52  ;;  %v5265_v17 = vpop.eup %5264  ;;  %vm6777_vm8 = vmor %vm1486_vm6, %vm1487_vm3 }
 0x1b6   : > { %v6655_v26 = vadd.f32 %v6415_v28, %v6548_v62  ;;  %vm6741_vm5 = vcmp.eq.f32.partialorder %v1475_v27, 8.507059e+37  ;;  %v6758_v27 = vadd.f32 %v6583_v19, %v6548_v62 }
 0x1b7   : > { %9982 = vst [vmem:[#allocation52_spill] sm:$0xff] %v6616_v29  ;;  %v4916_v31 = vmul.f32 -1.442695, %v6616_v29  ;;  %v6669_v28 = vadd.f32 %v1277_v2, %v603_v38  ;;  %v6684_v2 = vadd.f32 %v6484_v15, %v6548_v62  ;;  %v6698_v15 = vadd.f32 %v6528_v30, %v6548_v62 }
 0x1b8   : > { %v1094_v7 = vpop.f32.mrf.mxu2 }
 0x1b9   : > { %v1284_v32 = vadd.f32 %v1094_v7, %v6366_v0  ;;  %5266 = vpow2.f32 %v4916_v31  ;;  %v6665_v0 = vadd.f32 %v6437_v48, %v6548_v62  ;;  %9985 = vst [vmem:[#allocation55_spill] sm:$0xff] %v6669_v28  ;;  %v6676_v31 = vadd.f32 %v6459_v35, %v6548_v62 }
 0x1ba   : > { %v1022_v29 = vpop.f32.mrf.mxu0  ;;  %v4920_v7 = vmul.f32 -1.442695, %v6588_v45  ;;  %v3260_v48 = vmul.f32 %v6562_v33, %v6562_v33  ;;  %9986 = vst [vmem:[#allocation56_spill] sm:$0xff] %v6684_v2  ;;  %v1468_v35 = vsub.f32 1.0, %v1467_v37  ;;  %v1483_v45 = vsub.f32 1.0, %v1482_v4 }
 0x1bb   : > { %v6645_v59 = vadd.f32 %v1284_v32, %v624_v23  ;;  %v6672_v32 = vpop.f32.mrf.mxu1  ;;  %v1283_v23 = vadd.f32 %v1091_v40, %v6346_v18  ;;  %v2898_v40 = vperm.slane %v5944_v54, 2  ;;  %v6711_v54 = vadd.f32 %v6569_v61, %v6548_v62  ;;  %v6723_v61 = vpop.trf.xlu1 }
 0x1bc   : > { %2008 = vrot.lane.b32.xlu2 %v6471_v8, %s5664_s6  ;;  %2036 = vrot.lane.b32.xlu1 %v6571_v10, %s5664_s6  ;;  %v6694_v8 = vpop.trf.xlu2  ;;  %v3292_v30 = vsel %vm413_vm0, %v3260_v48, 0.0  ;;  %v1477_v2 = vand.u32 2147483648, %v6596_v52 }
 0x1bd   : > { %9984 = vst [vmem:[#allocation54_spill] sm:$0xff] %v6645_v59  ;;  %v4922_v51 = vmul.f32 -1.442695, %v6645_v59  ;;  %v6691_v59 = vadd.f32 1.0, %v5265_v17  ;;  %v6707_v4 = vadd.f32 %v1283_v23, %v621_v55  ;;  %v1279_v55 = vadd.f32 %v1022_v29, %v6386_v56  ;;  %v6727_v23 = vpop.permute.xlu0 %1980 }
 0x1be   : > { %v1169_v10 = vpop.f32.mrf.mxu3  ;;  %9987 = vst [vmem:[#allocation57_spill] sm:$0xff] %v6694_v8  ;;  %v6736_v29 = vsel %vm413_vm0, %v6600_v60, 0.0 }
 0x1bf   : > { %v1290_v38 = vadd.f32 %v1169_v10, %v6450_v42  ;;  %5268 = vpow2.f32 %v4922_v51  ;;  %v4915_v42 = vmul.f32 -1.442695, %v6669_v28  ;;  %v5267_v37 = vpop.eup %5266  ;;  %9989 = vst [vmem:[#allocation59_spill] sm:$0xff] %v6707_v4  ;;  %v1469_v51 = vmul.f32 %v6618_v3, %v1468_v35 }
 0x1c0   : > { %v1097_v18 = vpop.f32.mrf.mxu2  ;;  %5270 = vpow2.f32 %v4920_v7  ;;  %9990 = vst [vmem:[#allocation60_spill] sm:$0xff] %v6711_v54  ;;  %v6725_v7 = vadd.f32 1.0, %v5267_v37  ;;  %v1478_v37 = vor.u32 1.1754944e-38, %v1477_v2  ;;  %v6747_v54 = vadd.f32 %v1279_v55, %v6633_v41 }
 0x1c1   : > { %v6705_v10 = vadd.f32 %v1290_v38, %v642_v12  ;;  %5272 = vrcp.f32 %v6691_v59  ;;  %v1484_v12 = vmul.f32 %v6623_v16, %v1483_v45  ;;  %v4921_v38 = vmul.f32 -1.442695, %v6707_v4 }
 0x1c2   : > { %v1025_v17 = vpop.f32.mrf.mxu0  ;;  %5274 = vpow2.f32 %v4915_v42  ;;  %v1492_v45 = vand.u32 2147483648, %v6598_v20  ;;  %9993 = vst [vmem:[#allocation61_spill] sm:$0xff] %v6747_v54  ;;  %v1285_v11 = vadd.f32 %v1097_v18, %v6388_v36  ;;  %v1490_v41 = vand.u32 2147483647, %v6598_v20 }
 0x1c3   : > { %9988 = vst [vmem:[#allocation58_spill] sm:$0xff] %v6705_v10  ;;  %v665_v35 = vpop.f32.mrf.mxu1  ;;  %v1485_v28 = vadd.f32 %v6623_v16, %v1484_v12  ;;  %v4928_v60 = vmul.f32 -1.442695, %v6705_v10  ;;  %5276 = vrcp.f32 %v6725_v7  ;;  %v1280_v2 = vadd.f32 %v1025_v17, %v6408_v6 }
 0x1c4   : > { %2014 = vrot.lane.b32.xlu2 %v6488_v21, %s5664_s6  ;;  %2900 = vrot.lane.b32.xlu1 %v2898_v40, %s5664_s6  ;;  %v1470_v40 = vadd.f32 %v6618_v3, %v1469_v51  ;;  %5278 = vpow2.f32 %v4921_v38  ;;  %v1493_v36 = vor.u32 1.1754944e-38, %v1492_v45  ;;  %v1507_v17 = vand.u32 2147483648, %v6691_v59 }
 0x1c5   : > { %v5269_v48 = vpop.eup %5268  ;;  %v1489_v38 = vsel %vm6777_vm8, %v6623_v16, %v1485_v28  ;;  %5280 = vpow2.f32 %v4928_v60  ;;  %v6791_v45 = vadd.f32 %v1285_v11, %v6651_v57  ;;  %vm1491_vm9 = vcmp.eq.f32.partialorder %v1490_v41, 8.507059e+37 }
 0x1c6   : > { %v6732_v56 = vpop.f32.mrf.mxu3  ;;  %v5271_v4 = vpop.eup %5270  ;;  %v6754_v51 = vadd.f32 1.0, %v5269_v48  ;;  %v1474_v52 = vsel %vm6769_vm7, %v6618_v3, %v1470_v40  ;;  %v6799_v3 = vadd.f32 %v1280_v2, %v6637_v53  ;;  %v6811_v28 = vsel %vm413_vm0, %v6562_v33, 0.0 }
 0x1c7   : > { %v6761_v12 = vpop.eup %5272  ;;  %v6773_v48 = vadd.f32 1.0, %v5271_v4  ;;  %v4917_v4 = vmul.f32 -1.442695, %v6747_v54  ;;  %9998 = vst [vmem:[#allocation62_spill] sm:$0xff] %v6791_v45  ;;  %v6815_v53 = vsel %vm1491_vm9, %v1493_v36, %v1489_v38  ;;  %v4923_v55 = vmul.f32 -1.442695, %v6791_v45 }
 0x1c8   : > { %v6751_v50 = vpop.f32.mrf.mxu2  ;;  %v5275_v19 = vpop.eup %5274  ;;  %5282 = vrcp.f32 %v6754_v51  ;;  %9999 = vst [vmem:[#allocation63_spill] sm:$0xff] %v6799_v3  ;;  %v1497_v60 = vmul.f32 %v6761_v12, %v6691_v59  ;;  %v666_v6 = vadd.f32 %v665_v35, %v6548_v62  ;;  %v6842_v42 = vadd.f32 %v6672_v32, %v6548_v62 }
 0x1c9   : > { %v6806_v16 = vadd.f32 1.0, %v5275_v19  ;;  %10001 = vst [vmem:[#allocation65_spill] sm:$0xff] %v6815_v53  ;;  %5284 = vpow2.f32 %v4917_v4  ;;  %v6836_v4 = vmul.f32 %v6727_v23, %v6815_v53  ;;  %v1537_v23 = vand.u32 2147483648, %v6725_v7 }
 0x1ca   : > { %v1028_v18 = vpop.f32.mrf.mxu0  ;;  %5286 = vrcp.f32 %v6773_v48  ;;  %vm1502_vm10 = vweird.f32 %v6761_v12  ;;  %vm1531_vm11 = vweird.f32 %v6725_v7  ;;  %vm1501_vm12 = vweird.f32 %v6691_v59 }
 0x1cb   : > { %v1281_v20 = vadd.f32 %v1028_v18, %v6428_v47  ;;  %v6796_v47 = vpop.permute.xlu0 %1986  ;;  %v6822_v18 = vor.u32 1.1754944e-38, %v1507_v17  ;;  %v668_v38 = vpop.f32.mrf.mxu1  ;;  %v1498_v17 = vsub.f32 1.0, %v1497_v60  ;;  %5288 = vrcp.f32 %v6806_v16  ;;  %10003 = vst [vmem:[#allocation67_spill] sm:$0xff] %v6836_v4  ;;  %vm6979_vm4 = vmor %vm1501_vm12, %vm1502_vm10 }
 0x1cc   : > { %2026 = vrot.lane.b32.xlu2 %v6490_v13, %s5664_s6  ;;  %3293 = vadd.xlane.f32.xlu0 %v3292_v30  ;;  %v6813_v30 = vpop.eup %5276  ;;  %v1291_v60 = vadd.f32 %v6732_v56, %v6469_v39  ;;  %v6859_v32 = vadd.f32 %v668_v38, %v6548_v62  ;;  %vm1621_vm15 = vweird.f32 %v6754_v51 }
 0x1cd   : > { %v6802_v40 = vadd.f32 %v1281_v20, %v6641_v43  ;;  %v6819_v43 = vadd.f32 %v6608_v46, %v6548_v62  ;;  %v5279_v41 = vpop.eup %5278  ;;  %v6828_v20 = vsel %vm6741_vm5, %v1478_v37, %v1474_v52  ;;  %v4918_v46 = vmul.f32 -1.442695, %v6799_v3 }
 0x1ce   : > { %v1175_v11 = vpop.f32.mrf.mxu3  ;;  %10002 = vst [vmem:[#allocation66_spill] sm:$0xff] %v6828_v20  ;;  %v5281_v57 = vpop.eup %5280  ;;  %v1527_v35 = vmul.f32 %v6813_v30, %v6725_v7  ;;  %vm1532_vm14 = vweird.f32 %v6813_v30 }
 0x1cf   : > { %10000 = vst [vmem:[#allocation64_spill] sm:$0xff] %v6802_v40  ;;  %v4919_v2 = vmul.f32 -1.442695, %v6802_v40  ;;  %v6844_v52 = vpop.eup %5282  ;;  %vm6951_vm1 = vmor %vm1531_vm11, %vm1532_vm14 }
 0x1d0   : > { %v1103_v19 = vpop.f32.mrf.mxu2  ;;  %v5285_v56 = vpop.eup %5284  ;;  %vm1622_vm2 = vweird.f32 %v6844_v52 }
 0x1d1   : > { %v1287_v36 = vadd.f32 %v1103_v19, %v6430_v25  ;;  %v6846_v25 = vadd.f32 1.0, %v5279_v41  ;;  %5290 = vpow2.f32 %v4919_v2  ;;  %v6861_v41 = vadd.f32 1.0, %v5281_v57  ;;  %v6871_v38 = vpop.eup %5286  ;;  %vm7011_vm5 = vmor %vm1621_vm15, %vm1622_vm2 }
 0x1d2   : > { %v1250_v37 = vpop.f32.mrf.mxu0  ;;  %5292 = vpow2.f32 %v4923_v55  ;;  %v1528_v2 = vsub.f32 1.0, %v1527_v35  ;;  %v1286_v55 = vadd.f32 %v6751_v50, %v6410_v44  ;;  %v6875_v57 = vadd.f32 %v1291_v60, %v6688_v63  ;;  %v6885_v44 = vpop.eup %5288 }
 0x1d3   : > { %v6851_v19 = vadd.f32 %v1287_v36, %v6665_v0  ;;  %v1298_v33 = vadd.f32 %v1250_v37, %v6490_v13  ;;  %5294 = vpow2.f32 %v4918_v46  ;;  %v1499_v0 = vmul.f32 %v6761_v12, %v1498_v17  ;;  %v6877_v46 = vpop.permute.xlu0 %1998 }
 0x1d4   : > { %2020 = vrot.lane.b32.xlu2 %v6526_v49, %s5664_s6  ;;  %3139 = vadd.xlane.f32.xlu0 %v6736_v29  ;;  %v1617_v13 = vmul.f32 %v6844_v52, %v6754_v51  ;;  %5296 = vrcp.f32 %v6846_v25  ;;  %10006 = vst [vmem:[#allocation70_spill] sm:$0xff] %v6875_v57  ;;  %v6883_v35 = vmul.f32 %v6564_v24, %v6564_v24  ;;  %v6889_v50 = vor.u32 1.1754944e-38, %v1537_v23 }
 0x1d5   : > { %10004 = vst [vmem:[#allocation68_spill] sm:$0xff] %v6851_v19  ;;  %v4925_v39 = vmul.f32 -1.442695, %v6851_v19  ;;  %v6869_v36 = vadd.f32 %v1298_v33, %v666_v6  ;;  %v1535_v33 = vand.u32 2147483647, %v6725_v7  ;;  %v6891_v6 = vadd.f32 1.0, %v5285_v56 }
 0x1d6   : > { %v1178_v29 = vpop.f32.mrf.mxu3  ;;  %v1618_v19 = vsub.f32 1.0, %v1617_v13  ;;  %v6901_v23 = vadd.f32 %v1286_v55, %v6655_v26  ;;  %v4929_v53 = vmul.f32 -1.442695, %v6875_v57  ;;  %v1625_v13 = vand.u32 2147483647, %v6754_v51 }
 0x1d7   : > { %10005 = vst [vmem:[#allocation69_spill] sm:$0xff] %v6869_v36  ;;  %v1293_v17 = vadd.f32 %v1178_v29, %v6502_v22  ;;  %5298 = vpow2.f32 %v4925_v39  ;;  %v5291_v63 = vpop.eup %5290  ;;  %v1292_v22 = vadd.f32 %v1175_v11, %v6488_v21  ;;  %v1529_v29 = vmul.f32 %v6813_v30, %v1528_v2  ;;  %v6907_v11 = vpop.trf.xlu2 }
 0x1d8   : > { %5300 = vrcp.f32 %v6861_v41  ;;  %v5293_v60 = vpop.eup %5292  ;;  %10008 = vst [vmem:[#allocation72_spill] sm:$0xff] %v6901_v23  ;;  %v6903_v39 = vadd.f32 1.0, %v5291_v63  ;;  %v6914_v2 = vmul.f32 %v6871_v38, %v6773_v48  ;;  %vm6916_vm13 = vcmp.eq.f32.partialorder %v1535_v33, 8.507059e+37  ;;  %v1106_v21 = vpop.f32.mrf.mxu2 }
 0x1d9   : > { %v6896_v37 = vadd.f32 %v1293_v17, %v6702_v34  ;;  %v5295_v40 = vpop.eup %5294  ;;  %10009 = vst [vmem:[#allocation73_spill] sm:$0xff] %v6907_v11  ;;  %v6910_v34 = vadd.f32 %v6761_v12, %v1499_v0  ;;  %v6930_v33 = vadd.f32 1.0, %v5293_v60  ;;  %v6933_v63 = vadd.f32 %v1292_v22, %v6698_v15 }
 0x1da   : > { %v1253_v56 = vpop.f32.mrf.mxu0  ;;  %5302 = vrcp.f32 %v6903_v39  ;;  %v6926_v0 = vpop.eup %5296  ;;  %v1530_v55 = vadd.f32 %v6813_v30, %v1529_v29  ;;  %v4924_v57 = vmul.f32 -1.442695, %v6901_v23  ;;  %v6940_v3 = vadd.f32 1.0, %v5295_v40  ;;  %v10031_v40 = vld [vmem:[#allocation60_spill] sm:$0xff] }
 0x1db   : > { %10007 = vst [vmem:[#allocation71_spill] sm:$0xff] %v6896_v37  ;;  %v4931_v17 = vmul.f32 -1.442695, %v6896_v37  ;;  %5304 = vrcp.f32 %v6891_v6  ;;  %v1619_v37 = vmul.f32 %v6844_v52, %v1618_v19  ;;  %v1627_v60 = vand.u32 2147483648, %v6754_v51  ;;  %v671_v29 = vpop.f32.mrf.mxu1 }
 0x1dc   : > { %2032 = vrot.lane.b32.xlu2 %v6535_v58, %s5664_s6  ;;  %10012 = vst [vmem:[#allocation74_spill] sm:$0xff] %v6930_v33  ;;  %5306 = vpow2.f32 %v4929_v53  ;;  %v1288_v22 = vadd.f32 %v1106_v21, %v6452_v1  ;;  %vm6957_vm3 = vcmp.eq.f32.partialorder %v1625_v13, 8.507059e+37  ;;  %v6962_v1 = vpop.permute.xlu0 %1992  ;;  %v1534_v7 = vsel %vm6951_vm1, %v6813_v30, %v1530_v55 }
 0x1dd   : > { %10013 = vst [vmem:[#allocation75_spill] sm:$0xff] %v6933_v63  ;;  %v5299_v8 = vpop.eup %5298  ;;  %5308 = vpow2.f32 %v4931_v17  ;;  %v1620_v17 = vadd.f32 %v6844_v52, %v1619_v37  ;;  %v1628_v30 = vor.u32 1.1754944e-38, %v1627_v60  ;;  %v1299_v19 = vadd.f32 %v1253_v56, %v6504_v5 }
 0x1de   : > { %v1181_v45 = vpop.f32.mrf.mxu3  ;;  %v6938_v54 = vpop.eup %5300  ;;  %10014 = vst [vmem:[#allocation76_spill] sm:$0xff] %v6940_v3  ;;  %v6944_v15 = vadd.f32 1.0, %v5299_v8  ;;  %5310 = vrcp.f32 %v6930_v33  ;;  %v4930_v8 = vmul.f32 -1.442695, %v6933_v63  ;;  %v6994_v55 = vadd.f32 %v1288_v22, %v6676_v31  ;;  %v10028_v31 = vld [vmem:[#allocation51_spill] sm:$0xff] }
 0x1df   : > { %5312 = vpow2.f32 %v4924_v57  ;;  %v1707_v13 = vmul.f32 %v6938_v54, %v6861_v41  ;;  %v6998_v10 = vadd.f32 %v671_v29, %v6548_v62  ;;  %v7005_v14 = vsel %vm6916_vm13, %v6889_v50, %v1534_v7 }
 0x1e0   : > { %v6965_v21 = vpop.eup %5302  ;;  %5314 = vrcp.f32 %v6940_v3  ;;  %10021 = vst [vmem:[#allocation77_spill] sm:$0xff] %v6994_v55  ;;  %v1624_v29 = vsel %vm7011_vm5, %v6844_v52, %v1620_v17  ;;  %v1582_v50 = vand.u32 2147483648, %v6903_v39  ;;  %v4936_v26 = vmul.f32 -1.442695, %v6869_v36 }
 0x1e1   : > { %v6983_v63 = vpop.eup %5304  ;;  %v1572_v57 = vmul.f32 %v6965_v21, %v6903_v39  ;;  %5316 = vrcp.f32 %v6944_v15  ;;  %10022 = vst [vmem:[#allocation78_spill] sm:$0xff] %v7005_v14  ;;  %v1708_v7 = vsub.f32 1.0, %v1707_v13  ;;  %vm1577_vm6 = vweird.f32 %v6965_v21 }
 0x1e2   : > { %v6973_v23 = vpop.f32.mrf.mxu0  ;;  %v5307_v60 = vpop.eup %5306  ;;  %5318 = vpow2.f32 %v4930_v8  ;;  %v1580_v8 = vand.u32 2147483647, %v6903_v39  ;;  %v4926_v52 = vmul.f32 -1.442695, %v6994_v55  ;;  %v7031_v17 = vadd.f32 %v1299_v19, %v6859_v32 }
 0x1e3   : > { %v1573_v5 = vsub.f32 1.0, %v1572_v57  ;;  %v5309_v22 = vpop.eup %5308  ;;  %v10026_v57 = vld [vmem:[#allocation40_spill] sm:$0xff]  ;;  %vm1711_vm7 = vweird.f32 %v6861_v41  ;;  %v1715_v13 = vand.u32 2147483647, %v6861_v41  ;;  %vm1576_vm8 = vweird.f32 %v6903_v39 }
 0x1e4   : > { %2038 = vrot.lane.b32.xlu2 %v6585_v9, %s5664_s6  ;;  %v7021_v51 = vpop.eup %5310  ;;  %v1294_v56 = vadd.f32 %v1181_v45, %v10026_v57  ;;  %v7027_v9 = vadd.f32 1.0, %v5307_v60  ;;  %10027 = vst [vmem:[#allocation40_spill] sm:$0xff] %v7031_v17  ;;  %v7041_v45 = vadd.f32 1.0, %v5309_v22  ;;  %v1717_v60 = vand.u32 2147483648, %v6861_v41  ;;  %v1109_v57 = vpop.f32.mrf.mxu2  ;;  %vm1578_vm9 = vmor %vm1576_vm8, %vm1577_vm6 }
 0x1e5   : > { %10025 = vst [vmem:[#allocation79_spill] sm:$0xff] %v7021_v51  ;;  %v1574_v4 = vmul.f32 %v6965_v21, %v1573_v5  ;;  %v5313_v24 = vpop.eup %5312  ;;  %v7048_v19 = vsel %vm6957_vm3, %v1628_v30, %v1624_v29  ;;  %v1583_v55 = vor.u32 1.1754944e-38, %v1582_v50  ;;  %5320 = vpow2.f32 %v4936_v26  ;;  %v7056_v51 = vpop.permute.xlu0 %2004  ;;  %v10034_v26 = vld [vmem:[#allocation38_spill] sm:$0xff] }
 0x1e6   : > { %v1184_v37 = vpop.f32.mrf.mxu3  ;;  %v7037_v5 = vpop.eup %5314  ;;  %10030 = vst [vmem:[#allocation81_spill] sm:$0xff] %v7048_v19  ;;  %vm1581_vm10 = vcmp.eq.f32.partialorder %v1580_v8, 8.507059e+37  ;;  %v7059_v30 = vadd.f32 %v1294_v56, %v10031_v40  ;;  %5322 = vpow2.f32 %v4926_v52  ;;  %v4937_v50 = vmul.f32 -1.442695, %v7031_v17 }
 0x1e7   : > { %10029 = vst [vmem:[#allocation80_spill] sm:$0xff] %v7037_v5  ;;  %v1575_v36 = vadd.f32 %v6965_v21, %v1574_v4  ;;  %v7044_v32 = vpop.eup %5316  ;;  %v1709_v4 = vmul.f32 %v6938_v54, %v1708_v7  ;;  %v7053_v5 = vadd.f32 1.0, %v5313_v24  ;;  %v1289_v7 = vadd.f32 %v1109_v57, %v10034_v26  ;;  %v7088_v52 = vpop.permute.xlu1 %1982 }
 0x1e8   : > { %2040 = vrot.lane.b32.xlu0 %v10028_v31, %s5664_s6  ;;  %v674_v31 = vpop.f32.mrf.mxu1  ;;  %v5319_v22 = vpop.eup %5318  ;;  %10032 = vst [vmem:[#allocation60_spill] sm:$0xff] %v7059_v30  ;;  %5324 = vrcp.f32 %v7041_v45  ;;  %v1662_v24 = vmul.f32 %v7044_v32, %v6944_v15  ;;  %vm1712_vm11 = vweird.f32 %v6938_v54  ;;  %v4932_v8 = vmul.f32 -1.442695, %v7059_v30  ;;  %v10049_v30 = vld [vmem:[#allocation42_spill] sm:$0xff] }
 0x1e9   : > { %v1579_v3 = vsel %vm1578_vm9, %v6965_v21, %v1575_v36  ;;  %v10035_v36 = vld [vmem:[#allocation41_spill] sm:$0xff]  ;;  %v7072_v56 = vadd.f32 1.0, %v5319_v22  ;;  %5326 = vrcp.f32 %v7027_v9  ;;  %vm7084_vm12 = vcmp.eq.f32.partialorder %v1715_v13, 8.507059e+37  ;;  %vm7103_vm13 = vmor %vm1711_vm7, %vm1712_vm11 }
 0x1ea   : > { %v1259_v39 = vpop.f32.mrf.mxu0  ;;  %v7061_v29 = vsel %vm1581_vm10, %v1583_v55, %v1579_v3  ;;  %v1300_v21 = vadd.f32 %v6973_v23, %v10035_v36  ;;  %v1710_v55 = vadd.f32 %v6938_v54, %v1709_v4  ;;  %5328 = vrcp.f32 %v7053_v5 }
 0x1eb   : > { %10033 = vst [vmem:[#allocation82_spill] sm:$0xff] %v7061_v29  ;;  %v2081_v33 = vmul.f32 %v6962_v1, %v7061_v29  ;;  %v7080_v1 = vmul.f32 %v6796_v47, %v7005_v14  ;;  %v5321_v4 = vpop.eup %5320  ;;  %v10038_v47 = vld [vmem:[#allocation56_spill] sm:$0xff]  ;;  %v1295_v40 = vadd.f32 %v1184_v37, %v6526_v49  ;;  %v1663_v13 = vsub.f32 1.0, %v1662_v24 }
 0x1ec   : > { %v7096_v22 = vadd.f32 %v1289_v7, %v10038_v47  ;;  %5330 = vpow2.f32 %v4937_v50  ;;  %v1718_v26 = vor.u32 1.1754944e-38, %v1717_v60  ;;  %v10043_v36 = vand.u32 2147483647, %v6691_v59  ;;  %v5323_v49 = vpop.eup %5322 }
 0x1ed   : > { %2161 = vmatpush.msrb.mxu2 %v2081_v33  ;;  %5332 = vrcp.f32 %v7072_v56  ;;  %v1670_v37 = vand.u32 2147483647, %v6944_v15  ;;  %v1672_v41 = vand.u32 2147483648, %v6944_v15  ;;  %v1714_v60 = vsel %vm7103_vm13, %v6938_v54, %v1710_v55 }
 0x1ee   : > { %3133 = vadd.xlane.f32.xlu1 %v6811_v28  ;;  %v1187_v57 = vpop.f32.mrf.mxu3  ;;  %v7092_v28 = vmul.f32 %v6877_v46, %v7048_v19  ;;  %10039 = vst [vmem:[#allocation38_spill] sm:$0xff] %v7096_v22  ;;  %v7108_v46 = vadd.f32 %v1300_v21, %v6998_v10  ;;  %vm7112_vm14 = vcmp.eq.f32.partialorder %v10043_v36, 8.507059e+37  ;;  %v7122_v50 = vpop.eup %5324  ;;  %v7124_v10 = vadd.f32 1.0, %v5321_v4 }
 0x1ef   : > { %5334 = vpow2.f32 %v4932_v8  ;;  %v675_v59 = vadd.f32 %v674_v31, %v6548_v62  ;;  %v1301_v24 = vadd.f32 %v1259_v39, %v6535_v58  ;;  %v7128_v21 = vpop.permute.xlu2 %1978  ;;  %v4927_v47 = vmul.f32 -1.442695, %v7096_v22  ;;  %v7136_v4 = vpop.eup %5326 }
 0x1f0   : > { %10042 = vst [vmem:[#allocation41_spill] sm:$0xff] %v7108_v46  ;;  %v7133_v3 = vadd.f32 %v1295_v40, %v6758_v27  ;;  %v1588_v54 = vsub.f32 1.0, %v6914_v2  ;;  %v677_v55 = vpop.f32.mrf.mxu1  ;;  %v1664_v8 = vmul.f32 %v7044_v32, %v1663_v13  ;;  %v2011_v31 = vpop.permute.xlu0 %2010  ;;  %v7141_v58 = vsel %vm7084_vm12, %v1718_v26, %v1714_v60  ;;  %v10053_v26 = vld [vmem:[#allocation43_spill] sm:$0xff] }
 0x1f1   : > { %10046 = vst [vmem:[#allocation56_spill] sm:$0xff] %v7124_v10  ;;  %v4938_v39 = vmul.f32 -1.442695, %v7108_v46  ;;  %v1296_v36 = vadd.f32 %v1187_v57, %v10049_v30  ;;  %v7145_v22 = vpop.eup %5328  ;;  %vm1666_vm15 = vweird.f32 %v6944_v15  ;;  %v1673_v27 = vor.u32 1.1754944e-38, %v1672_v41 }
 0x1f2   : > { %10047 = vst [vmem:[#allocation83_spill] sm:$0xff] %v7133_v3  ;;  %v1262_v33 = vpop.f32.mrf.mxu0  ;;  %v7148_v2 = vadd.f32 1.0, %v5323_v49  ;;  %vm1591_vm1 = vweird.f32 %v6773_v48  ;;  %v1752_v40 = vmul.f32 %v7122_v50, %v7041_v45  ;;  %v5331_v13 = vpop.eup %5330  ;;  %5336 = vrcp.f32 %v7124_v10 }
 0x1f3   : > { %10048 = vst [vmem:[#allocation84_spill] sm:$0xff] %v7141_v58  ;;  %vm7154_vm2 = vcmp.eq.f32.partialorder %v1670_v37, 8.507059e+37  ;;  %v7158_v30 = vadd.f32 %v1301_v24, %v675_v59  ;;  %v678_v57 = vadd.f32 %v677_v55, %v6548_v62  ;;  %v1302_v41 = vadd.f32 %v1262_v33, %v10053_v26  ;;  %v7162_v49 = vpop.eup %5332  ;;  %v7174_v24 = vpop.permute.xlu1 %1994 }
 0x1f4   : > { %v7165_v60 = vmul.f32 %v2011_v31, %v7141_v58  ;;  %5338 = vpow2.f32 %v4927_v47  ;;  %v4933_v46 = vmul.f32 -1.442695, %v7133_v3  ;;  %v1589_v17 = vmul.f32 %v6871_v38, %v1588_v54 }
 0x1f5   : > { %10052 = vst [vmem:[#allocation42_spill] sm:$0xff] %v7158_v30  ;;  %v5335_v37 = vpop.eup %5334  ;;  %v1665_v19 = vadd.f32 %v7044_v32, %v1664_v8  ;;  %vm1667_vm3 = vweird.f32 %v7044_v32  ;;  %5340 = vpow2.f32 %v4938_v39  ;;  %v7172_v59 = vadd.f32 %v1296_v36, %v6819_v43 }
 0x1f6   : > { %10054 = vst [vmem:[#allocation43_spill] sm:$0xff] %v7165_v60  ;;  %v1190_v55 = vpop.f32.mrf.mxu3  ;;  %5342 = vrcp.f32 %v7148_v2  ;;  %v7177_v33 = vadd.f32 1.0, %v5331_v13  ;;  %v10057_v47 = vsel %vm6979_vm4, %v6761_v12, %v6910_v34  ;;  %v1753_v8 = vsub.f32 1.0, %v1752_v40  ;;  %vm7197_vm6 = vmor %vm1666_vm15, %vm1667_vm3  ;;  %v10062_v34 = vld [vmem:[#allocation46_spill] sm:$0xff] }
 0x1f7   : > { %10055 = vst [vmem:[#allocation85_spill] sm:$0xff] %v7172_v59  ;;  %v7187_v54 = vsel %vm7112_vm14, %v6822_v18, %v10057_v47  ;;  %v4939_v43 = vmul.f32 -1.442695, %v7158_v30  ;;  %vm1592_vm5 = vweird.f32 %v6871_v38  ;;  %v7191_v36 = vadd.f32 %v1302_v41, %v678_v57  ;;  %v7216_v26 = vpop.permute.xlu2 %1984 }
 0x1f8   : > { %10056 = vst [vmem:[#allocation86_spill] sm:$0xff] %v7177_v33  ;;  %v1512_v31 = vmul.f32 %v6885_v44, %v6806_v16  ;;  %v7201_v12 = vadd.f32 1.0, %v5335_v37  ;;  %5344 = vpow2.f32 %v4933_v46  ;;  %v1590_v18 = vadd.f32 %v6871_v38, %v1589_v17  ;;  %v7205_v39 = vpop.eup %5336  ;;  %vm7228_vm4 = vmor %vm1591_vm1, %vm1592_vm5  ;;  %v2017_v3 = vpop.permute.xlu0 %2016 }
 0x1f9   : > { %10058 = vst [vmem:[#allocation87_spill] sm:$0xff] %v7187_v54  ;;  %v1297_v7 = vadd.f32 %v1190_v55, %v10062_v34  ;;  %v1669_v40 = vsel %vm7197_vm6, %v7044_v32, %v1665_v19  ;;  %v7212_v15 = vmul.f32 %v7088_v52, %v7187_v54  ;;  %v4934_v13 = vmul.f32 -1.442695, %v7172_v59 }
 0x1fa   : > { %10059 = vst [vmem:[#allocation88_spill] sm:$0xff] %v7191_v36  ;;  %v1597_v57 = vand.u32 2147483648, %v6773_v48  ;;  %v5339_v46 = vpop.eup %5338  ;;  %5346 = vrcp.f32 %v7177_v33  ;;  %v1754_v17 = vmul.f32 %v7122_v50, %v1753_v8  ;;  %v1542_v41 = vmul.f32 %v6983_v63, %v6891_v6 }
 0x1fb   : > { %10063 = vst [vmem:[#allocation46_spill] sm:$0xff] %v7205_v39  ;;  %v3295_v32 = vsel %vm413_vm0, %v6883_v35, 0.0  ;;  %v5341_v19 = vpop.eup %5340  ;;  %5348 = vpow2.f32 %v4939_v43  ;;  %v1595_v37 = vand.u32 2147483647, %v6773_v48  ;;  %v4940_v55 = vmul.f32 -1.442695, %v7191_v36 }
 0x1fc   : > { %v1513_v47 = vsub.f32 1.0, %v1512_v31  ;;  %3296 = vadd.xlane.f32.xlu1 %v3295_v32  ;;  %v7234_v8 = vpop.eup %5342  ;;  %v7238_v35 = vsel %vm7154_vm2, %v1673_v27, %v1669_v40  ;;  %5350 = vrcp.f32 %v7201_v12  ;;  %v1594_v43 = vsel %vm7228_vm4, %v6871_v38, %v1590_v18  ;;  %v7259_v18 = vpop.permute.xlu1 %1988 }
 0x1fd   : > { %10066 = vst [vmem:[#allocation89_spill] sm:$0xff] %v7238_v35  ;;  %v7245_v53 = vadd.f32 %v1297_v7, %v6842_v42  ;;  %v7247_v48 = vadd.f32 1.0, %v5339_v46  ;;  %5352 = vpow2.f32 %v4934_v13  ;;  %v1598_v31 = vor.u32 1.1754944e-38, %v1597_v57 }
 0x1fe   : > { %vm1757_vm7 = vweird.f32 %v7122_v50  ;;  %v5345_v34 = vpop.eup %5344  ;;  %v7250_v32 = vadd.f32 1.0, %v5341_v19  ;;  %v1755_v27 = vadd.f32 %v7122_v50, %v1754_v17  ;;  %v1762_v23 = vand.u32 2147483648, %v7041_v45  ;;  %v680_v17 = vpop.f32.mrf.mxu1 }
 0x1ff   : > { %10067 = vst [vmem:[#allocation90_spill] sm:$0xff] %v7245_v53  ;;  %v1543_v40 = vsub.f32 1.0, %v1542_v41  ;;  %v7256_v38 = vmul.f32 %v7128_v21, %v6828_v20  ;;  %vm1596_vm8 = vcmp.eq.f32.partialorder %v1595_v37, 8.507059e+37  ;;  %5354 = vpow2.f32 %v4940_v55  ;;  %v1265_v41 = vpop.f32.mrf.mxu0  ;;  %v7296_v59 = vpop.permute.xlu2 %1996 }
 0x200   : > { %v1514_v42 = vmul.f32 %v6885_v44, %v1513_v47  ;;  %v7261_v7 = vpop.eup %5346  ;;  %v7263_v13 = vsel %vm1596_vm8, %v1598_v31, %v1594_v43  ;;  %vm1756_vm9 = vweird.f32 %v7041_v45  ;;  %v1760_v57 = vand.u32 2147483647, %v7041_v45 }
 0x201   : > { %10068 = vst [vmem:[#allocation91_spill] sm:$0xff] %v7263_v13  ;;  %v4935_v46 = vmul.f32 -1.442695, %v7245_v53  ;;  %v5349_v21 = vpop.eup %5348  ;;  %v7270_v19 = vmul.f32 %v7056_v51, %v7238_v35  ;;  %5356 = vrcp.f32 %v7247_v48  ;;  %v7273_v52 = vadd.f32 1.0, %v5345_v34  ;;  %vm7281_vm10 = vmor %vm1756_vm9, %vm1757_vm7  ;;  %v10072_v53 = vld [vmem:[#allocation47_spill] sm:$0xff] }
 0x202   : > { %v7277_v37 = vmul.f32 %v7174_v24, %v7263_v13  ;;  %v7285_v55 = vpop.eup %5350  ;;  %5358 = vrcp.f32 %v7250_v32  ;;  %v1759_v51 = vsel %vm7281_vm10, %v7122_v50, %v1755_v27  ;;  %v1763_v47 = vor.u32 1.1754944e-38, %v1762_v23 }
 0x203   : > { %v1544_v43 = vmul.f32 %v6983_v63, %v1543_v40  ;;  %v5353_v31 = vpop.eup %5352  ;;  %v1515_v24 = vadd.f32 %v6885_v44, %v1514_v42  ;;  %vm1517_vm11 = vweird.f32 %v6885_v44  ;;  %v681_v34 = vadd.f32 %v680_v17, %v6548_v62 }
 0x204   : > { %10069 = vst [vmem:[#allocation92_spill] sm:$0xff] %v7277_v37  ;;  %v1303_v36 = vadd.f32 %v1265_v41, %v10072_v53  ;;  %v7298_v30 = vadd.f32 1.0, %v5349_v21  ;;  %vm1761_vm12 = vcmp.eq.f32.partialorder %v1760_v57, 8.507059e+37  ;;  %5360 = vpow2.f32 %v4935_v46 }
 0x205   : > { %v1522_v50 = vand.u32 2147483648, %v6806_v16  ;;  %v5355_v27 = vpop.eup %5354  ;;  %v7301_v23 = vsel %vm1761_vm12, %v1763_v47, %v1759_v51  ;;  %vm1516_vm13 = vweird.f32 %v6806_v16  ;;  %v1520_v40 = vand.u32 2147483647, %v6806_v16  ;;  %v10078_v51 = vld [vmem:[#allocation55_spill] sm:$0xff] }
 0x206   : > { %10073 = vst [vmem:[#allocation47_spill] sm:$0xff] %v7298_v30  ;;  %vm1547_vm14 = vweird.f32 %v6983_v63  ;;  %v7306_v42 = vadd.f32 1.0, %v5353_v31  ;;  %vm7308_vm15 = vmor %vm1516_vm13, %vm1517_vm11  ;;  %v1545_v57 = vadd.f32 %v6983_v63, %v1544_v43  ;;  %v1550_v46 = vand.u32 2147483647, %v6891_v6  ;;  %v683_v11 = vpop.f32.mrf.mxu1 }
 0x207   : > { %10074 = vst [vmem:[#allocation93_spill] sm:$0xff] %v7301_v23  ;;  %v1552_v17 = vand.u32 2147483648, %v6891_v6  ;;  %v7315_v41 = vpop.eup %5356  ;;  %v1519_v16 = vsel %vm7308_vm15, %v6885_v44, %v1515_v24  ;;  %v7320_v21 = vadd.f32 %v1303_v36, %v681_v34  ;;  %v1602_v45 = vmul.f32 %v6926_v0, %v6846_v25  ;;  %v7344_v34 = vpop.permute.xlu1 %2000  ;;  %v10085_v36 = vld [vmem:[#allocation76_spill] sm:$0xff] }
 0x208   : > { %v3141_v47 = vsel %vm413_vm0, %v10078_v51, 0.0  ;;  %v7326_v31 = vpop.eup %5358  ;;  %5362 = vrcp.f32 %v7273_v52  ;;  %v7329_v43 = vadd.f32 1.0, %v5355_v27  ;;  %v1523_v58 = vor.u32 1.1754944e-38, %v1522_v50  ;;  %v1268_v35 = vpop.f32.mrf.mxu0 }
 0x209   : > { %10077 = vst [vmem:[#allocation94_spill] sm:$0xff] %v7320_v21  ;;  %vm1546_vm1 = vweird.f32 %v6891_v6  ;;  %3142 = vadd.xlane.f32.xlu1 %v3141_v47  ;;  %5364 = vrcp.f32 %v7298_v30  ;;  %v7334_v44 = vmul.f32 %v2017_v3, %v7301_v23  ;;  %vm1521_vm2 = vcmp.eq.f32.partialorder %v1520_v40, 8.507059e+37  ;;  %v10083_v47 = vld [vmem:[#allocation74_spill] sm:$0xff]  ;;  %v10084_v23 = vld [vmem:[#allocation79_spill] sm:$0xff]  ;;  %v1991_v60 = vpop.permute.xlu2 %1990 }
 0x20a   : > { %vm7338_vm3 = vmor %vm1546_vm1, %vm1547_vm14  ;;  %v1842_v24 = vmul.f32 %v7261_v7, %v7177_v33  ;;  %v5361_v50 = vpop.eup %5360  ;;  %5366 = vrcp.f32 %v7306_v42  ;;  %v7347_v6 = vsel %vm1521_vm2, %v1523_v58, %v1519_v16  ;;  %vm1551_vm5 = vcmp.eq.f32.partialorder %v1550_v46, 8.507059e+37 }
 0x20b   : > { %10079 = vst [vmem:[#allocation95_spill] sm:$0xff] %v7334_v44  ;;  %v1549_v3 = vsel %vm7338_vm3, %v6983_v63, %v1545_v57  ;;  %v1553_v27 = vor.u32 1.1754944e-38, %v1552_v17  ;;  %v4941_v40 = vmul.f32 -1.442695, %v7320_v21  ;;  %v1603_v53 = vsub.f32 1.0, %v1602_v45  ;;  %v10086_v63 = vld [vmem:[#allocation80_spill] sm:$0xff] }
 0x20c   : > { %10082 = vst [vmem:[#allocation96_spill] sm:$0xff] %v7347_v6  ;;  %v1632_v13 = vmul.f32 %v10084_v23, %v10083_v47  ;;  %5368 = vrcp.f32 %v7329_v43  ;;  %v7358_v58 = vmul.f32 %v7216_v26, %v7347_v6  ;;  %v1557_v57 = vmul.f32 %v10086_v63, %v10085_v36  ;;  %v10088_v44 = vld [vmem:[#allocation48_spill] sm:$0xff] }
 0x20d   : > { %v7363_v46 = vadd.f32 1.0, %v5361_v50  ;;  %v7365_v17 = vsel %vm1551_vm5, %v1553_v27, %v1549_v3  ;;  %v1843_v45 = vsub.f32 1.0, %v1842_v24  ;;  %vm1847_vm6 = vweird.f32 %v7261_v7 }
 0x20e   : > { %10087 = vst [vmem:[#allocation74_spill] sm:$0xff] %v7365_v17  ;;  %v1852_v21 = vand.u32 2147483648, %v7177_v33  ;;  %v7369_v20 = vpop.eup %5362  ;;  %v684_v26 = vadd.f32 %v683_v11, %v6548_v62  ;;  %v1304_v54 = vadd.f32 %v1268_v35, %v10088_v44  ;;  %v1677_v16 = vmul.f32 %v7234_v8, %v7148_v2  ;;  %v10090_v44 = vld [vmem:[#allocation59_spill] sm:$0xff] }
 0x20f   : > { %v1558_v6 = vsub.f32 1.0, %v1557_v57  ;;  %v7375_v50 = vpop.eup %5364  ;;  %5370 = vpow2.f32 %v4941_v40  ;;  %vm1846_vm4 = vweird.f32 %v7177_v33  ;;  %v1604_v24 = vmul.f32 %v6926_v0, %v1603_v53 }
 0x210   : > { %10089 = vst [vmem:[#allocation79_spill] sm:$0xff] %v7375_v50  ;;  %v1633_v3 = vsub.f32 1.0, %v1632_v13  ;;  %v1567_v27 = vand.u32 2147483648, %v10085_v36  ;;  %v7380_v14 = vpop.eup %5366  ;;  %vm1562_vm7 = vweird.f32 %v10086_v63  ;;  %v1565_v35 = vand.u32 2147483647, %v10085_v36  ;;  %v1271_v37 = vpop.f32.mrf.mxu0  ;;  %vm7442_vm2 = vmor %vm1846_vm4, %vm1847_vm6 }
 0x211   : > { %v1559_v11 = vmul.f32 %v10086_v63, %v1558_v6  ;;  %v3159_v57 = vsel %vm413_vm0, %v10090_v44, 0.0  ;;  %5372 = vrcp.f32 %v7363_v46  ;;  %v1844_v40 = vmul.f32 %v7261_v7, %v1843_v45 }
 0x212   : > { %v7389_v50 = vor.u32 1.1754944e-38, %v1852_v21  ;;  %vm1607_vm8 = vweird.f32 %v6926_v0  ;;  %3160 = vadd.xlane.f32.xlu1 %v3159_v57  ;;  %v7392_v13 = vpop.eup %5368  ;;  %v7394_v53 = vadd.f32 %v1304_v54, %v684_v26  ;;  %v1678_v6 = vsub.f32 1.0, %v1677_v16  ;;  %v7401_v21 = vpop.permute.xlu1 %2006  ;;  %v10093_v26 = vld [vmem:[#allocation45_spill] sm:$0xff] }
 0x213   : > { %v1560_v30 = vadd.f32 %v10086_v63, %v1559_v11  ;;  %vm1561_vm9 = vweird.f32 %v10085_v36  ;;  %v1605_v39 = vadd.f32 %v6926_v0, %v1604_v24  ;;  %v1610_v10 = vand.u32 2147483647, %v6846_v25 }
 0x214   : > { %10091 = vst [vmem:[#allocation76_spill] sm:$0xff] %v7389_v50  ;;  %v1612_v45 = vand.u32 2147483648, %v6846_v25  ;;  %vm1563_vm10 = vmor %vm1561_vm9, %vm1562_vm7  ;;  %v1568_v57 = vor.u32 1.1754944e-38, %v1567_v27  ;;  %v1634_v54 = vmul.f32 %v10084_v23, %v1633_v3  ;;  %vm1566_vm11 = vcmp.eq.f32.partialorder %v1565_v35, 8.507059e+37  ;;  %v686_v27 = vpop.f32.mrf.mxu1 }
 0x215   : > { %10092 = vst [vmem:[#allocation80_spill] sm:$0xff] %v7394_v53  ;;  %v1564_v16 = vsel %vm1563_vm10, %v10086_v63, %v1560_v30  ;;  %v3135_v36 = vsel %vm413_vm0, %v10093_v26, 0.0  ;;  %v5371_v11 = vpop.eup %5370  ;;  %v2079_v24 = vmul.f32 %v7259_v18, %v7365_v17  ;;  %v7412_v50 = vadd.f32 %v7261_v7, %v1844_v40 }
 0x216   : > { %vm1606_vm12 = vweird.f32 %v6846_v25  ;;  %v7415_v29 = vsel %vm1566_vm11, %v1568_v57, %v1564_v16  ;;  %3136 = vadd.xlane.f32.xlu2 %v3135_v36  ;;  %v4942_v30 = vmul.f32 -1.442695, %v7394_v53  ;;  %v1679_v63 = vmul.f32 %v7234_v8, %v1678_v6  ;;  %v10101_v36 = vld [vmem:[#allocation51_spill] sm:$0xff]  ;;  %v10190_v6 = vld [vmem:[#allocation69_spill] sm:$0xff] }
 0x217   : > { %10094 = vst [vmem:[#allocation48_spill] sm:$0xff] %v7415_v29  ;;  %v2080_v3 = vmul.f32 %v1991_v60, %v7415_v29  ;;  %v1797_v35 = vmul.f32 %v7380_v14, %v7306_v42  ;;  %v7422_v18 = vpop.eup %5372  ;;  %vm7426_vm13 = vmor %vm1606_vm12, %vm1607_vm8  ;;  %vm7430_vm14 = vcmp.eq.f32.partialorder %v1610_v10, 8.507059e+37  ;;  %v1613_v57 = vor.u32 1.1754944e-38, %v1612_v45  ;;  %v7436_v60 = vpop.permute.xlu2 %2002 }
 0x218   : > { %vm1636_vm15 = vweird.f32 %v10083_v47  ;;  %vm1637_vm1 = vweird.f32 %v10084_v23  ;;  %v1609_v10 = vsel %vm7426_vm13, %v6926_v0, %v1605_v39  ;;  %v1635_v45 = vadd.f32 %v10084_v23, %v1634_v54 }
 0x219   : > { %2162 = vmatpush.msrb.mxu2 %v2080_v3  ;;  %v687_v16 = vadd.f32 %v686_v27, %v6548_v62  ;;  %v1305_v53 = vadd.f32 %v1271_v37, %v10101_v36  ;;  %v7452_v26 = vadd.f32 1.0, %v5371_v11  ;;  %v1640_v17 = vand.u32 2147483647, %v10083_v47  ;;  %vm7470_vm5 = vmor %vm1636_vm15, %vm1637_vm1 }
 0x21a   : > { %v1642_v29 = vand.u32 2147483648, %v10083_v47  ;;  %5374 = vpow2.f32 %v4942_v30  ;;  %v1680_v0 = vadd.f32 %v7234_v8, %v1679_v63  ;;  %vm1682_vm3 = vweird.f32 %v7234_v8  ;;  %v10105_v47 = vld [vmem:[#allocation52_spill] sm:$0xff] }
 0x21b   : > { %v1798_v39 = vsub.f32 1.0, %v1797_v35  ;;  %2163 = vmatpush.msrb.mxu2 %v2079_v24  ;;  %v7464_v62 = vsel %vm7430_vm14, %v1613_v57, %v1609_v10  ;;  %v1685_v54 = vand.u32 2147483647, %v7148_v2  ;;  %v1687_v11 = vand.u32 2147483648, %v7148_v2 }
 0x21c   : > { %v1647_v27 = vmul.f32 %v7145_v22, %v7053_v5  ;;  %v1639_v24 = vsel %vm7470_vm5, %v10084_v23, %v1635_v45  ;;  %vm1681_vm6 = vweird.f32 %v7148_v2  ;;  %v7482_v30 = vadd.f32 %v1305_v53, %v687_v16  ;;  %v7498_v2 = vpop.permute.xlu1 %2012  ;;  %v10108_v16 = vld [vmem:[#allocation49_spill] sm:$0xff] }
 0x21d   : > { %2164 = vmatpush.msrb.mxu2 %v7080_v1  ;;  %v3264_v63 = vmul.f32 %v10105_v47, %v10105_v47  ;;  %5376 = vrcp.f32 %v7452_v26  ;;  %v7490_v3 = vmul.f32 %v7296_v59, %v7464_v62  ;;  %vm1641_vm4 = vcmp.eq.f32.partialorder %v1640_v17, 8.507059e+37  ;;  %vm7494_vm7 = vmor %vm1681_vm6, %vm1682_vm3 }
 0x21e   : > { %10104 = vst [vmem:[#allocation59_spill] sm:$0xff] %v7482_v30  ;;  %v1643_v35 = vor.u32 1.1754944e-38, %v1642_v29  ;;  %v1684_v1 = vsel %vm7494_vm7, %v7234_v8, %v1680_v0  ;;  %v1799_v53 = vmul.f32 %v7380_v14, %v1798_v39  ;;  %v1805_v25 = vand.u32 2147483647, %v7306_v42  ;;  %v10109_v39 = vld [vmem:[#allocation50_spill] sm:$0xff] }
 0x21f   : > { %v3304_v59 = vsel %vm413_vm0, %v3264_v63, 0.0  ;;  %2165 = vmatpush.msrb.mxu2 %v7358_v58  ;;  %vm1686_vm8 = vcmp.eq.f32.partialorder %v1685_v54, 8.507059e+37  ;;  %v1688_v17 = vor.u32 1.1754944e-38, %v1687_v11  ;;  %v1648_v40 = vsub.f32 1.0, %v1647_v27  ;;  %v7526_v11 = vpop.permute.xlu0 %2028 }
 0x220   : > { %v7507_v29 = vsel %vm1641_vm4, %v1643_v35, %v1639_v24  ;;  %3305 = vadd.xlane.f32.xlu1 %v3304_v59  ;;  %v5375_v57 = vpop.eup %5374  ;;  %v4943_v8 = vmul.f32 -1.442695, %v7482_v30  ;;  %v1807_v45 = vand.u32 2147483648, %v7306_v42  ;;  %v3156_v58 = vsel %vm413_vm0, %v10108_v16, 0.0  ;;  %10110 = vst [vmem:[#allocation51_spill] sm:$0xff] %v7526_v11  ;;  %v10113_v24 = vld [vmem:[#allocation67_spill] sm:$0xff] }
 0x221   : > { %v7511_v10 = vmul.f32 %v7344_v34, %v7507_v29  ;;  %2166 = vmatpush.msrb.mxu2 %v7212_v15  ;;  %v7518_v36 = vsel %vm1686_vm8, %v1688_v17, %v1684_v1  ;;  %v1722_v0 = vmul.f32 %v7136_v4, %v7027_v9  ;;  %3157 = vadd.xlane.f32.xlu0 %v3156_v58  ;;  %v2009_v34 = vpop.permute.xlu2 %2008  ;;  %vm1801_vm9 = vweird.f32 %v7306_v42 }
 0x222   : > { %v3262_v37 = vmul.f32 %v10109_v39, %v10109_v39  ;;  %v1692_v54 = vmul.f32 %v7315_v41, %v7247_v48  ;;  %v1800_v15 = vadd.f32 %v7380_v14, %v1799_v53  ;;  %vm1802_vm10 = vweird.f32 %v7380_v14 }
 0x223   : > { %vm7531_vm11 = vcmp.eq.f32.partialorder %v1805_v25, 8.507059e+37  ;;  %2167 = vmatpush.msrb.mxu2 %v10113_v24  ;;  %v7536_v63 = vpop.eup %5376  ;;  %v7538_v35 = vadd.f32 1.0, %v5375_v57  ;;  %v1649_v23 = vmul.f32 %v7145_v22, %v1648_v40  ;;  %5378 = vpow2.f32 %v4943_v8  ;;  %vm7546_vm13 = vmor %vm1801_vm9, %vm1802_vm10 }
 0x224   : > { %v3298_v1 = vsel %vm413_vm0, %v3262_v37, 0.0  ;;  %v1693_v59 = vsub.f32 1.0, %v1692_v54  ;;  %v1808_v53 = vor.u32 1.1754944e-38, %v1807_v45  ;;  %v1702_v25 = vand.u32 2147483648, %v7247_v48  ;;  %v10116_v45 = vld [vmem:[#allocation53_spill] sm:$0xff]  ;;  %v7566_v24 = vpop.permute.xlu1 %2018 }
 0x225   : > { %2168 = vmatpush.msrb.mxu2 %v7256_v38  ;;  %3299 = vadd.xlane.f32.xlu2 %v3298_v1  ;;  %vm2146_vm12 = vcmask 523264   ;;  %v1723_v57 = vsub.f32 1.0, %v1722_v0  ;;  %vm1697_vm14 = vweird.f32 %v7315_v41  ;;  %v1700_v8 = vand.u32 2147483647, %v7247_v48  ;;  %v10118_v1 = vld [vmem:[#allocation54_spill] sm:$0xff] }
 0x226   : > { %v1694_v40 = vmul.f32 %v7315_v41, %v1693_v59  ;;  %v10117_v58 = vunpack.i.l.bf16 %v10116_v45  ;;  %v1804_v38 = vsel %vm7546_vm13, %v7380_v14, %v1800_v15  ;;  %vm1652_vm15 = vweird.f32 %v7145_v22 }
 0x227   : > { %v1655_v42 = vand.u32 2147483647, %v7053_v5  ;;  %v1887_v0 = vmul.f32 %v7392_v13, %v7329_v43  ;;  %v1650_v37 = vadd.f32 %v7145_v22, %v1649_v23  ;;  %vm1696_vm1 = vweird.f32 %v7247_v48  ;;  %v2023_v39 = vpop.permute.xlu0 %2022 }
 0x228   : > { %4944 = vmatmul.msk.f32.vlgmr.msrb.gmra.mxu2 %vm2146_vm12, %v10117_v58  ;;  %v1695_v54 = vadd.f32 %v7315_v41, %v1694_v40  ;;  %v3270_v59 = vmul.f32 %v10118_v1, %v10118_v1  ;;  %vm1698_vm3 = vmor %vm1696_vm1, %vm1697_vm14  ;;  %v1703_v14 = vor.u32 1.1754944e-38, %v1702_v25  ;;  %v1767_v15 = vmul.f32 %v7285_v55, %v7201_v12 }
 0x229   : > { %v3263_v17 = vmul.f32 %v10078_v51, %v10078_v51  ;;  %v3268_v23 = vmul.f32 %v10108_v16, %v10108_v16  ;;  %v1724_v40 = vmul.f32 %v7136_v4, %v1723_v57  ;;  %vm1701_vm5 = vcmp.eq.f32.partialorder %v1700_v8, 8.507059e+37  ;;  %v5379_v33 = vpop.eup %5378  ;;  %v7590_v8 = vpop.permute.xlu2 %2014 }
 0x22a   : > { %v1699_v48 = vsel %vm1698_vm3, %v7315_v41, %v1695_v54  ;;  %v3322_v58 = vsel %vm413_vm0, %v3270_v59, 0.0  ;;  %v1657_v25 = vand.u32 2147483648, %v7053_v5  ;;  %v1888_v30 = vsub.f32 1.0, %v1887_v0 }
 0x22b   : > { %v7580_v11 = vsel %vm1701_vm5, %v1703_v14, %v1699_v48  ;;  %3323 = vadd.xlane.f32.xlu1 %v3322_v58  ;;  %v3301_v51 = vsel %vm413_vm0, %v3263_v17, 0.0  ;;  %v7585_v16 = vsel %vm7531_vm11, %v1808_v53, %v1804_v38  ;;  %vm1651_vm6 = vweird.f32 %v7053_v5 }
 0x22c   : > { %v2089_v41 = vmul.f32 %v2009_v34, %v7580_v11  ;;  %3302 = vadd.xlane.f32.xlu0 %v3301_v51  ;;  %v3316_v57 = vsel %vm413_vm0, %v3268_v23, 0.0  ;;  %5380 = vrcp.f32 %v7538_v35  ;;  %v2088_v0 = vmul.f32 %v7401_v21, %v7518_v36  ;;  %vm7597_vm4 = vmor %vm1651_vm6, %vm1652_vm15  ;;  %v7638_v48 = vpop.permute.xlu1 %2030 }
 0x22d   : > { %v1732_v5 = vand.u32 2147483648, %v7027_v9  ;;  %v1768_v53 = vsub.f32 1.0, %v1767_v15  ;;  %3317 = vadd.xlane.f32.xlu2 %v3316_v57  ;;  %v1654_v51 = vsel %vm7597_vm4, %v7145_v22, %v1650_v37  ;;  %v1725_v34 = vadd.f32 %v7136_v4, %v1724_v40  ;;  %v10122_v37 = vld [vmem:[#allocation58_spill] sm:$0xff] }
 0x22e   : > { %vm1726_vm7 = vweird.f32 %v7027_v9  ;;  %vm1727_vm8 = vweird.f32 %v7136_v4  ;;  %2230 = vmatpush.msrb.mxu3 %v2089_v41  ;;  %v10121_v21 = vunpack.i.l.bf16 %v6723_v61  ;;  %v7612_v38 = vmul.f32 %v2023_v39, %v7585_v16 }
 0x22f   : > { %vm1656_vm9 = vcmp.eq.f32.partialorder %v1655_v42, 8.507059e+37  ;;  %v1658_v54 = vor.u32 1.1754944e-38, %v1657_v25  ;;  %v1889_v59 = vmul.f32 %v7392_v13, %v1888_v30  ;;  %v7615_v14 = vadd.f32 1.0, %v5379_v33  ;;  %vm7623_vm11 = vmor %vm1726_vm7, %vm1727_vm8  ;;  %v7655_v27 = vpop.permute.xlu0 %2034 }
 0x230   : > { %4945 = vmatmul.msk.f32.gmra.mxu2 %vm2146_vm12, %v10121_v21  ;;  %v1730_v22 = vand.u32 2147483647, %v7027_v9  ;;  %vm1891_vm10 = vweird.f32 %v7329_v43  ;;  %2231 = vmatpush.msrb.mxu3 %v2088_v0  ;;  %v3276_v15 = vmul.f32 %v10122_v37, %v10122_v37  ;;  %v1733_v39 = vor.u32 1.1754944e-38, %v1732_v5  ;;  %v10141_v21 = vld [vmem:[#allocation48_spill] sm:$0xff] }
 0x231   : > { %v7621_v17 = vsel %vm1656_vm9, %v1658_v54, %v1654_v51  ;;  %v1769_v42 = vmul.f32 %v7285_v55, %v1768_v53  ;;  %v3269_v33 = vmul.f32 %v10090_v44, %v10090_v44  ;;  %v1729_v30 = vsel %vm7623_vm11, %v7136_v4, %v1725_v34 }
 0x232   : > { %v2086_v9 = vmul.f32 %v7436_v60, %v7621_v17  ;;  %2232 = vmatpush.msrb.mxu3 %v7270_v19  ;;  %v1737_v40 = vmul.f32 %v7162_v49, %v7072_v56  ;;  %v3340_v58 = vsel %vm413_vm0, %v3276_v15, 0.0  ;;  %v7641_v25 = vpop.eup %5380  ;;  %v7644_v41 = vadd.f32 %v7392_v13, %v1889_v59  ;;  %v10145_v15 = vld [vmem:[#allocation46_spill] sm:$0xff] }
 0x233   : > { %vm1892_vm13 = vweird.f32 %v7392_v13  ;;  %v1775_v60 = vand.u32 2147483647, %v7201_v12  ;;  %3341 = vadd.xlane.f32.xlu1 %v3340_v58  ;;  %v3319_v4 = vsel %vm413_vm0, %v3269_v33, 0.0  ;;  %5382 = vrcp.f32 %v7615_v14 }
 0x234   : > { %vm1731_vm14 = vcmp.eq.f32.partialorder %v1730_v22, 8.507059e+37  ;;  %v1777_v19 = vand.u32 2147483648, %v7201_v12  ;;  %2233 = vmatpush.msrb.mxu3 %v2086_v9  ;;  %3320 = vadd.xlane.f32.xlu0 %v3319_v4  ;;  %v3144_v57 = vsel %vm413_vm0, %v10105_v47, 0.0  ;;  %v1770_v5 = vadd.f32 %v7285_v55, %v1769_v42  ;;  %vm7669_vm1 = vmor %vm1891_vm10, %vm1892_vm13  ;;  %v7676_v22 = vpop.permute.xlu2 %2026 }
 0x235   : > { %v7653_v0 = vsel %vm1731_vm14, %v1733_v39, %v1729_v30  ;;  %vm1772_vm15 = vweird.f32 %v7285_v55  ;;  %3145 = vadd.xlane.f32.xlu2 %v3144_v57  ;;  %v1812_v53 = vmul.f32 %v7422_v18, %v7363_v46  ;;  %v1738_v59 = vsub.f32 1.0, %v1737_v40  ;;  %v10137_v39 = vld [vmem:[#allocation92_spill] sm:$0xff] }
 0x236   : > { %v7663_v51 = vmul.f32 %v7498_v2, %v7653_v0  ;;  %2234 = vmatpush.msrb.mxu3 %v7511_v10  ;;  %vm1771_vm3 = vweird.f32 %v7201_v12  ;;  %vm7683_vm5 = vcmp.eq.f32.partialorder %v1775_v60, 8.507059e+37  ;;  %v1778_v42 = vor.u32 1.1754944e-38, %v1777_v19  ;;  %v10131_v60 = vld [vmem:[#allocation63_spill] sm:$0xff]  ;;  %v10132_v19 = vld [vmem:[#allocation61_spill] sm:$0xff] }
 0x237   : > { %v1813_v23 = vsub.f32 1.0, %v1812_v53  ;;  %vm7687_vm6 = vmor %vm1771_vm3, %vm1772_vm15  ;;  %vm1741_vm4 = vweird.f32 %v7072_v56  ;;  %v1820_v10 = vand.u32 2147483647, %v7363_v46  ;;  %v1822_v33 = vand.u32 2147483648, %v7363_v46 }
 0x238   : > { %2235 = vmatpush.msrb.mxu3 %v7092_v28  ;;  %v1774_v12 = vsel %vm7687_vm6, %v7285_v55, %v1770_v5  ;;  %vm1817_vm7 = vweird.f32 %v7422_v18  ;;  %v1782_v30 = vmul.f32 %v7369_v20, %v7273_v52  ;;  %v1739_v58 = vmul.f32 %v7162_v49, %v1738_v59  ;;  %v2025_v59 = vpop.permute.xlu1 %2024 }
 0x239   : > { %v1814_v9 = vmul.f32 %v7422_v18, %v1813_v23  ;;  %v7702_v40 = vpop.eup %5382  ;;  %v1857_v28 = vmul.f32 %v7326_v31, %v7250_v32  ;;  %vm1816_vm8 = vweird.f32 %v7363_v46  ;;  %v3150_v55 = vsel %vm413_vm0, %v10131_v60, 0.0 }
 0x23a   : > { %2236 = vmatpush.msrb.mxu3 %v7490_v3  ;;  %v3147_v57 = vsel %vm413_vm0, %v10132_v19, 0.0  ;;  %v3162_v5 = vsel %vm413_vm0, %v10118_v1, 0.0  ;;  %v1783_v53 = vsub.f32 1.0, %v1782_v30  ;;  %vm7716_vm9 = vmor %vm1816_vm8, %vm1817_vm7  ;;  %vm7720_vm10 = vcmp.eq.f32.partialorder %v1820_v10, 8.507059e+37  ;;  %v10162_v1 = vld [vmem:[#allocation66_spill] sm:$0xff] }
 0x23b   : > { %v1815_v4 = vadd.f32 %v7422_v18, %v1814_v9  ;;  %3151 = vadd.xlane.f32.xlu1 %v3150_v55  ;;  %v1823_v3 = vor.u32 1.1754944e-38, %v1822_v33  ;;  %v1792_v9 = vand.u32 2147483648, %v7273_v52  ;;  %v1902_v55 = vmul.f32 %v7536_v63, %v7452_v26 }
 0x23c   : > { %2237 = vmatpush.msrb.mxu3 %v10137_v39  ;;  %3148 = vadd.xlane.f32.xlu0 %v3147_v57  ;;  %v10138_v2 = vunpack.i.h.bf16 %v10116_v45  ;;  %v1784_v10 = vmul.f32 %v7369_v20, %v1783_v53  ;;  %vm1787_vm11 = vweird.f32 %v7369_v20  ;;  %v1790_v33 = vand.u32 2147483647, %v7273_v52  ;;  %v7737_v57 = vpop.permute.xlu0 %2913  ;;  %v2021_v46 = vpop.permute.xlu2 %2020 }
 0x23d   : > { %v1819_v30 = vsel %vm7716_vm9, %v7422_v18, %v1815_v4  ;;  %3163 = vadd.xlane.f32.xlu2 %v3162_v5  ;;  %10139 = vst [vmem:[#allocation52_spill] sm:$0xff] %v7737_v57  ;;  %v1740_v39 = vadd.f32 %v7162_v49, %v1739_v58  ;;  %vm1742_vm13 = vweird.f32 %v7162_v49  ;;  %v1745_v23 = vand.u32 2147483647, %v7072_v56  ;;  %v10149_v57 = vld [vmem:[#allocation72_spill] sm:$0xff] }
 0x23e   : > { %4946 = vmatmul.msk.f32.vlgmr.msrb.gmra.mxu3 %vm2146_vm12, %v10138_v2  ;;  %v7744_v18 = vsel %vm7720_vm10, %v1823_v3, %v1819_v30  ;;  %v10140_v2 = vld [vmem:[#allocation82_spill] sm:$0xff]  ;;  %v1747_v4 = vand.u32 2147483648, %v7072_v56  ;;  %v1785_v53 = vadd.f32 %v7369_v20, %v1784_v10  ;;  %vm1786_vm14 = vweird.f32 %v7273_v52  ;;  %vm7762_vm3 = vmor %vm1741_vm4, %vm1742_vm13  ;;  %v10144_v52 = vld [vmem:[#allocation56_spill] sm:$0xff] }
 0x23f   : > { %2391 = vmatpush.msra.mxu3 %v10140_v2  ;;  %v2097_v5 = vmul.f32 %v2025_v59, %v7744_v18  ;;  %v7753_v58 = vsel %vm7683_vm5, %v1778_v42, %v1774_v12  ;;  %v1858_v54 = vsub.f32 1.0, %v1857_v28  ;;  %vm1788_vm15 = vmor %vm1786_vm14, %vm1787_vm11  ;;  %v1793_v3 = vor.u32 1.1754944e-38, %v1792_v9  ;;  %v10146_v12 = vld [vmem:[#allocation47_spill] sm:$0xff]  ;;  %v10148_v10 = vld [vmem:[#allocation74_spill] sm:$0xff] }
 0x240   : > { %v1903_v30 = vsub.f32 1.0, %v1902_v55  ;;  %v7768_v42 = vmul.f32 %v10145_v15, %v10144_v52  ;;  %vm1791_vm5 = vcmp.eq.f32.partialorder %v1790_v33, 8.507059e+37  ;;  %v10147_v28 = vld [vmem:[#allocation79_spill] sm:$0xff]  ;;  %v2094_v55 = vmul.f32 %v7566_v24, %v7753_v58 }
 0x241   : > { %2392 = vmatpush.msra.mxu3 %v10141_v21  ;;  %2299 = vmatpush.msra.mxu0 %v2097_v5  ;;  %v1789_v21 = vsel %vm1788_vm15, %v7369_v20, %v1785_v53  ;;  %v1872_v9 = vmul.f32 %v10147_v28, %v10146_v12  ;;  %v1744_v56 = vsel %vm7762_vm3, %v7162_v49, %v1740_v39  ;;  %v3168_v5 = vsel %vm413_vm0, %v10149_v57, 0.0  ;;  %v10150_v53 = vld [vmem:[#allocation62_spill] sm:$0xff] }
 0x242   : > { %v7779_v2 = vsel %vm1791_vm5, %v1793_v3, %v1789_v21  ;;  %vm1746_vm6 = vcmp.eq.f32.partialorder %v1745_v23, 8.507059e+37  ;;  %v1748_v20 = vor.u32 1.1754944e-38, %v1747_v4  ;;  %v3165_v24 = vsel %vm413_vm0, %v10150_v53, 0.0  ;;  %v10151_v3 = vld [vmem:[#allocation78_spill] sm:$0xff] }
 0x243   : > { %2393 = vmatpush.msra.mxu3 %v10148_v10  ;;  %2300 = vmatpush.msra.mxu0 %v7612_v38  ;;  %v2095_v33 = vmul.f32 %v2021_v46, %v7779_v2  ;;  %v7788_v59 = vmul.f32 %v7326_v31, %v1858_v54  ;;  %v1904_v39 = vmul.f32 %v7536_v63, %v1903_v30  ;;  %v10152_v46 = vunpack.i.h.bf16 %v6723_v61 }
 0x244   : > { %3169 = vadd.xlane.f32.xlu1 %v3168_v5  ;;  %3166 = vadd.xlane.f32.xlu0 %v3165_v24  ;;  %v1932_v23 = vmul.f32 %v7702_v40, %v7615_v14  ;;  %v7795_v38 = vsel %vm1746_vm6, %v1748_v20, %v1744_v56  ;;  %v3180_v54 = vsel %vm413_vm0, %v10122_v37, 0.0  ;;  %v1873_v21 = vsub.f32 1.0, %v1872_v9  ;;  %v7803_v30 = vpop.xlane.xlu0 %3293  ;;  %v10153_v56 = vld [vmem:[#allocation96_spill] sm:$0xff]  ;;  %v10157_v20 = vld [vmem:[#allocation65_spill] sm:$0xff] }
 0x245   : > { %2394 = vmatpush.msra.mxu3 %v10151_v3  ;;  %2301 = vmatpush.msra.mxu0 %v2095_v33  ;;  %v2092_v10 = vmul.f32 %v7590_v8, %v7795_v38  ;;  %vm1906_vm4 = vweird.f32 %v7452_v26  ;;  %vm1907_vm7 = vweird.f32 %v7536_v63  ;;  %v1912_v33 = vand.u32 2147483648, %v7452_v26  ;;  %v10154_v3 = vld [vmem:[#allocation87_spill] sm:$0xff] }
 0x246   : > { %4947 = vmatmul.msk.f32.gmra.mxu3 %vm2146_vm12, %v10152_v46  ;;  %3181 = vadd.xlane.f32.xlu2 %v3180_v54  ;;  %v1933_v5 = vsub.f32 1.0, %v1932_v23  ;;  %v1942_v9 = vand.u32 2147483648, %v7615_v14  ;;  %v1917_v24 = vmul.f32 %v7641_v25, %v7538_v35  ;;  %v7816_v8 = vadd.f32 %v7536_v63, %v1904_v39  ;;  %v10155_v54 = vld [vmem:[#allocation95_spill] sm:$0xff]  ;;  %vm7855_vm5 = vmor %vm1906_vm4, %vm1907_vm7 }
 0x247   : > { %2395 = vmatpush.msra.mxu3 %v10153_v56  ;;  %2302 = vmatpush.msra.mxu0 %v2094_v55  ;;  %vm1937_vm8 = vweird.f32 %v7702_v40  ;;  %v1940_v23 = vand.u32 2147483647, %v7615_v14  ;;  %vm1862_vm9 = vweird.f32 %v7326_v31  ;;  %v1874_v55 = vmul.f32 %v10147_v28, %v1873_v21  ;;  %v10156_v56 = vld [vmem:[#allocation75_spill] sm:$0xff] }
 0x248   : > { %v1934_v46 = vmul.f32 %v7702_v40, %v1933_v5  ;;  %v3186_v49 = vsel %vm413_vm0, %v10156_v56, 0.0  ;;  %vm1936_vm10 = vweird.f32 %v7615_v14  ;;  %v1918_v39 = vsub.f32 1.0, %v1917_v24 }
 0x249   : > { %2396 = vmatpush.msra.mxu3 %v10154_v3  ;;  %2303 = vmatpush.msra.mxu0 %v10155_v54  ;;  %vm1922_vm11 = vweird.f32 %v7641_v25  ;;  %v1927_v3 = vand.u32 2147483648, %v7538_v35  ;;  %v3265_v4 = vmul.f32 %v10132_v19, %v10132_v19  ;;  %v10158_v54 = vand.u32 2147483647, %v7329_v43  ;;  %vm1938_vm14 = vmor %vm1936_vm10, %vm1937_vm8  ;;  %v7846_v19 = vpop.permute.xlu1 %2036 }
 0x24a   : > { %v1935_v5 = vadd.f32 %v7702_v40, %v1934_v46  ;;  %v1943_v14 = vor.u32 1.1754944e-38, %v1942_v9  ;;  %v1925_v24 = vand.u32 2147483647, %v7538_v35  ;;  %v10161_v46 = vld [vmem:[#allocation70_spill] sm:$0xff]  ;;  %vm1941_vm15 = vcmp.eq.f32.partialorder %v1940_v23, 8.507059e+37  ;;  %v7872_v23 = vpop.permute.xlu2 %2032 }
 0x24b   : > { %2397 = vmatpush.msra.mxu3 %v10157_v20  ;;  %vm7836_vm13 = vcmp.eq.f32.partialorder %v10158_v54, 8.507059e+37  ;;  %2304 = vmatpush.msra.mxu0 %v2092_v10  ;;  %v1919_v20 = vmul.f32 %v7641_v25, %v1918_v39  ;;  %v3183_v37 = vsel %vm413_vm0, %v10161_v46, 0.0  ;;  %vm1921_vm3 = vweird.f32 %v7538_v35  ;;  %v10166_v39 = vld [vmem:[#allocation64_spill] sm:$0xff] }
 0x24c   : > { %3187 = vadd.xlane.f32.xlu1 %v3186_v49  ;;  %v1939_v54 = vsel %vm1938_vm14, %v7702_v40, %v1935_v5  ;;  %3184 = vadd.xlane.f32.xlu0 %v3183_v37  ;;  %v10165_v9 = vunpack.i.l.bf16 %v10116_v45  ;;  %v3307_v35 = vsel %vm413_vm0, %v3265_v4, 0.0  ;;  %v5665_v37 = vmov 32.0   ;;  %vm1923_vm4 = vmor %vm1921_vm3, %vm1922_vm11 }
 0x24d   : > { %2398 = vmatpush.msra.mxu3 %v10162_v1  ;;  %v7859_v10 = vsel %vm1941_vm15, %v1943_v14, %v1939_v54  ;;  %2305 = vmatpush.msra.mxu0 %v7663_v51  ;;  %v1920_v1 = vadd.f32 %v7641_v25, %v1919_v20  ;;  %5384 = vrcp.f32 %v5665_v37  ;;  %v1909_v40 = vsel %vm7855_vm5, %v7536_v63, %v7816_v8  ;;  %v10167_v63 = vld [vmem:[#allocation43_spill] sm:$0xff]  ;;  %v7884_v20 = vpop.xlane.xlu0 %3139 }
 0x24e   : > { %4952 = vmatmul.msk.f32.vlgmr.msra.gmra.mxu3 %vm2146_vm12, %v10165_v9  ;;  %vm1877_vm6 = vweird.f32 %v10147_v28  ;;  %v1928_v51 = vor.u32 1.1754944e-38, %v1927_v3  ;;  %3308 = vadd.xlane.f32.xlu2 %v3307_v35  ;;  %v3267_v4 = vmul.f32 %v10166_v39, %v10166_v39  ;;  %v1875_v5 = vadd.f32 %v10147_v28, %v1874_v55  ;;  %v10168_v35 = vld [vmem:[#allocation57_spill] sm:$0xff] }
 0x24f   : > { %2460 = vmatpush.msrb.mxu3 %v7859_v10  ;;  %v1924_v14 = vsel %vm1923_vm4, %v7641_v25, %v1920_v1  ;;  %vm1926_vm7 = vcmp.eq.f32.partialorder %v1925_v24, 8.507059e+37  ;;  %2306 = vmatpush.msra.mxu0 %v10167_v63  ;;  %v3266_v8 = vmul.f32 %v10131_v60, %v10131_v60  ;;  %v1860_v54 = vadd.f32 %v7326_v31, %v7788_v59 }
 0x250   : > { %v1913_v3 = vor.u32 1.1754944e-38, %v1912_v33  ;;  %v1882_v49 = vand.u32 2147483648, %v10146_v12  ;;  %v7889_v9 = vsel %vm1926_vm7, %v1928_v51, %v1924_v14  ;;  %v10169_v55 = vunpack.i.l.bf16 %v10168_v35 }
 0x251   : > { %v10170_v25 = vsub.f32 1.0, %v7768_v42  ;;  %v10171_v1 = vand.u32 2147483647, %v7452_v26  ;;  %vm1876_vm10 = vweird.f32 %v10146_v12  ;;  %v1880_v59 = vand.u32 2147483647, %v10146_v12  ;;  %2461 = vmatpush.msrb.mxu3 %v7889_v9  ;;  %2414 = vmatpush.msrb.mxu0 %v7580_v11  ;;  %v10196_v42 = vld [vmem:[#allocation71_spill] sm:$0xff] }
 0x252   : > { %4948 = vmatmul.msk.f32.vlgmr.msra.gmra.mxu0 %vm2146_vm12, %v10169_v55  ;;  %v10172_v33 = vand.u32 2147483648, %v7329_v43  ;;  %vm7909_vm11 = vmor %vm1876_vm10, %vm1877_vm6  ;;  %v3313_v26 = vsel %vm413_vm0, %v3267_v4, 0.0  ;;  %v3271_v12 = vmul.f32 %v10150_v53, %v10150_v53  ;;  %vm1861_vm14 = vweird.f32 %v7250_v32 }
 0x253   : > { %v1829_v24 = vmul.f32 %v10145_v15, %v10170_v25  ;;  %vm1911_vm8 = vcmp.eq.f32.partialorder %v10171_v1, 8.507059e+37  ;;  %v7916_v14 = vpop.eup %5384  ;;  %v1865_v43 = vand.u32 2147483647, %v7250_v32  ;;  %v1879_v11 = vsel %vm7909_vm11, %v10147_v28, %v1875_v5  ;;  %vm7934_vm15 = vmor %vm1861_vm14, %vm1862_vm9  ;;  %2415 = vmatpush.msrb.mxu0 %v7518_v36  ;;  %v10181_v25 = vld [vmem:[#allocation89_spill] sm:$0xff] }
 0x254   : > { %v1898_v37 = vor.u32 1.1754944e-38, %v10172_v33  ;;  %v7905_v51 = vsel %vm1911_vm8, %v1913_v3, %v1909_v40  ;;  %3314 = vadd.xlane.f32.xlu1 %v3313_v26  ;;  %v3310_v40 = vsel %vm413_vm0, %v3266_v8, 0.0  ;;  %v10175_v4 = vsel %vm7669_vm1, %v7392_v13, %v7644_v41  ;;  %v7942_v8 = vpop.permute.xlu1 %2900  ;;  %v2039_v26 = vpop.permute.xlu2 %2038  ;;  %v10188_v3 = vld [vmem:[#allocation73_spill] sm:$0xff] }
 0x255   : > { %2462 = vmatpush.msrb.mxu3 %v7905_v51  ;;  %v10178_v28 = vand.u32 2147483648, %v7250_v32  ;;  %v1883_v55 = vor.u32 1.1754944e-38, %v1882_v49  ;;  %v2692_v34 = vmul.f32 32.0, %v7916_v14  ;;  %3311 = vadd.xlane.f32.xlu0 %v3310_v40  ;;  %10179 = vst [vmem:[#allocation67_spill] sm:$0xff] %v7942_v8  ;;  %v1864_v13 = vsel %vm7934_vm15, %v7326_v31, %v1860_v54 }
 0x256   : > { %v1899_v63 = vsel %vm7836_vm13, %v1898_v37, %v10175_v4  ;;  %v1830_v41 = vadd.f32 %v10145_v15, %v1829_v24  ;;  %vm1832_vm1 = vweird.f32 %v10145_v15  ;;  %vm1881_vm9 = vcmp.eq.f32.partialorder %v1880_v59, 8.507059e+37  ;;  %2416 = vmatpush.msrb.mxu0 %v10181_v25  ;;  %v10182_v59 = vld [vmem:[#allocation86_spill] sm:$0xff] }
 0x257   : > { %v1868_v5 = vor.u32 1.1754944e-38, %v10178_v28  ;;  %2463 = vmatpush.msrb.mxu3 %v1899_v63  ;;  %v1837_v32 = vand.u32 2147483648, %v10144_v52  ;;  %v1884_v21 = vsel %vm1881_vm9, %v1883_v55, %v1879_v11  ;;  %v2693_v49 = vsub.f32 1.0, %v2692_v34  ;;  %v10187_v11 = vld [vmem:[#allocation76_spill] sm:$0xff] }
 0x258   : > { %v10180_v36 = vunpack.i.l.bf16 %v6723_v61  ;;  %v3325_v1 = vsel %vm413_vm0, %v3271_v12, 0.0  ;;  %vm1866_vm13 = vcmp.eq.f32.partialorder %v1865_v43, 8.507059e+37  ;;  %vm1831_vm3 = vweird.f32 %v10144_v52  ;;  %2417 = vmatpush.msrb.mxu0 %v7621_v17 }
 0x259   : > { %v1835_v31 = vand.u32 2147483647, %v10144_v52  ;;  %2464 = vmatpush.msrb.mxu3 %v1884_v21  ;;  %3326 = vadd.xlane.f32.xlu2 %v3325_v1  ;;  %v3272_v54 = vmul.f32 %v10149_v57, %v10149_v57  ;;  %v10183_v33 = vand.u32 2147483647, %v10182_v59  ;;  %v1869_v37 = vsel %vm1866_vm13, %v1868_v5, %v1864_v13  ;;  %vm7963_vm6 = vmor %vm1831_vm3, %vm1832_vm1 }
 0x25a   : > { %4953 = vmatmul.msk.f32.gmra.mxu3 %vm2146_vm12, %v10180_v36  ;;  %v2041_v24 = vpop.permute.xlu0 %2040  ;;  %v2694_v12 = vmul.f32 %v7916_v14, %v2693_v49  ;;  %v10186_v43 = vsel %vm7442_vm2, %v7261_v7, %v7412_v50  ;;  %v1834_v4 = vsel %vm7963_vm6, %v10145_v15, %v1830_v41  ;;  %v10189_v28 = vunpack.i.l.bf16 %v10188_v3  ;;  %2418 = vmatpush.msrb.mxu0 %v7507_v29  ;;  %v10191_v29 = vld [vmem:[#allocation81_spill] sm:$0xff] }
 0x25b   : > { %vm1851_vm5 = vcmp.eq.f32.partialorder %v10183_v33, 8.507059e+37  ;;  %v2105_v52 = vmul.f32 %v2041_v24, %v7859_v10  ;;  %2465 = vmatpush.msrb.mxu3 %v1869_v37  ;;  %v1838_v5 = vor.u32 1.1754944e-38, %v1837_v32  ;;  %v3204_v10 = vsel %vm413_vm0, %v10190_v6, 0.0  ;;  %v10192_v32 = vld [vmem:[#allocation68_spill] sm:$0xff] }
 0x25c   : > { %v1854_v40 = vsel %vm1851_vm5, %v10187_v11, %v10186_v43  ;;  %4949 = vmatmul.msk.f32.gmra.mxu0 %vm2146_vm12, %v10189_v28  ;;  %v2695_v17 = vadd.f32 %v7916_v14, %v2694_v12  ;;  %v3277_v7 = vmul.f32 %v10161_v46, %v10161_v46  ;;  %vm1836_vm2 = vcmp.eq.f32.partialorder %v1835_v31, 8.507059e+37  ;;  %3205 = vadd.xlane.f32.xlu1 %v3204_v10  ;;  %v10200_v10 = vld [vmem:[#allocation93_spill] sm:$0xff] }
 0x25d   : > { %2368 = vmatpush.msra.mxu2 %v2105_v52  ;;  %v2104_v50 = vmul.f32 %v2039_v26, %v7889_v9  ;;  %vm2696_vm4 = vweird.f32 %v7916_v14  ;;  %2466 = vmatpush.msrb.mxu3 %v1854_v40  ;;  %v3328_v15 = vsel %vm413_vm0, %v3272_v54, 0.0  ;;  %v5250_v55 = vunpack.i.h.bf16 %v10168_v35 }
 0x25e   : > { %v1839_v34 = vsel %vm1836_vm2, %v1838_v5, %v1834_v4  ;;  %2419 = vmatpush.msrb.mxu0 %v10191_v29  ;;  %3329 = vadd.xlane.f32.xlu0 %v3328_v15  ;;  %v2103_v13 = vmul.f32 %v7846_v19, %v7905_v51  ;;  %v7996_v41 = vsel %vm2696_vm4, %v7916_v14, %v2695_v17  ;;  %v3343_v9 = vsel %vm413_vm0, %v3277_v7, 0.0  ;;  %v10193_v14 = vld [vmem:[#allocation91_spill] sm:$0xff] }
 0x25f   : > { %2467 = vmatpush.msrb.mxu3 %v1839_v34  ;;  %2369 = vmatpush.msra.mxu2 %v2104_v50  ;;  %v3273_v49 = vmul.f32 %v10192_v32, %v10192_v32  ;;  %v2102_v25 = vmul.f32 %v7655_v27, %v1899_v63  ;;  %v3278_v19 = vmul.f32 %v10156_v56, %v10156_v56  ;;  %v10194_v31 = vunpack.i.h.bf16 %v10116_v45  ;;  %v5642_v50 = vld [vmem:[%s9733_s3 + $0x40] sm:$0xff] }
 0x260   : > { %2420 = vmatpush.msrb.mxu0 %v7464_v62  ;;  %v2101_v62 = vmul.f32 %v7872_v23, %v1884_v21  ;;  %v3388_v1 = vmul.f32 %v7803_v30, %v7996_v41  ;;  %v2100_v54 = vmul.f32 %v7638_v48, %v1869_v37  ;;  %v5255_v23 = vunpack.i.h.bf16 %v10188_v3  ;;  %v10195_v30 = vld [vmem:[#allocation51_spill] sm:$0xff] }
 0x261   : > { %v3134_v36 = vpop.xlane.xlu1 %3133  ;;  %3344 = vadd.xlane.f32.xlu2 %v3343_v9  ;;  %2370 = vmatpush.msra.mxu2 %v2103_v13  ;;  %v3331_v63 = vsel %vm413_vm0, %v3273_v49, 0.0  ;;  %v3346_v24 = vsel %vm413_vm0, %v3278_v19, 0.0  ;;  %v2099_v45 = vmul.f32 %v10195_v30, %v1854_v40  ;;  %v3153_v33 = vsel %vm413_vm0, %v10166_v39, 0.0  ;;  %v10202_v9 = vld [vmem:[#allocation84_spill] sm:$0xff]  ;;  %v10203_v49 = vld [vmem:[#allocation38_spill] sm:$0xff] }
 0x262   : > { %4958 = vmatmul.msk.f32.vlgmr.msrb.gmra.mxu3 %vm2146_vm12, %v5250_v55  ;;  %v8007_v51 = vmul.f32 %v3134_v36, %v7996_v41  ;;  %2421 = vmatpush.msrb.mxu0 %v10193_v14  ;;  %v3279_v48 = vmul.f32 %v10196_v42, %v10196_v42  ;;  %v2098_v37 = vmul.f32 %v7676_v22, %v1839_v34  ;;  %v10197_v12 = vunpack.i.h.bf16 %v6723_v61  ;;  %v10198_v61 = vld [vmem:[#allocation40_spill] sm:$0xff] }
 0x263   : > { %2371 = vmatpush.msra.mxu2 %v2102_v25  ;;  %v3284_v26 = vmul.f32 %v10190_v6, %v10190_v6  ;;  %v3171_v11 = vsel %vm413_vm0, %v10192_v32, 0.0  ;;  %v3285_v40 = vmul.f32 %v10198_v61, %v10198_v61  ;;  %v8056_v15 = vperm.slane %v5642_v50, 4 }
 0x264   : > { %4954 = vmatmul.msk.f32.vlgmr.msrb.gmra.mxu0 %vm2146_vm12, %v10194_v31  ;;  %v3420_v27 = vmul.f32 %v8007_v51, %v8007_v51  ;;  %3332 = vadd.xlane.f32.xlu1 %v3331_v63  ;;  %v3349_v52 = vsel %vm413_vm0, %v3279_v48, 0.0  ;;  %v3177_v36 = vsel %vm413_vm0, %v10203_v49, 0.0  ;;  %v10204_v25 = vunpack.i.l.bf16 %v10168_v35  ;;  %v10206_v31 = vld [vmem:[#allocation83_spill] sm:$0xff]  ;;  %v10209_v48 = vld [vmem:[#allocation42_spill] sm:$0xff] }
 0x265   : > { %2372 = vmatpush.msra.mxu2 %v2101_v62  ;;  %v3364_v43 = vsel %vm413_vm0, %v3284_v26, 0.0  ;;  %v3367_v5 = vsel %vm413_vm0, %v3285_v40, 0.0  ;;  %v3207_v62 = vsel %vm413_vm0, %v10198_v61, 0.0  ;;  %v3195_v35 = vsel %vm413_vm0, %v10206_v31, 0.0 }
 0x266   : > { %v3452_v59 = vsub.f32 %v3388_v1, %v3420_v27  ;;  %3347 = vadd.xlane.f32.xlu0 %v3346_v24  ;;  %v10207_v63 = vunpack.i.l.bf16 %v10188_v3  ;;  %v3275_v30 = vmul.f32 %v10203_v49, %v10203_v49  ;;  %v3213_v3 = vsel %vm413_vm0, %v10209_v48, 0.0 }
 0x267   : > { %2373 = vmatpush.msra.mxu2 %v2100_v54  ;;  %v10208_v54 = vld [vmem:[#allocation41_spill] sm:$0xff] }
 0x268   : > { %v3516_v21 = vadd.f32 1e-05, %v3452_v59  ;;  %v3210_v24 = vsel %vm413_vm0, %v10208_v54, 0.0  ;;  %v3337_v26 = vsel %vm413_vm0, %v3275_v30, 0.0 }
 0x269   : > { %3154 = vadd.xlane.f32.xlu2 %v3153_v33  ;;  %2374 = vmatpush.msra.mxu2 %v2099_v45 }
 0x26a   : > { %4959 = vmatmul.msk.f32.gmra.mxu3 %vm2146_vm12, %v5255_v23  ;;  %5386 = vrsqrt.f32 %v3516_v21  ;;  %vm3554_vm8 = vweird.f32 %v3516_v21 }
 0x26b   : > { %2375 = vmatpush.msra.mxu2 %v2098_v37 }
 0x26c   : > { %4955 = vmatmul.msk.f32.gmra.mxu0 %vm2146_vm12, %v10197_v12  ;;  %4950 = vmatmul.msk.f32.vlgmr.msra.gmra.mxu2 %vm2146_vm12, %v5250_v55  ;;  %v10201_v55 = vld [vmem:[#allocation44_spill] sm:$0xff] }
 0x26d   : > { %3350 = vadd.xlane.f32.xlu1 %v3349_v52  ;;  %2437 = vmatpush.msrb.mxu2 %v7744_v18  ;;  %v3484_v34 = vsub.f32 %v10201_v55, %v8007_v51  ;;  %v10205_v51 = vld [vmem:[#allocation60_spill] sm:$0xff] }
 0x26e   : > { %3365 = vadd.xlane.f32.xlu0 %v3364_v43  ;;  %v3192_v14 = vsel %vm413_vm0, %v10205_v51, 0.0  ;;  %v3280_v37 = vmul.f32 %v10205_v51, %v10205_v51 }
 0x26f   : > { %2438 = vmatpush.msrb.mxu2 %v7585_v16  ;;  %v10199_v16 = vld [vmem:[#allocation77_spill] sm:$0xff]  ;;  %v3297_v33 = vpop.xlane.xlu1 %3296 }
 0x270   : > { %v5387_v22 = vpop.eup %5386  ;;  %v3174_v17 = vsel %vm413_vm0, %v10199_v16, 0.0  ;;  %v3274_v27 = vmul.f32 %v10199_v16, %v10199_v16  ;;  %v3389_v52 = vmul.f32 %v3297_v33, %v7996_v41 }
 0x271   : > { %v3549_v4 = vmul.f32 %v5387_v22, %v3516_v21  ;;  %3172 = vadd.xlane.f32.xlu2 %v3171_v11  ;;  %2439 = vmatpush.msrb.mxu2 %v7779_v2  ;;  %vm3555_vm7 = vweird.f32 %v5387_v22  ;;  %v10210_v11 = vld [vmem:[#allocation85_spill] sm:$0xff] }
 0x272   : > { %vm3556_vm10 = vmor %vm3554_vm8, %vm3555_vm7  ;;  %v3334_v59 = vsel %vm413_vm0, %v3274_v27, 0.0  ;;  %v3282_v40 = vmul.f32 %v10210_v11, %v10210_v11 }
 0x273   : > { %v3550_v28 = vmul.f32 %v5387_v22, %v3549_v4  ;;  %2440 = vmatpush.msrb.mxu2 %v7753_v58  ;;  %v3189_v58 = vsel %vm413_vm0, %v10196_v42, 0.0 }
 0x274   : > { %4951 = vmatmul.msk.f32.gmra.mxu2 %vm2146_vm12, %v5255_v23 }
 0x275   : > { %v3551_v18 = vmul.f32 0.5, %v3550_v28  ;;  %3368 = vadd.xlane.f32.xlu1 %v3367_v5  ;;  %2441 = vmatpush.msrb.mxu2 %v10200_v10  ;;  %v3281_v28 = vmul.f32 %v10206_v31, %v10206_v31  ;;  %v3358_v10 = vsel %vm413_vm0, %v3282_v40, 0.0 }
 0x276   : > { %3175 = vadd.xlane.f32.xlu0 %v3174_v17 }
 0x277   : > { %v3552_v7 = vsub.f32 1.5, %v3551_v18  ;;  %2442 = vmatpush.msrb.mxu2 %v7795_v38  ;;  %v8061_v38 = vperm.slane %v5642_v50, 5 }
 0x279   : > { %v3553_v2 = vmul.f32 %v5387_v22, %v3552_v7  ;;  %3190 = vadd.xlane.f32.xlu2 %v3189_v58  ;;  %2443 = vmatpush.msrb.mxu2 %v7653_v0  ;;  %v3286_v7 = vmul.f32 %v10208_v54, %v10208_v54  ;;  %v3355_v58 = vsel %vm413_vm0, %v3281_v28, 0.0 }
 0x27b   : > { %v3557_v29 = vsel %vm3556_vm10, %v5387_v22, %v3553_v2  ;;  %2444 = vmatpush.msrb.mxu2 %v10202_v9  ;;  %v3352_v22 = vsel %vm413_vm0, %v3280_v37, 0.0 }
 0x27c   : > { %v3868_v13 = vmul.f32 %v3557_v29, %v3484_v34  ;;  %4956 = vmatmul.msk.f32.vlgmr.msrb.gmra.mxu2 %vm2146_vm12, %v10204_v25  ;;  %v3370_v29 = vsel %vm413_vm0, %v3286_v7, 0.0  ;;  %v3287_v25 = vmul.f32 %v10209_v48, %v10209_v48  ;;  %v10215_v7 = vld [vmem:[#allocation80_spill] sm:$0xff] }
 0x27d   : > { %3178 = vadd.xlane.f32.xlu1 %v3177_v36 }
 0x27e   : > { %v3901_v19 = vmul.f32 %v8056_v15, %v3868_v13  ;;  %3193 = vadd.xlane.f32.xlu0 %v3192_v14  ;;  %v10211_v13 = vld [vmem:[#allocation88_spill] sm:$0xff] }
 0x27f   : > { %v3288_v9 = vmul.f32 %v10211_v13, %v10211_v13  ;;  %v3216_v28 = vsel %vm413_vm0, %v10211_v13, 0.0 }
 0x280   : > { %v3934_v0 = vadd.f32 %v8061_v38, %v3901_v19 }
 0x281   : > { %3208 = vadd.xlane.f32.xlu2 %v3207_v62  ;;  %v3376_v27 = vsel %vm413_vm0, %v3288_v9, 0.0 }
 0x282   : > { %v4968_v1 = vmul.f32 -1.442695, %v3934_v0 }
 0x284   : > { %5388 = vpow2.f32 %v4968_v1  ;;  %4957 = vmatmul.msk.f32.gmra.mxu2 %vm2146_vm12, %v10207_v63 }
 0x285   : > { %3196 = vadd.xlane.f32.xlu1 %v3195_v35 }
 0x286   : > { %3211 = vadd.xlane.f32.xlu0 %v3210_v24  ;;  %v3373_v24 = vsel %vm413_vm0, %v3287_v25, 0.0  ;;  %v10216_v25 = vld [vmem:[#allocation94_spill] sm:$0xff] }
 0x289   : > { %3335 = vadd.xlane.f32.xlu2 %v3334_v59  ;;  %v3137_v21 = vpop.xlane.xlu2 %3136 }
 0x28a   : > { %v5389_v23 = vpop.eup %5388  ;;  %v3229_v12 = vmul.f32 %v3137_v21, %v7996_v41  ;;  %v3198_v21 = vsel %vm413_vm0, %v10210_v11, 0.0 }
 0x28b   : > { %v4062_v45 = vadd.f32 1.0, %v5389_v23  ;;  %v5643_v23 = vld [vmem:[%s5909_s19] sm:$0xff] }
 0x28c   : > { %v3421_v43 = vmul.f32 %v3229_v12, %v3229_v12 }
 0x28d   : > { %5390 = vrcp.f32 %v4062_v45  ;;  %3214 = vadd.xlane.f32.xlu1 %v3213_v3  ;;  %v4105_v50 = vand.u32 2147483648, %v4062_v45  ;;  %v4103_v34 = vand.u32 2147483647, %v4062_v45  ;;  %vm4099_vm11 = vweird.f32 %v4062_v45  ;;  %v10212_v3 = vld [vmem:[#allocation59_spill] sm:$0xff] }
 0x28e   : > { %3338 = vadd.xlane.f32.xlu0 %v3337_v26  ;;  %v3453_v4 = vsub.f32 %v3389_v52, %v3421_v43  ;;  %v3225_v37 = vsel %vm413_vm0, %v10212_v3, 0.0  ;;  %v10213_v26 = vld [vmem:[#allocation45_spill] sm:$0xff]  ;;  %v10214_v43 = vld [vmem:[#allocation90_spill] sm:$0xff] }
 0x28f   : > { %v4106_v19 = vor.u32 1.1754944e-38, %v4105_v50  ;;  %vm4104_vm15 = vcmp.eq.f32.partialorder %v4103_v34, 8.507059e+37  ;;  %v3485_v52 = vsub.f32 %v10213_v26, %v3229_v12  ;;  %v3283_v12 = vmul.f32 %v10214_v43, %v10214_v43 }
 0x290   : > { %v3517_v17 = vadd.f32 1e-05, %v3453_v4 }
 0x291   : > { %3353 = vadd.xlane.f32.xlu2 %v3352_v22  ;;  %v3201_v22 = vsel %vm413_vm0, %v10214_v43, 0.0  ;;  %v3361_v34 = vsel %vm413_vm0, %v3283_v12, 0.0 }
 0x292   : > { %5392 = vrsqrt.f32 %v3517_v17  ;;  %vm3564_vm9 = vweird.f32 %v3517_v17 }
 0x293   : > { %v5391_v5 = vpop.eup %5390 }
 0x294   : > { %v4095_v18 = vmul.f32 %v5391_v5, %v4062_v45  ;;  %vm4100_vm12 = vweird.f32 %v5391_v5 }
 0x295   : > { %3359 = vadd.xlane.f32.xlu1 %v3358_v10  ;;  %vm4101_vm14 = vmor %vm4099_vm11, %vm4100_vm12 }
 0x296   : > { %v4096_v2 = vsub.f32 1.0, %v4095_v18  ;;  %3356 = vadd.xlane.f32.xlu0 %v3355_v58  ;;  %v3230_v18 = vmul.f32 %v7884_v20, %v7996_v41 }
 0x298   : > { %v4097_v55 = vmul.f32 %v5391_v5, %v4096_v2  ;;  %v5393_v14 = vpop.eup %5392  ;;  %v3222_v2 = vsel %vm413_vm0, %v10215_v7, 0.0  ;;  %v3300_v58 = vpop.xlane.xlu2 %3299  ;;  %v3422_v50 = vmul.f32 %v3230_v18, %v3230_v18 }
 0x299   : > { %3371 = vadd.xlane.f32.xlu2 %v3370_v29  ;;  %v3559_v35 = vmul.f32 %v5393_v14, %v3517_v17  ;;  %vm3565_vm1 = vweird.f32 %v5393_v14 }
 0x29a   : > { %v4098_v36 = vadd.f32 %v5391_v5, %v4097_v55  ;;  %vm3566_vm13 = vmor %vm3564_vm9, %vm3565_vm1  ;;  %v3390_v55 = vmul.f32 %v3300_v58, %v7996_v41 }
 0x29b   : > { %v3560_v59 = vmul.f32 %v5393_v14, %v3559_v35 }
 0x29c   : > { %v4102_v62 = vsel %vm4101_vm14, %v5391_v5, %v4098_v36  ;;  %v3454_v29 = vsub.f32 %v3390_v55, %v3422_v50 }
 0x29d   : > { %v4107_v1 = vsel %vm4104_vm15, %v4106_v19, %v4102_v62  ;;  %3377 = vadd.xlane.f32.xlu1 %v3376_v27  ;;  %v3561_v45 = vmul.f32 0.5, %v3560_v59  ;;  %v3219_v19 = vsel %vm413_vm0, %v10216_v25, 0.0 }
 0x29e   : > { %v4574_v63 = vmul.f32 %v4107_v1, %v3934_v0  ;;  %3374 = vadd.xlane.f32.xlu0 %v3373_v24  ;;  %v3518_v20 = vadd.f32 1e-05, %v3454_v29 }
 0x29f   : > { %v3562_v0 = vsub.f32 1.5, %v3561_v45 }
 0x2a0   : > { %v4606_v30 = vadd.f32 %v5643_v23, %v4574_v63  ;;  %vm3574_vm6 = vweird.f32 %v3518_v20 }
 0x2a1   : > { %3199 = vadd.xlane.f32.xlu2 %v3198_v21  ;;  %v3563_v33 = vmul.f32 %v5393_v14, %v3562_v0  ;;  %v3158_v21 = vpop.xlane.xlu0 %3157 }
 0x2a2   : > { %4638 = vst.msk [vmem:[%s8115_s12] sm:$0xff] %vm413_vm0, %v4606_v30 }
 0x2a3   : > { %v3567_v40 = vsel %vm3566_vm13, %v5393_v14, %v3563_v33  ;;  %v10217_v33 = vld [vmem:[#allocation50_spill] sm:$0xff] }
 0x2a4   : > { %v3869_v4 = vmul.f32 %v3567_v40, %v3485_v52  ;;  %v3143_v40 = vpop.xlane.xlu1 %3142 }
 0x2a5   : > { %3226 = vadd.xlane.f32.xlu1 %v3225_v37  ;;  %v3486_v37 = vsub.f32 %v10217_v33, %v3230_v18  ;;  %v10218_v33 = vld [vmem:[#allocation55_spill] sm:$0xff] }
 0x2a6   : > { %3202 = vadd.xlane.f32.xlu0 %v3201_v22  ;;  %v3902_v5 = vmul.f32 %v8056_v15, %v3869_v4 }
 0x2a8   : > { %v3935_v17 = vadd.f32 %v8061_v38, %v3902_v5 }
 0x2a9   : > { %3217 = vadd.xlane.f32.xlu2 %v3216_v28  ;;  %v5644_v58 = vld [vmem:[%s5909_s19 + $0x8] sm:$0xff] }
 0x2aa   : > { %v4969_v10 = vmul.f32 -1.442695, %v3935_v17 }
 0x2ac   : > { %5394 = vpow2.f32 %v4969_v10 }
 0x2ad   : > { %5396 = vrsqrt.f32 %v3518_v20 }
 0x2ae   : > { %3223 = vadd.xlane.f32.xlu0 %v3222_v2  ;;  %v3231_v2 = vmul.f32 %v3143_v40, %v7996_v41 }
 0x2b0   : > { %v3423_v29 = vmul.f32 %v3231_v2, %v3231_v2 }
 0x2b1   : > { %3362 = vadd.xlane.f32.xlu2 %v3361_v34  ;;  %v3303_v34 = vpop.xlane.xlu0 %3302 }
 0x2b2   : > { %v5395_v9 = vpop.eup %5394 }
 0x2b3   : > { %v4063_v36 = vadd.f32 1.0, %v5395_v9  ;;  %v5397_v14 = vpop.eup %5396 }
 0x2b4   : > { %v3569_v62 = vmul.f32 %v5397_v14, %v3518_v20  ;;  %vm3575_vm3 = vweird.f32 %v5397_v14  ;;  %v3391_v20 = vmul.f32 %v3303_v34, %v7996_v41  ;;  %v3318_v34 = vpop.xlane.xlu2 %3317 }
 0x2b5   : > { %5398 = vrcp.f32 %v4063_v36  ;;  %v4120_v59 = vand.u32 2147483648, %v4063_v36  ;;  %v4118_v45 = vand.u32 2147483647, %v4063_v36  ;;  %vm4114_vm2 = vweird.f32 %v4063_v36  ;;  %vm3576_vm4 = vmor %vm3574_vm6, %vm3575_vm3 }
 0x2b6   : > { %v3570_v35 = vmul.f32 %v5397_v14, %v3569_v62  ;;  %v3455_v9 = vsub.f32 %v3391_v20, %v3423_v29  ;;  %v3161_v29 = vpop.xlane.xlu1 %3160 }
 0x2b7   : > { %v4121_v52 = vor.u32 1.1754944e-38, %v4120_v59  ;;  %vm4119_vm8 = vcmp.eq.f32.partialorder %v4118_v45, 8.507059e+37 }
 0x2b8   : > { %v3571_v63 = vmul.f32 0.5, %v3570_v35 }
 0x2b9   : > { %3220 = vadd.xlane.f32.xlu2 %v3219_v19 }
 0x2ba   : > { %v3572_v23 = vsub.f32 1.5, %v3571_v63 }
 0x2bb   : > { %v5399_v1 = vpop.eup %5398 }
 0x2bc   : > { %v4110_v27 = vmul.f32 %v5399_v1, %v4063_v36  ;;  %vm4115_vm5 = vweird.f32 %v5399_v1  ;;  %v3573_v0 = vmul.f32 %v5397_v14, %v3572_v23  ;;  %v3519_v36 = vadd.f32 1e-05, %v3455_v9 }
 0x2bd   : > { %vm4116_vm7 = vmor %vm4114_vm2, %vm4115_vm5  ;;  %v3396_v9 = vmul.f32 %v3318_v34, %v7996_v41 }
 0x2be   : > { %v4111_v24 = vsub.f32 1.0, %v4110_v27  ;;  %v3577_v22 = vsel %vm3576_vm4, %v5397_v14, %v3573_v0  ;;  %vm3584_vm12 = vweird.f32 %v3519_v36 }
 0x2bf   : > { %v3870_v28 = vmul.f32 %v3577_v22, %v3486_v37  ;;  %v3487_v37 = vsub.f32 %v10218_v33, %v3231_v2 }
 0x2c0   : > { %v4112_v30 = vmul.f32 %v5399_v1, %v4111_v24 }
 0x2c1   : > { %v3903_v10 = vmul.f32 %v8056_v15, %v3870_v28 }
 0x2c2   : > { %v4113_v26 = vadd.f32 %v5399_v1, %v4112_v30 }
 0x2c3   : > { %v3936_v18 = vadd.f32 %v8061_v38, %v3903_v10 }
 0x2c4   : > { %v4117_v4 = vsel %vm4116_vm7, %v5399_v1, %v4113_v26 }
 0x2c5   : > { %v4122_v5 = vsel %vm4119_vm8, %v4121_v52, %v4117_v4  ;;  %v4970_v55 = vmul.f32 -1.442695, %v3936_v18 }
 0x2c6   : > { %v4575_v12 = vmul.f32 %v4122_v5, %v3935_v17 }
 0x2c7   : > { %5400 = vpow2.f32 %v4970_v55 }
 0x2c8   : > { %v4607_v50 = vadd.f32 %v5644_v58, %v4575_v12  ;;  %5402 = vrsqrt.f32 %v3519_v36  ;;  %v3236_v12 = vmul.f32 %v3158_v21, %v7996_v41  ;;  %v3306_v21 = vpop.xlane.xlu1 %3305 }
 0x2ca   : > { %4639 = vst.msk [vmem:[%s8115_s12 + $0x8] sm:$0xff] %vm413_vm0, %v4607_v50  ;;  %v3428_v20 = vmul.f32 %v3236_v12, %v3236_v12 }
 0x2cd   : > { %v5401_v17 = vpop.eup %5400 }
 0x2ce   : > { %v4064_v19 = vadd.f32 1.0, %v5401_v17  ;;  %v5403_v14 = vpop.eup %5402 }
 0x2cf   : > { %v3579_v62 = vmul.f32 %v5403_v14, %v3519_v36  ;;  %vm3585_vm10 = vweird.f32 %v5403_v14  ;;  %v3460_v36 = vsub.f32 %v3396_v9, %v3428_v20 }
 0x2d0   : > { %5404 = vrcp.f32 %v4064_v19  ;;  %v4135_v23 = vand.u32 2147483648, %v4064_v19  ;;  %v4133_v45 = vand.u32 2147483647, %v4064_v19  ;;  %vm3586_vm14 = vmor %vm3584_vm12, %vm3585_vm10  ;;  %vm4129_vm15 = vweird.f32 %v4064_v19 }
 0x2d1   : > { %v3580_v1 = vmul.f32 %v5403_v14, %v3579_v62  ;;  %v5645_v50 = vld [vmem:[%s5909_s19 + $0x10] sm:$0xff]  ;;  %v3524_v17 = vadd.f32 1e-05, %v3460_v36  ;;  %v3392_v36 = vmul.f32 %v3306_v21, %v7996_v41 }
 0x2d2   : > { %v4136_v22 = vor.u32 1.1754944e-38, %v4135_v23  ;;  %vm4134_vm9 = vcmp.eq.f32.partialorder %v4133_v45, 8.507059e+37 }
 0x2d3   : > { %v3581_v63 = vmul.f32 0.5, %v3580_v1  ;;  %vm3634_vm3 = vweird.f32 %v3524_v17 }
 0x2d5   : > { %v3582_v59 = vsub.f32 1.5, %v3581_v63 }
 0x2d6   : > { %v5405_v35 = vpop.eup %5404 }
 0x2d7   : > { %v4125_v27 = vmul.f32 %v5405_v35, %v4064_v19  ;;  %vm4130_vm11 = vweird.f32 %v5405_v35  ;;  %v3583_v0 = vmul.f32 %v5403_v14, %v3582_v59 }
 0x2d8   : > { %vm4131_vm1 = vmor %vm4129_vm15, %vm4130_vm11 }
 0x2d9   : > { %v4126_v24 = vsub.f32 1.0, %v4125_v27  ;;  %v3587_v52 = vsel %vm3586_vm14, %v5403_v14, %v3583_v0 }
 0x2da   : > { %v3871_v40 = vmul.f32 %v3587_v52, %v3487_v37 }
 0x2db   : > { %v4127_v30 = vmul.f32 %v5405_v35, %v4126_v24  ;;  %v8158_v24 = vmul.f32 %v3161_v29, %v7996_v41 }
 0x2dc   : > { %v3904_v5 = vmul.f32 %v8056_v15, %v3871_v40 }
 0x2dd   : > { %v4128_v26 = vadd.f32 %v5405_v35, %v4127_v30  ;;  %v3324_v30 = vpop.xlane.xlu1 %3323  ;;  %v3429_v52 = vmul.f32 %v8158_v24, %v8158_v24 }
 0x2de   : > { %v3937_v58 = vadd.f32 %v8061_v38, %v3904_v5 }
 0x2df   : > { %v4132_v4 = vsel %vm4131_vm1, %v5405_v35, %v4128_v26  ;;  %v3321_v26 = vpop.xlane.xlu0 %3320 }
 0x2e0   : > { %v4137_v28 = vsel %vm4134_vm9, %v4136_v22, %v4132_v4  ;;  %v4971_v55 = vmul.f32 -1.442695, %v3937_v58  ;;  %v10219_v22 = vld [vmem:[#allocation49_spill] sm:$0xff]  ;;  %v3397_v4 = vmul.f32 %v3321_v26, %v7996_v41 }
 0x2e1   : > { %v4576_v10 = vmul.f32 %v4137_v28, %v3936_v18  ;;  %v3492_v40 = vsub.f32 %v10219_v22, %v3236_v12 }
 0x2e2   : > { %5406 = vpow2.f32 %v4971_v55  ;;  %v3146_v55 = vpop.xlane.xlu2 %3145 }
 0x2e3   : > { %v4608_v2 = vadd.f32 %v5645_v50, %v4576_v10  ;;  %5408 = vrsqrt.f32 %v3524_v17  ;;  %v8165_v29 = vmul.f32 %v3146_v55, %v7996_v41 }
 0x2e5   : > { %4640 = vst.msk [vmem:[%s8115_s12 + $0x10] sm:$0xff] %vm413_vm0, %v4608_v2  ;;  %v3461_v2 = vsub.f32 %v3397_v4, %v3429_v52 }
 0x2e7   : > { %v3525_v9 = vadd.f32 1e-05, %v3461_v2 }
 0x2e8   : > { %v5407_v19 = vpop.eup %5406 }
 0x2e9   : > { %v4065_v14 = vadd.f32 1.0, %v5407_v19  ;;  %v5409_v18 = vpop.eup %5408  ;;  %v3424_v19 = vmul.f32 %v8165_v29, %v8165_v29  ;;  %vm3644_vm10 = vweird.f32 %v3525_v9 }
 0x2ea   : > { %v3629_v62 = vmul.f32 %v5409_v18, %v3524_v17  ;;  %vm3635_vm13 = vweird.f32 %v5409_v18  ;;  %v3164_v21 = vpop.xlane.xlu2 %3163 }
 0x2eb   : > { %5410 = vrcp.f32 %v4065_v14  ;;  %v4150_v45 = vand.u32 2147483648, %v4065_v14  ;;  %v4148_v33 = vand.u32 2147483647, %v4065_v14  ;;  %vm3636_vm6 = vmor %vm3634_vm3, %vm3635_vm13  ;;  %vm4144_vm2 = vweird.f32 %v4065_v14 }
 0x2ec   : > { %v3630_v1 = vmul.f32 %v5409_v18, %v3629_v62  ;;  %5412 = vrsqrt.f32 %v3525_v9 }
 0x2ed   : > { %v4151_v10 = vor.u32 1.1754944e-38, %v4150_v45  ;;  %vm4149_vm7 = vcmp.eq.f32.partialorder %v4148_v33, 8.507059e+37  ;;  %v3398_v45 = vmul.f32 %v3324_v30, %v7996_v41 }
 0x2ee   : > { %v3631_v63 = vmul.f32 0.5, %v3630_v1  ;;  %v3456_v1 = vsub.f32 %v3392_v36, %v3424_v19 }
 0x2f0   : > { %v3632_v23 = vsub.f32 1.5, %v3631_v63  ;;  %v3342_v63 = vpop.xlane.xlu1 %3341 }
 0x2f1   : > { %v5411_v35 = vpop.eup %5410 }
 0x2f2   : > { %v4140_v27 = vmul.f32 %v5411_v35, %v4065_v14  ;;  %vm4145_vm5 = vweird.f32 %v5411_v35  ;;  %v3633_v37 = vmul.f32 %v5409_v18, %v3632_v23  ;;  %v5413_v23 = vpop.eup %5412  ;;  %v3182_v2 = vpop.xlane.xlu2 %3181 }
 0x2f3   : > { %vm4146_vm4 = vmor %vm4144_vm2, %vm4145_vm5  ;;  %vm3645_vm8 = vweird.f32 %v5413_v23 }
 0x2f4   : > { %v4141_v59 = vsub.f32 1.0, %v4140_v27  ;;  %v3637_v5 = vsel %vm3636_vm6, %v5409_v18, %v3633_v37  ;;  %v5646_v18 = vld [vmem:[%s5909_s19 + $0x18] sm:$0xff]  ;;  %vm3646_vm12 = vmor %vm3644_vm10, %vm3645_vm8 }
 0x2f5   : > { %v3876_v50 = vmul.f32 %v3637_v5, %v3492_v40 }
 0x2f6   : > { %v4142_v0 = vmul.f32 %v5411_v35, %v4141_v59  ;;  %v3520_v59 = vadd.f32 1e-05, %v3456_v1 }
 0x2f7   : > { %v3909_v12 = vmul.f32 %v8056_v15, %v3876_v50 }
 0x2f8   : > { %v4143_v28 = vadd.f32 %v5411_v35, %v4142_v0  ;;  %v3639_v0 = vmul.f32 %v5413_v23, %v3525_v9  ;;  %v3152_v50 = vpop.xlane.xlu1 %3151  ;;  %vm3594_vm14 = vweird.f32 %v3520_v59 }
 0x2f9   : > { %v8172_v14 = vadd.f32 %v8061_v38, %v3909_v12  ;;  %v8197_v12 = vmul.f32 %v3182_v2, %v7996_v41 }
 0x2fa   : > { %v4147_v34 = vsel %vm4146_vm4, %v5411_v35, %v4143_v28  ;;  %v3149_v35 = vpop.xlane.xlu0 %3148  ;;  %v3640_v37 = vmul.f32 %v5413_v23, %v3639_v0 }
 0x2fb   : > { %v4152_v20 = vsel %vm4149_vm7, %v4151_v10, %v4147_v34  ;;  %v4976_v27 = vmul.f32 -1.442695, %v8172_v14  ;;  %v8191_v34 = vmul.f32 %v3152_v50, %v7996_v41  ;;  %v3436_v1 = vmul.f32 %v8197_v12, %v8197_v12 }
 0x2fc   : > { %v4577_v17 = vmul.f32 %v4152_v20, %v3937_v58  ;;  %v8179_v58 = vmul.f32 %v3164_v21, %v7996_v41  ;;  %v3641_v28 = vmul.f32 0.5, %v3640_v37  ;;  %v8194_v20 = vmul.f32 %v3149_v35, %v7996_v41 }
 0x2fd   : > { %5414 = vpow2.f32 %v4976_v27  ;;  %v3488_v21 = vsub.f32 %v10105_v47, %v8165_v29  ;;  %v3309_v29 = vpop.xlane.xlu2 %3308 }
 0x2fe   : > { %v4609_v62 = vadd.f32 %v5646_v18, %v4577_v17  ;;  %5416 = vrsqrt.f32 %v3520_v59  ;;  %v3430_v33 = vmul.f32 %v8179_v58, %v8179_v58  ;;  %v3642_v30 = vsub.f32 1.5, %v3641_v28 }
 0x2ff   : > { %v3493_v18 = vsub.f32 %v10090_v44, %v8158_v24  ;;  %v3425_v44 = vmul.f32 %v8194_v20, %v8194_v20 }
 0x300   : > { %4641 = vst.msk [vmem:[%s8115_s12 + $0x18] sm:$0xff] %vm413_vm0, %v4609_v62  ;;  %v3462_v26 = vsub.f32 %v3398_v45, %v3430_v33  ;;  %v3643_v36 = vmul.f32 %v5413_v23, %v3642_v30  ;;  %v3404_v62 = vmul.f32 %v3342_v63, %v7996_v41  ;;  %v3426_v33 = vmul.f32 %v8191_v34, %v8191_v34  ;;  %v8215_v63 = vpop.f32.mrf.mxu3 }
 0x302   : > { %v3167_v52 = vpop.xlane.xlu0 %3166  ;;  %v8186_v5 = vadd.f32 1e-05, %v3462_v26  ;;  %v3647_v27 = vsel %vm3646_vm12, %v5413_v23, %v3643_v36  ;;  %v3468_v24 = vsub.f32 %v3404_v62, %v3436_v1 }
 0x303   : > { %v5415_v22 = vpop.eup %5414  ;;  %v8200_v19 = vmul.f32 %v3167_v52, %v7996_v41  ;;  %v3877_v0 = vmul.f32 %v3647_v27, %v3493_v18 }
 0x304   : > { %v5417_v40 = vpop.eup %5416  ;;  %v8184_v4 = vadd.f32 1.0, %v5415_v22  ;;  %v8224_v28 = vadd.f32 1e-05, %v3468_v24  ;;  %vm3654_vm13 = vweird.f32 %v8186_v5 }
 0x305   : > { %v3589_v10 = vmul.f32 %v5417_v40, %v3520_v59  ;;  %vm3595_vm11 = vweird.f32 %v5417_v40  ;;  %v3431_v47 = vmul.f32 %v8200_v19, %v8200_v19  ;;  %v3910_v52 = vmul.f32 %v8056_v15, %v3877_v0 }
 0x306   : > { %5418 = vrcp.f32 %v8184_v4  ;;  %vm4219_vm15 = vweird.f32 %v8184_v4  ;;  %vm3596_vm1 = vmor %vm3594_vm14, %vm3595_vm11  ;;  %v4225_v50 = vand.u32 2147483648, %v8184_v4  ;;  %v3393_v59 = vmul.f32 %v3309_v29, %v7996_v41 }
 0x307   : > { %v3590_v55 = vmul.f32 %v5417_v40, %v3589_v10  ;;  %5420 = vrsqrt.f32 %v8186_v5  ;;  %v8229_v30 = vadd.f32 %v8061_v38, %v3910_v52  ;;  %v4223_v18 = vand.u32 2147483647, %v8184_v4 }
 0x308   : > { %5422 = vrsqrt.f32 %v8224_v28  ;;  %v3457_v62 = vsub.f32 %v3393_v59, %v3425_v44  ;;  %v4226_v24 = vor.u32 1.1754944e-38, %v4225_v50  ;;  %vm3714_vm7 = vweird.f32 %v8224_v28 }
 0x309   : > { %v3591_v17 = vmul.f32 0.5, %v3590_v55  ;;  %v4977_v1 = vmul.f32 -1.442695, %v8229_v30  ;;  %vm4224_vm6 = vcmp.eq.f32.partialorder %v4223_v18, 8.507059e+37 }
 0x30a   : > { %v8207_v35 = vpop.xlane.xlu0 %3184 }
 0x30b   : > { %v3592_v9 = vsub.f32 1.5, %v3591_v17  ;;  %5424 = vpow2.f32 %v4977_v1 }
 0x30c   : > { %v5419_v45 = vpop.eup %5418 }
 0x30d   : > { %v5421_v37 = vpop.eup %5420  ;;  %v4215_v26 = vmul.f32 %v5419_v45, %v8184_v4  ;;  %v3593_v23 = vmul.f32 %v5417_v40, %v3592_v9  ;;  %vm4220_vm9 = vweird.f32 %v5419_v45  ;;  %v8248_v4 = vpop.f32.mrf.mxu3 }
 0x30e   : > { %v3649_v22 = vmul.f32 %v5421_v37, %v8186_v5  ;;  %vm4221_vm3 = vmor %vm4219_vm15, %vm4220_vm9  ;;  %vm3655_vm5 = vweird.f32 %v5421_v37  ;;  %v8245_v50 = vpop.eup %5422 }
 0x30f   : > { %v4216_v10 = vsub.f32 1.0, %v4215_v26  ;;  %v3597_v2 = vsel %vm3596_vm1, %v5417_v40, %v3593_v23  ;;  %v3170_v26 = vpop.xlane.xlu1 %3169  ;;  %vm3656_vm2 = vmor %vm3654_vm13, %vm3655_vm5  ;;  %vm3715_vm4 = vweird.f32 %v8245_v50 }
 0x310   : > { %v3872_v55 = vmul.f32 %v3597_v2, %v3488_v21  ;;  %v3650_v36 = vmul.f32 %v5421_v37, %v3649_v22  ;;  %v8236_v21 = vadd.f32 1e-05, %v3457_v62  ;;  %v10220_v62 = vld [vmem:[#allocation54_spill] sm:$0xff]  ;;  %vm3716_vm10 = vmor %vm3714_vm7, %vm3715_vm4 }
 0x311   : > { %v4217_v17 = vmul.f32 %v5419_v45, %v4216_v10  ;;  %v3327_v10 = vpop.xlane.xlu2 %3326 }
 0x312   : > { %v3905_v27 = vmul.f32 %v8056_v15, %v3872_v55  ;;  %v3651_v9 = vmul.f32 0.5, %v3650_v36  ;;  %v3312_v40 = vpop.xlane.xlu0 %3311  ;;  %5426 = vrsqrt.f32 %v8236_v21  ;;  %v3399_v36 = vmul.f32 %v3327_v10, %v7996_v41 }
 0x313   : > { %v4218_v0 = vadd.f32 %v5419_v45, %v4217_v17  ;;  %v3394_v23 = vmul.f32 %v3312_v40, %v7996_v41  ;;  %v10221_v40 = vld [vmem:[#allocation11_spill] sm:$0xff]  ;;  %vm3604_vm8 = vweird.f32 %v8236_v21 }
 0x314   : > { %v8242_v44 = vadd.f32 %v8061_v38, %v3905_v27  ;;  %v3652_v29 = vsub.f32 1.5, %v3651_v9  ;;  %v8261_v27 = vmul.f32 %v3170_v26, %v7996_v41  ;;  %v3463_v9 = vsub.f32 %v3399_v36, %v3431_v47 }
 0x315   : > { %v4222_v52 = vsel %vm4221_vm3, %v5419_v45, %v4218_v0  ;;  %v3458_v22 = vsub.f32 %v3394_v23, %v3426_v33  ;;  %v3494_v45 = vsub.f32 %v10220_v62, %v8179_v58  ;;  %v3709_v33 = vmul.f32 %v8245_v50, %v8224_v28  ;;  %v5425_v58 = vpop.eup %5424 }
 0x316   : > { %v4227_v2 = vsel %vm4224_vm6, %v4226_v24, %v4222_v52  ;;  %v4972_v59 = vmul.f32 -1.442695, %v8242_v44  ;;  %v3653_v55 = vmul.f32 %v5421_v37, %v3652_v29  ;;  %v8266_v5 = vadd.f32 1e-05, %v3463_v9 }
 0x317   : > { %v4582_v17 = vmul.f32 %v4227_v2, %v8172_v14  ;;  %v8258_v18 = vadd.f32 1e-05, %v3458_v22  ;;  %v3710_v24 = vmul.f32 %v8245_v50, %v3709_v33  ;;  %v8272_v29 = vadd.f32 1.0, %v5425_v58  ;;  %v10222_v22 = vld [vmem:[#allocation61_spill] sm:$0xff]  ;;  %v2400_v58 = vpop.f32.mrf.mxu3 }
 0x318   : > { %5428 = vpow2.f32 %v4972_v59  ;;  %v3657_v1 = vsel %vm3656_vm2, %v5421_v37, %v3653_v55  ;;  %v8268_v23 = vpop.eup %5426  ;;  %v8277_v47 = vmul.f32 %v8207_v35, %v7996_v41  ;;  %v3489_v10 = vsub.f32 %v10222_v22, %v8194_v20  ;;  %v10223_v55 = vld [vmem:[#allocation58_spill] sm:$0xff] }
 0x319   : > { %v4614_v14 = vadd.f32 %v4582_v17, %v10221_v40  ;;  %v3878_v0 = vmul.f32 %v3657_v1, %v3494_v45  ;;  %5430 = vrsqrt.f32 %v8258_v18  ;;  %v3711_v26 = vmul.f32 0.5, %v3710_v24  ;;  %v8295_v17 = vpop.xlane.xlu1 %3187 }
 0x31a   : > { %v3599_v2 = vmul.f32 %v8268_v23, %v8236_v21  ;;  %5432 = vrsqrt.f32 %v8266_v5  ;;  %v8289_v59 = vmul.f32 %v8261_v27, %v8261_v27  ;;  %v3500_v36 = vsub.f32 %v10223_v55, %v8197_v12 }
 0x31b   : > { %4646 = vst.msk [vmem:[%s8115_s12 + $0x40] sm:$0xff] %vm413_vm0, %v4614_v14  ;;  %v3911_v37 = vmul.f32 %v8056_v15, %v3878_v0  ;;  %5434 = vrcp.f32 %v8272_v29  ;;  %v3712_v45 = vsub.f32 1.5, %v3711_v26  ;;  %v8309_v12 = vmul.f32 %v8277_v47, %v8277_v47 }
 0x31c   : > { %v3600_v33 = vmul.f32 %v8268_v23, %v3599_v2  ;;  %v4238_v26 = vand.u32 2147483647, %v8272_v29  ;;  %v4240_v28 = vand.u32 2147483648, %v8272_v29  ;;  %vm3605_vm12 = vweird.f32 %v8268_v23 }
 0x31d   : > { %v8298_v62 = vadd.f32 %v8061_v38, %v3911_v37  ;;  %v3713_v14 = vmul.f32 %v8245_v50, %v3712_v45  ;;  %v3330_v37 = vpop.xlane.xlu0 %3329  ;;  %vm3614_vm11 = vweird.f32 %v8258_v18  ;;  %v8327_v35 = vadd.f32 1e-06, %v2400_v58  ;;  %vm3606_vm1 = vmor %vm3604_vm8, %vm3605_vm12 }
 0x31e   : > { %v5429_v20 = vpop.eup %5428  ;;  %v3601_v0 = vmul.f32 0.5, %v3600_v33  ;;  %v3400_v52 = vmul.f32 %v3330_v37, %v7996_v41  ;;  %vm4234_vm14 = vweird.f32 %v8272_v29  ;;  %vm8333_vm15 = vcmp.eq.f32.partialorder %v4238_v26, 8.507059e+37 }
 0x31f   : > { %v8302_v1 = vpop.eup %5430  ;;  %v8304_v9 = vadd.f32 1.0, %v5429_v20  ;;  %v4978_v40 = vmul.f32 -1.442695, %v8298_v62  ;;  %v3717_v2 = vsel %vm3716_vm10, %v8245_v50, %v3713_v14  ;;  %v4241_v14 = vor.u32 1.1754944e-38, %v4240_v28 }
 0x320   : > { %v3609_v24 = vmul.f32 %v8302_v1, %v8258_v18  ;;  %v8322_v22 = vpop.eup %5432  ;;  %v3602_v55 = vsub.f32 1.5, %v3601_v0  ;;  %v3884_v33 = vmul.f32 %v3717_v2, %v3500_v36  ;;  %vm3615_vm13 = vweird.f32 %v8302_v1 }
 0x321   : > { %5436 = vrcp.f32 %v8304_v9  ;;  %v5435_v45 = vpop.eup %5434  ;;  %v3659_v0 = vmul.f32 %v8322_v22, %v8266_v5  ;;  %vm4159_vm9 = vweird.f32 %v8304_v9  ;;  %vm3664_vm5 = vweird.f32 %v8266_v5  ;;  %vm8366_vm6 = vmor %vm3614_vm11, %vm3615_vm13 }
 0x322   : > { %5438 = vpow2.f32 %v4978_v40  ;;  %v3610_v20 = vmul.f32 %v8302_v1, %v3609_v24  ;;  %v4230_v3 = vmul.f32 %v5435_v45, %v8272_v29  ;;  %v3603_v7 = vmul.f32 %v8268_v23, %v3602_v55  ;;  %v8350_v55 = vpop.xlane.xlu1 %3314 }
 0x323   : > { %v3917_v36 = vmul.f32 %v8056_v15, %v3884_v33  ;;  %v3660_v21 = vmul.f32 %v8322_v22, %v3659_v0  ;;  %vm4235_vm3 = vweird.f32 %v5435_v45  ;;  %vm3665_vm8 = vweird.f32 %v8322_v22 }
 0x324   : > { %v3611_v40 = vmul.f32 0.5, %v3610_v20  ;;  %v4231_v24 = vsub.f32 1.0, %v4230_v3  ;;  %v3607_v58 = vsel %vm3606_vm1, %v8268_v23, %v3603_v7  ;;  %v3464_v20 = vsub.f32 %v3400_v52, %v8289_v59  ;;  %vm4236_vm2 = vmor %vm4234_vm14, %vm4235_vm3 }
 0x325   : > { %v8348_v28 = vadd.f32 %v8061_v38, %v3917_v36  ;;  %v3873_v2 = vmul.f32 %v3607_v58, %v3489_v10  ;;  %v4163_v23 = vand.u32 2147483647, %v8304_v9  ;;  %v3661_v58 = vmul.f32 0.5, %v3660_v21  ;;  %vm3666_vm12 = vmor %vm3664_vm5, %vm3665_vm8 }
 0x326   : > { %v3612_v37 = vsub.f32 1.5, %v3611_v40  ;;  %v4232_v3 = vmul.f32 %v5435_v45, %v4231_v24  ;;  %v8377_v18 = vadd.f32 1e-05, %v3464_v20  ;;  %v10230_v21 = vsub.f32 %v10131_v60, %v8191_v34  ;;  %v10231_v34 = vld [vmem:[#allocation14_spill] sm:$0xff] }
 0x327   : > { %v5437_v26 = vpop.eup %5436  ;;  %v4984_v10 = vmul.f32 -1.442695, %v8348_v28  ;;  %v3906_v36 = vmul.f32 %v8056_v15, %v3873_v2  ;;  %vm8384_vm7 = vcmp.eq.f32.partialorder %v4163_v23, 8.507059e+37  ;;  %v8424_v5 = vmul.f32 %v8295_v17, %v7996_v41 }
 0x328   : > { %v5439_v33 = vpop.eup %5438  ;;  %v4155_v25 = vmul.f32 %v5437_v26, %v8304_v9  ;;  %v3613_v7 = vmul.f32 %v8302_v1, %v3612_v37  ;;  %v4233_v59 = vadd.f32 %v5435_v45, %v4232_v3  ;;  %vm4160_vm4 = vweird.f32 %v5437_v26  ;;  %v3345_v3 = vpop.xlane.xlu2 %3344 }
 0x329   : > { %v8358_v40 = vadd.f32 1.0, %v5439_v33  ;;  %v4165_v37 = vand.u32 2147483648, %v8304_v9  ;;  %vm4161_vm10 = vmor %vm4159_vm9, %vm4160_vm4  ;;  %v3405_v60 = vmul.f32 %v3345_v3, %v7996_v41  ;;  %v3495_v9 = vsub.f32 %v10150_v53, %v8200_v19 }
 0x32a   : > { %v4156_v0 = vsub.f32 1.0, %v4155_v25  ;;  %v3617_v24 = vsel %vm8366_vm6, %v8302_v1, %v3613_v7  ;;  %v4237_v2 = vsel %vm4236_vm2, %v5435_v45, %v4233_v59  ;;  %v8380_v25 = vadd.f32 %v8061_v38, %v3906_v36 }
 0x32b   : > { %5440 = vrcp.f32 %v8358_v40  ;;  %v4242_v1 = vsel %vm8333_vm15, %v4241_v14, %v4237_v2  ;;  %v3874_v7 = vmul.f32 %v3617_v24, %v10230_v21  ;;  %v3662_v36 = vsub.f32 1.5, %v3661_v58 }
 0x32c   : > { %v4157_v33 = vmul.f32 %v5437_v26, %v4156_v0  ;;  %5442 = vpow2.f32 %v4984_v10  ;;  %v4583_v45 = vmul.f32 %v4242_v1, %v8229_v30  ;;  %v4973_v10 = vmul.f32 -1.442695, %v8380_v25 }
 0x32d   : > { %v4166_v50 = vor.u32 1.1754944e-38, %v4165_v37  ;;  %v3907_v14 = vmul.f32 %v8056_v15, %v3874_v7  ;;  %5444 = vrsqrt.f32 %v8377_v18  ;;  %v3663_v30 = vmul.f32 %v8322_v22, %v3662_v36 }
 0x32e   : > { %v4158_v20 = vadd.f32 %v5437_v26, %v4157_v33  ;;  %v4615_v23 = vadd.f32 %v4583_v45, %v10231_v34  ;;  %5446 = vpow2.f32 %v4973_v10  ;;  %v3469_v58 = vsub.f32 %v3405_v60, %v8309_v12 }
 0x32f   : > { %v8407_v24 = vadd.f32 %v8061_v38, %v3907_v14  ;;  %v3667_v53 = vsel %vm3666_vm12, %v8322_v22, %v3663_v30  ;;  %5448 = vrcp.f32 %v8327_v35  ;;  %v4253_v45 = vand.u32 2147483647, %v8358_v40 }
 0x330   : > { %v4162_v52 = vsel %vm4161_vm10, %v5437_v26, %v4158_v20  ;;  %v3206_v26 = vpop.xlane.xlu1 %3205  ;;  %4647 = vst.msk [vmem:[%s8115_s12 + $0x48] sm:$0xff] %vm413_vm0, %v4615_v23  ;;  %v3879_v3 = vmul.f32 %v3667_v53, %v3495_v9  ;;  %v8431_v7 = vadd.f32 1e-05, %v3469_v58  ;;  %v4255_v20 = vand.u32 2147483648, %v8358_v40  ;;  %v3348_v58 = vpop.xlane.xlu0 %3347 }
 0x331   : > { %v5441_v59 = vpop.eup %5440  ;;  %v4167_v0 = vsel %vm8384_vm7, %v4166_v50, %v4162_v52  ;;  %v4974_v12 = vmul.f32 -1.442695, %v8407_v24  ;;  %vm4249_vm14 = vweird.f32 %v8358_v40  ;;  %v8446_v14 = vmul.f32 %v8424_v5, %v8424_v5  ;;  %v2403_v53 = vpop.f32.mrf.mxu3 }
 0x332   : > { %v5443_v37 = vpop.eup %5442  ;;  %v4578_v2 = vmul.f32 %v4167_v0, %v8242_v44  ;;  %v4245_v33 = vmul.f32 %v5441_v59, %v8358_v40  ;;  %v8429_v44 = vmul.f32 %v3206_v26, %v7996_v41  ;;  %vm4250_vm11 = vweird.f32 %v5441_v59 }
 0x333   : > { %v8420_v19 = vadd.f32 1.0, %v5443_v37  ;;  %v8433_v22 = vpop.eup %5444  ;;  %v3912_v36 = vmul.f32 %v8056_v15, %v3879_v3  ;;  %vm4251_vm15 = vmor %vm4249_vm14, %vm4250_vm11  ;;  %v4256_v40 = vor.u32 1.1754944e-38, %v4255_v20  ;;  %v8463_v9 = vmul.f32 %v8350_v55, %v7996_v41 }
 0x334   : > { %v4246_v21 = vsub.f32 1.0, %v4245_v33  ;;  %v5447_v17 = vpop.eup %5446  ;;  %v3669_v50 = vmul.f32 %v8433_v22, %v8377_v18  ;;  %v8467_v26 = vmul.f32 %v8429_v44, %v8429_v44  ;;  %vm4254_vm1 = vcmp.eq.f32.partialorder %v4253_v45, 8.507059e+37 }
 0x335   : > { %5450 = vrcp.f32 %v8420_v19  ;;  %v8450_v34 = vadd.f32 1.0, %v5447_v17  ;;  %v8452_v23 = vpop.eup %5448  ;;  %v8455_v30 = vadd.f32 %v8061_v38, %v3912_v36  ;;  %v3406_v45 = vmul.f32 %v3348_v58, %v7996_v41 }
 0x336   : > { %v4247_v10 = vmul.f32 %v5441_v59, %v4246_v21  ;;  %5452 = vpow2.f32 %v4974_v12  ;;  %v3670_v0 = vmul.f32 %v8433_v22, %v3669_v50  ;;  %v8474_v55 = vmul.f32 %v8452_v23, %v8327_v35 }
 0x337   : > { %v5647_v1 = vld [vmem:[%s5909_s19 + $0x20] sm:$0xff]  ;;  %5454 = vrsqrt.f32 %v8431_v7  ;;  %vm3674_vm9 = vweird.f32 %v8377_v18  ;;  %v8482_v36 = vadd.f32 1e-06, %v2403_v53  ;;  %vm4339_vm13 = vweird.f32 %v8420_v19 }
 0x338   : > { %v4610_v29 = vadd.f32 %v5647_v1, %v4578_v2  ;;  %v4248_v52 = vadd.f32 %v5441_v59, %v4247_v10  ;;  %5456 = vrcp.f32 %v8450_v34  ;;  %v4979_v2 = vmul.f32 -1.442695, %v8455_v30 }
 0x339   : > { %v3671_v33 = vmul.f32 0.5, %v3670_v0  ;;  %v4343_v1 = vand.u32 2147483647, %v8420_v19  ;;  %vm3675_vm3 = vweird.f32 %v8433_v22  ;;  %vm4174_vm2 = vweird.f32 %v8450_v34 }
 0x33a   : > { %4642 = vst.msk [vmem:[%s8115_s12 + $0x20] sm:$0xff] %vm413_vm0, %v4610_v29  ;;  %v4252_v37 = vsel %vm4251_vm15, %v5441_v59, %v4248_v52  ;;  %v4345_v29 = vand.u32 2147483648, %v8420_v19  ;;  %5458 = vpow2.f32 %v4979_v2  ;;  %v10232_v52 = vld [vmem:[#allocation16_spill] sm:$0xff]  ;;  %v8494_v2 = vpop.f32.mrf.mxu0  ;;  %vm3676_vm4 = vmor %vm3674_vm9, %vm3675_vm3  ;;  %v10235_v18 = vsub.f32 %v10149_v57, %v8261_v27 }
 0x33b   : > { %v5451_v12 = vpop.eup %5450  ;;  %v4257_v3 = vsel %vm4254_vm1, %v4256_v40, %v4252_v37  ;;  %v3672_v10 = vsub.f32 1.5, %v3671_v33  ;;  %vm8489_vm6 = vcmp.eq.f32.partialorder %v4343_v1, 8.507059e+37  ;;  %v3155_v33 = vpop.xlane.xlu2 %3154  ;;  %v4178_v1 = vand.u32 2147483647, %v8450_v34 }
 0x33c   : > { %v5453_v21 = vpop.eup %5452  ;;  %v4584_v20 = vmul.f32 %v4257_v3, %v8298_v62  ;;  %v4335_v59 = vmul.f32 %v5451_v12, %v8420_v19  ;;  %vm4340_vm5 = vweird.f32 %v5451_v12  ;;  %v4346_v37 = vor.u32 1.1754944e-38, %v4345_v29 }
 0x33d   : > { %v8479_v17 = vadd.f32 1.0, %v5453_v21  ;;  %v8484_v50 = vpop.eup %5454  ;;  %v3673_v21 = vmul.f32 %v8433_v22, %v3672_v10  ;;  %v4180_v29 = vand.u32 2147483648, %v8450_v34  ;;  %vm4341_vm7 = vmor %vm4339_vm13, %vm4340_vm5  ;;  %vm3724_vm8 = vweird.f32 %v8431_v7 }
 0x33e   : > { %v4616_v0 = vadd.f32 %v4584_v20, %v10232_v52  ;;  %v4336_v40 = vsub.f32 1.0, %v4335_v59  ;;  %v5457_v62 = vpop.eup %5456  ;;  %v3470_v20 = vsub.f32 %v3406_v45, %v8446_v14  ;;  %v3719_v59 = vmul.f32 %v8484_v50, %v8431_v7 }
 0x33f   : > { %5460 = vrcp.f32 %v8479_v17  ;;  %v4170_v3 = vmul.f32 %v5457_v62, %v8450_v34  ;;  %v3677_v10 = vsel %vm3676_vm4, %v8433_v22, %v3673_v21  ;;  %v8512_v14 = vmul.f32 %v3155_v33, %v7996_v41 }
 0x340   : > { %4648 = vst.msk [vmem:[%s8115_s12 + $0x50] sm:$0xff] %vm413_vm0, %v4616_v0  ;;  %v4337_v53 = vmul.f32 %v5451_v12, %v4336_v40  ;;  %v5459_v52 = vpop.eup %5458  ;;  %v3880_v60 = vmul.f32 %v3677_v10, %v10235_v18  ;;  %v3720_v8 = vmul.f32 %v8484_v50, %v3719_v59  ;;  %5462 = vrcp.f32 %v8482_v36 }
 0x341   : > { %v4171_v40 = vsub.f32 1.0, %v4170_v3  ;;  %v8517_v45 = vadd.f32 1.0, %v5459_v52  ;;  %vm4175_vm10 = vweird.f32 %v5457_v62  ;;  %v8525_v33 = vadd.f32 1e-05, %v3470_v20  ;;  %v10238_v52 = vld [vmem:[#allocation23_spill] sm:$0xff] }
 0x342   : > { %v4338_v0 = vadd.f32 %v5451_v12, %v4337_v53  ;;  %vm8529_vm12 = vcmp.eq.f32.partialorder %v4178_v1, 8.507059e+37  ;;  %v4181_v57 = vor.u32 1.1754944e-38, %v4180_v29  ;;  %v3427_v20 = vmul.f32 %v8512_v14, %v8512_v14  ;;  %vm4176_vm11 = vmor %vm4174_vm2, %vm4175_vm10 }
 0x343   : > { %v4172_v53 = vmul.f32 %v5457_v62, %v4171_v40  ;;  %5464 = vrcp.f32 %v8517_v45  ;;  %v4193_v58 = vand.u32 2147483647, %v8479_v17  ;;  %v3913_v1 = vmul.f32 %v8056_v15, %v3880_v60  ;;  %v8553_v60 = vpop.f32.mrf.mxu0 }
 0x344   : > { %v4342_v22 = vsel %vm4341_vm7, %v5451_v12, %v4338_v0  ;;  %v3721_v29 = vmul.f32 0.5, %v3720_v8  ;;  %5466 = vrsqrt.f32 %v8525_v33  ;;  %vm3725_vm14 = vweird.f32 %v8484_v50 }
 0x345   : > { %v5461_v3 = vpop.eup %5460  ;;  %v4347_v19 = vsel %vm8489_vm6, %v4346_v37, %v4342_v22  ;;  %v4173_v59 = vadd.f32 %v5457_v62, %v4172_v53  ;;  %v4195_v37 = vand.u32 2147483648, %v8479_v17  ;;  %v8550_v18 = vadd.f32 %v8061_v38, %v3913_v1  ;;  %vm3726_vm13 = vmor %vm3724_vm8, %vm3725_vm14 }
 0x346   : > { %v4590_v27 = vmul.f32 %v4347_v19, %v8348_v28  ;;  %v4185_v12 = vmul.f32 %v5461_v3, %v8479_v17  ;;  %v8545_v10 = vpop.eup %5462  ;;  %v3722_v22 = vsub.f32 1.5, %v3721_v29  ;;  %vm4190_vm15 = vweird.f32 %v5461_v3 }
 0x347   : > { %v4177_v28 = vsel %vm4176_vm11, %v5457_v62, %v4173_v59  ;;  %v3459_v53 = vsub.f32 %v8463_v9, %v3427_v20  ;;  %vm4189_vm1 = vweird.f32 %v8479_v17  ;;  %vm8560_vm9 = vcmp.eq.f32.partialorder %v4193_v58, 8.507059e+37  ;;  %v3366_v59 = vpop.xlane.xlu0 %3365  ;;  %v3333_v9 = vpop.xlane.xlu1 %3332 }
 0x348   : > { %v4622_v0 = vadd.f32 %v4590_v27, %v10238_v52  ;;  %v4186_v40 = vsub.f32 1.0, %v4185_v12  ;;  %v4182_v34 = vsel %vm8529_vm12, %v4181_v57, %v4177_v28  ;;  %v4980_v57 = vmul.f32 -1.442695, %v8550_v18  ;;  %vm4191_vm3 = vmor %vm4189_vm1, %vm4190_vm15 }
 0x349   : > { %v4579_v8 = vmul.f32 %v4182_v34, %v8380_v25  ;;  %v5465_v19 = vpop.eup %5464  ;;  %v3723_v27 = vmul.f32 %v8484_v50, %v3722_v22  ;;  %v4196_v29 = vor.u32 1.1754944e-38, %v4195_v37  ;;  %v4268_v17 = vand.u32 2147483647, %v8517_v45  ;;  %v3173_v22 = vpop.xlane.xlu2 %3172 }
 0x34a   : > { %4654 = vst.msk [vmem:[%s8115_s12 + $0x80] sm:$0xff] %vm413_vm0, %v4622_v0  ;;  %v4187_v62 = vmul.f32 %v5461_v3, %v4186_v40  ;;  %v4260_v52 = vmul.f32 %v5465_v19, %v8517_v45  ;;  %5468 = vpow2.f32 %v4980_v57  ;;  %v8575_v58 = vadd.f32 1e-05, %v3459_v53  ;;  %v5467_v0 = vpop.eup %5466 }
 0x34b   : > { %v3727_v20 = vsel %vm3726_vm13, %v8484_v50, %v3723_v27  ;;  %v10241_v40 = vsub.f32 %v10161_v46, %v8277_v47  ;;  %v3412_v34 = vmul.f32 %v3366_v59, %v7996_v41  ;;  %v4270_v50 = vand.u32 2147483648, %v8517_v45 }
 0x34c   : > { %v4188_v25 = vadd.f32 %v5461_v3, %v4187_v62  ;;  %v4261_v28 = vsub.f32 1.0, %v4260_v52  ;;  %v3729_v62 = vmul.f32 %v5467_v0, %v8525_v33  ;;  %5470 = vrsqrt.f32 %v8575_v58 }
 0x34d   : > { %v3885_v7 = vmul.f32 %v3727_v20, %v10241_v40  ;;  %vm4265_vm5 = vweird.f32 %v5465_v19  ;;  %v3401_v47 = vmul.f32 %v3333_v9, %v7996_v41  ;;  %v3476_v27 = vsub.f32 %v3412_v34, %v8467_v26  ;;  %v2423_v9 = vpop.f32.mrf.mxu0 }
 0x34e   : > { %v4192_v37 = vsel %vm4191_vm3, %v5461_v3, %v4188_v25  ;;  %v4262_v53 = vmul.f32 %v5465_v19, %v4261_v28  ;;  %v3730_v57 = vmul.f32 %v5467_v0, %v3729_v62  ;;  %v8593_v21 = vmul.f32 %v3173_v22, %v7996_v41 }
 0x34f   : > { %v3918_v46 = vmul.f32 %v8056_v15, %v3885_v7  ;;  %vm4264_vm6 = vweird.f32 %v8517_v45  ;;  %vm4269_vm4 = vcmp.eq.f32.partialorder %v4268_v17, 8.507059e+37  ;;  %v8600_v20 = vadd.f32 1e-05, %v3476_v27  ;;  %v3351_v22 = vpop.xlane.xlu1 %3350 }
 0x350   : > { %v5469_v25 = vpop.eup %5468  ;;  %vm4266_vm2 = vmor %vm4264_vm6, %vm4265_vm5  ;;  %v3731_v52 = vmul.f32 0.5, %v3730_v57  ;;  %v3433_v45 = vmul.f32 %v8593_v21, %v8593_v21  ;;  %vm3735_vm7 = vweird.f32 %v5467_v0  ;;  %vm3734_vm8 = vweird.f32 %v8525_v33 }
 0x351   : > { %v5648_v12 = vld [vmem:[%s5909_s19 + $0x28] sm:$0xff]  ;;  %5472 = vrsqrt.f32 %v8600_v20  ;;  %vm3736_vm10 = vmor %vm3734_vm8, %vm3735_vm7  ;;  %v2477_v27 = vsub.f32 1.0, %v8474_v55  ;;  %v8631_v33 = vmul.f32 %v3351_v22, %v7996_v41  ;;  %vm3624_vm12 = vweird.f32 %v8575_v58 }
 0x352   : > { %v4611_v1 = vadd.f32 %v5648_v12, %v4579_v8  ;;  %v4197_v8 = vsel %vm8560_vm9, %v4196_v29, %v4192_v37  ;;  %v4271_v29 = vor.u32 1.1754944e-38, %v4270_v50  ;;  %v8604_v37 = vadd.f32 1.0, %v5469_v25  ;;  %v8609_v40 = vpop.eup %5470 }
 0x353   : > { %v4580_v3 = vmul.f32 %v4197_v8, %v8407_v24  ;;  %v8598_v24 = vadd.f32 %v8061_v38, %v3918_v46  ;;  %v3732_v34 = vsub.f32 1.5, %v3731_v52  ;;  %v8618_v8 = vadd.f32 1e-06, %v2423_v9 }
 0x354   : > { %4643 = vst.msk [vmem:[%s8115_s12 + $0x28] sm:$0xff] %vm413_vm0, %v4611_v1  ;;  %v4263_v1 = vadd.f32 %v5465_v19, %v4262_v53  ;;  %5474 = vrcp.f32 %v8604_v37  ;;  %v3619_v62 = vmul.f32 %v8609_v40, %v8575_v58  ;;  %v3508_v46 = vsub.f32 %v10190_v6, %v8429_v44 }
 0x355   : > { %v4985_v28 = vmul.f32 -1.442695, %v8598_v24  ;;  %v3733_v50 = vmul.f32 %v5467_v0, %v3732_v34  ;;  %v3465_v57 = vsub.f32 %v3401_v47, %v3433_v45  ;;  %v4283_v55 = vand.u32 2147483647, %v8604_v37  ;;  %v2426_v45 = vpop.f32.mrf.mxu0 }
 0x356   : > { %v4267_v26 = vsel %vm4266_vm2, %v5465_v19, %v4263_v1  ;;  %v8616_v19 = vmul.f32 %v8545_v10, %v8482_v36  ;;  %vm4279_vm11 = vweird.f32 %v8604_v37  ;;  %vm3625_vm14 = vweird.f32 %v8609_v40 }
 0x357   : > { %v4272_v7 = vsel %vm4269_vm4, %v4271_v29, %v4267_v26  ;;  %5476 = vpow2.f32 %v4985_v28  ;;  %v8638_v25 = vadd.f32 1e-05, %v3465_v57  ;;  %v8640_v29 = vpop.eup %5472  ;;  %vm3794_vm15 = vweird.f32 %v8600_v20  ;;  %vm3626_vm13 = vmor %vm3624_vm12, %vm3625_vm14 }
 0x358   : > { %v4585_v17 = vmul.f32 %v4272_v7, %v8455_v30  ;;  %v3502_v30 = vsub.f32 %v10156_v56, %v8424_v5  ;;  %v2491_v1 = vsub.f32 1.0, %v8616_v19  ;;  %v3491_v5 = vsub.f32 %v10166_v39, %v8512_v14 }
 0x359   : > { %5478 = vrcp.f32 %v8618_v8  ;;  %v3789_v26 = vmul.f32 %v8640_v29, %v8600_v20  ;;  %v2478_v22 = vmul.f32 %v8452_v23, %v2477_v27  ;;  %vm8661_vm1 = vcmp.eq.f32.partialorder %v4283_v55, 8.507059e+37 }
 0x35a   : > { %v5475_v52 = vpop.eup %5474  ;;  %5480 = vrsqrt.f32 %v8638_v25  ;;  %v8669_v57 = vadd.f32 1e-06, %v2426_v45  ;;  %vm3795_vm3 = vweird.f32 %v8640_v29  ;;  %vm2481_vm5 = vweird.f32 %v8452_v23 }
 0x35b   : > { %v5649_v59 = vld [vmem:[%s5909_s19 + $0x30] sm:$0xff]  ;;  %v4275_v14 = vmul.f32 %v5475_v52, %v8604_v37  ;;  %vm4280_vm9 = vweird.f32 %v5475_v52  ;;  %v2479_v58 = vadd.f32 %v8452_v23, %v2478_v22  ;;  %vm2480_vm2 = vweird.f32 %v8327_v35  ;;  %vm3796_vm8 = vmor %vm3794_vm15, %vm3795_vm3 }
 0x35c   : > { %v4612_v12 = vadd.f32 %v5649_v59, %v4580_v3  ;;  %v10242_v3 = vld [vmem:[#allocation18_spill] sm:$0xff]  ;;  %v3737_v59 = vsel %vm3736_vm10, %v5467_v0, %v3733_v50  ;;  %v4285_v0 = vand.u32 2147483648, %v8604_v37  ;;  %vm4281_vm6 = vmor %vm4279_vm11, %vm4280_vm9  ;;  %vm3684_vm11 = vweird.f32 %v8638_v25 }
 0x35d   : > { %v4617_v53 = vadd.f32 %v4585_v17, %v10242_v3  ;;  %v3886_v56 = vmul.f32 %v3737_v59, %v3502_v30  ;;  %v5477_v39 = vpop.eup %5476  ;;  %v3790_v17 = vmul.f32 %v8640_v29, %v3789_v26  ;;  %v4276_v50 = vsub.f32 1.0, %v4275_v14  ;;  %vm8692_vm4 = vmor %vm2480_vm2, %vm2481_vm5 }
 0x35e   : > { %4644 = vst.msk [vmem:[%s8115_s12 + $0x30] sm:$0xff] %vm413_vm0, %v4612_v12  ;;  %v3620_v12 = vmul.f32 %v8609_v40, %v3619_v62  ;;  %v8654_v7 = vadd.f32 1.0, %v5477_v39  ;;  %v4286_v30 = vor.u32 1.1754944e-38, %v4285_v0  ;;  %v2484_v59 = vand.u32 2147483647, %v8327_v35 }
 0x35f   : > { %4649 = vst.msk [vmem:[%s8115_s12 + $0x58] sm:$0xff] %vm413_vm0, %v4617_v53  ;;  %v3919_v9 = vmul.f32 %v8056_v15, %v3886_v56  ;;  %v2469_v53 = vpop.f32.mrf.mxu3  ;;  %v8672_v27 = vpop.eup %5478  ;;  %v3791_v0 = vmul.f32 0.5, %v3790_v17  ;;  %vm2494_vm5 = vweird.f32 %v8482_v36 }
 0x360   : > { %v3621_v47 = vmul.f32 0.5, %v3620_v12  ;;  %5482 = vrcp.f32 %v8654_v7  ;;  %v4277_v12 = vmul.f32 %v5475_v52, %v4276_v50  ;;  %vm8696_vm7 = vcmp.eq.f32.partialorder %v2484_v59, 8.507059e+37 }
 0x361   : > { %v8657_v34 = vadd.f32 %v8061_v38, %v3919_v9  ;;  %v3792_v39 = vsub.f32 1.5, %v3791_v0  ;;  %v8737_v22 = vmul.f32 %v8672_v27, %v8618_v8  ;;  %vm4354_vm14 = vweird.f32 %v8654_v7 }
 0x362   : > { %v3622_v28 = vsub.f32 1.5, %v3621_v47  ;;  %v8676_v47 = vpop.eup %5480  ;;  %v4278_v26 = vadd.f32 %v5475_v52, %v4277_v12  ;;  %v4358_v12 = vand.u32 2147483647, %v8654_v7 }
 0x363   : > { %v4986_v56 = vmul.f32 -1.442695, %v8657_v34  ;;  %v3679_v14 = vmul.f32 %v8676_v47, %v8638_v25  ;;  %v3793_v45 = vmul.f32 %v8640_v29, %v3792_v39  ;;  %v10249_v39 = vld [vmem:[#allocation19_spill] sm:$0xff]  ;;  %vm3685_vm10 = vweird.f32 %v8676_v47 }
 0x364   : > { %v3623_v3 = vmul.f32 %v8609_v40, %v3622_v28  ;;  %v4282_v28 = vsel %vm4281_vm6, %v5475_v52, %v4278_v26  ;;  %v2483_v52 = vsel %vm8692_vm4, %v8452_v23, %v2479_v58  ;;  %vm3686_vm15 = vmor %vm3684_vm11, %vm3685_vm10  ;;  %vm4359_vm9 = vcmp.eq.f32.partialorder %v4358_v12, 8.507059e+37 }
 0x365   : > { %5484 = vpow2.f32 %v4986_v56  ;;  %v3680_v17 = vmul.f32 %v8676_v47, %v3679_v14  ;;  %v3797_v62 = vsel %vm3796_vm8, %v8640_v29, %v3793_v45  ;;  %v3497_v25 = vsub.f32 %v10192_v32, %v8593_v21 }
 0x366   : > { %v3627_v55 = vsel %vm3626_vm13, %v8609_v40, %v3623_v3  ;;  %5486 = vrcp.f32 %v8669_v57  ;;  %v5483_v50 = vpop.eup %5482  ;;  %v4287_v3 = vsel %vm8661_vm1, %v4286_v30, %v4282_v28  ;;  %v3892_v20 = vmul.f32 %v3797_v62, %v3508_v46 }
 0x367   : > { %v3875_v9 = vmul.f32 %v3627_v55, %v3491_v5  ;;  %v2486_v5 = vand.u32 2147483648, %v8327_v35  ;;  %v4586_v59 = vmul.f32 %v4287_v3, %v8550_v18  ;;  %v4350_v56 = vmul.f32 %v5483_v50, %v8654_v7  ;;  %v2472_v29 = vpop.f32.mrf.mxu3 }
 0x368   : > { %v4360_v55 = vand.u32 2147483648, %v8654_v7  ;;  %v3925_v6 = vmul.f32 %v8056_v15, %v3892_v20  ;;  %vm4355_vm12 = vweird.f32 %v5483_v50  ;;  %v8732_v28 = vadd.f32 1e-06, %v2469_v53 }
 0x369   : > { %v3908_v40 = vmul.f32 %v8056_v15, %v3875_v9  ;;  %v2487_v30 = vor.u32 1.1754944e-38, %v2486_v5  ;;  %v3681_v9 = vmul.f32 0.5, %v3680_v17  ;;  %v4618_v23 = vadd.f32 %v4586_v59, %v10249_v39  ;;  %v3191_v17 = vpop.xlane.xlu2 %3190  ;;  %vm4356_vm1 = vmor %vm4354_vm14, %vm4355_vm12 }
 0x36a   : > { %v4351_v58 = vsub.f32 1.0, %v4350_v56  ;;  %v8740_v37 = vadd.f32 1e-06, %v2472_v29  ;;  %v4361_v59 = vor.u32 1.1754944e-38, %v4360_v55  ;;  %v3176_v56 = vpop.xlane.xlu0 %3175  ;;  %v8753_v62 = vmul.f32 %v3191_v17, %v7996_v41  ;;  %v3369_v55 = vpop.xlane.xlu1 %3368  ;;  %v10250_v29 = vld [vmem:[#allocation24_spill] sm:$0xff] }
 0x36b   : > { %v8704_v35 = vadd.f32 %v8061_v38, %v3908_v40  ;;  %v5485_v26 = vpop.eup %5484  ;;  %v2488_v18 = vsel %vm8696_vm7, %v2487_v30, %v2483_v52  ;;  %v2170_v40 = vpop.f32.mrf.mxu2  ;;  %v3682_v44 = vsub.f32 1.5, %v3681_v9  ;;  %4650 = vst.msk [vmem:[%s8115_s12 + $0x60] sm:$0xff] %vm413_vm0, %v4618_v23  ;;  %v8744_v52 = vadd.f32 %v8061_v38, %v3925_v6 }
 0x36c   : > { %v8725_v14 = vpop.eup %5486  ;;  %v8727_v5 = vadd.f32 1.0, %v5485_v26  ;;  %v4352_v46 = vmul.f32 %v5483_v50, %v4351_v58  ;;  %v2587_v45 = vmul.f32 %v2488_v18, %v2170_v40  ;;  %v3439_v32 = vmul.f32 %v8753_v62, %v8753_v62 }
 0x36d   : > { %v4975_v0 = vmul.f32 -1.442695, %v8704_v35  ;;  %v3683_v53 = vmul.f32 %v8676_v47, %v3682_v44  ;;  %v4992_v30 = vmul.f32 -1.442695, %v8744_v52  ;;  %v8759_v20 = vmul.f32 %v8725_v14, %v8669_v57 }
 0x36e   : > { %v4353_v3 = vadd.f32 %v5483_v50, %v4352_v46  ;;  %2603 = vrot.lane.b32.xlu0 %v2587_v45, %s5664_s6  ;;  %v3471_v58 = vsub.f32 %v8631_v33, %v3439_v32  ;;  %v2492_v18 = vmul.f32 %v8545_v10, %v2491_v1  ;;  %v8784_v46 = vmul.f32 %v3369_v55, %v7996_v41 }
 0x36f   : > { %5488 = vpow2.f32 %v4975_v0  ;;  %v3687_v0 = vsel %vm3686_vm15, %v8676_v47, %v3683_v53  ;;  %v8768_v47 = vmul.f32 %v3176_v56, %v7996_v41  ;;  %v4373_v1 = vand.u32 2147483647, %v8727_v5 }
 0x370   : > { %5490 = vrcp.f32 %v8727_v5  ;;  %v4357_v7 = vsel %vm4356_vm1, %v5483_v50, %v4353_v3  ;;  %v3881_v12 = vmul.f32 %v3687_v0, %v3497_v25  ;;  %v8794_v17 = vadd.f32 1e-05, %v3471_v58 }
 0x371   : > { %v4362_v26 = vsel %vm4359_vm9, %v4361_v59, %v4357_v7  ;;  %5492 = vrcp.f32 %v8740_v37  ;;  %v8792_v45 = vmul.f32 %v8768_v47, %v8768_v47  ;;  %v4375_v53 = vand.u32 2147483648, %v8727_v5 }
 0x372   : > { %v4591_v21 = vmul.f32 %v4362_v26, %v8598_v24  ;;  %5494 = vpow2.f32 %v4992_v30  ;;  %v3914_v23 = vmul.f32 %v8056_v15, %v3881_v12  ;;  %v2493_v25 = vadd.f32 %v8545_v10, %v2492_v18  ;;  %v3209_v12 = vpop.xlane.xlu2 %3208 }
 0x373   : > { %5496 = vrcp.f32 %v8732_v28  ;;  %vm2495_vm13 = vweird.f32 %v8545_v10  ;;  %v2500_v26 = vand.u32 2147483648, %v8482_v36  ;;  %vm4369_vm6 = vweird.f32 %v8727_v5  ;;  %v2173_v33 = vpop.f32.mrf.mxu2 }
 0x374   : > { %v4623_v24 = vadd.f32 %v4591_v21, %v10250_v29  ;;  %v8781_v44 = vadd.f32 %v8061_v38, %v3914_v23  ;;  %vm8819_vm2 = vmor %vm2494_vm5, %vm2495_vm13  ;;  %vm4374_vm7 = vcmp.eq.f32.partialorder %v4373_v1, 8.507059e+37  ;;  %vm3744_vm15 = vweird.f32 %v8794_v17 }
 0x375   : > { %v5489_v9 = vpop.eup %5488  ;;  %v2497_v29 = vsel %vm8819_vm2, %v8545_v10, %v2493_v25  ;;  %vm2508_vm13 = vweird.f32 %v8618_v8  ;;  %vm2509_vm5 = vweird.f32 %v8672_v27 }
 0x376   : > { %v8765_v50 = vadd.f32 1.0, %v5489_v9  ;;  %v5491_v39 = vpop.eup %5490  ;;  %4655 = vst.msk [vmem:[%s8115_s12 + $0x88] sm:$0xff] %vm413_vm0, %v4623_v24  ;;  %v4981_v59 = vmul.f32 -1.442695, %v8781_v44  ;;  %v2498_v9 = vand.u32 2147483647, %v8482_v36  ;;  %vm8887_vm2 = vmor %vm2508_vm13, %vm2509_vm5 }
 0x377   : > { %v4365_v40 = vmul.f32 %v5491_v39, %v8727_v5  ;;  %v8796_v3 = vpop.eup %5492  ;;  %vm4370_vm3 = vweird.f32 %v5491_v39  ;;  %v4376_v36 = vor.u32 1.1754944e-38, %v4375_v53  ;;  %v3179_v5 = vpop.xlane.xlu1 %3178 }
 0x378   : > { %5498 = vrcp.f32 %v8765_v50  ;;  %v5495_v56 = vpop.eup %5494  ;;  %v8813_v21 = vmul.f32 %v8796_v3, %v8740_v37  ;;  %vm4371_vm4 = vmor %vm4369_vm6, %vm4370_vm3  ;;  %vm2499_vm8 = vcmp.eq.f32.partialorder %v2498_v9, 8.507059e+37  ;;  %v8833_v53 = vpop.xlane.xlu0 %3193  ;;  %v4210_v10 = vand.u32 2147483648, %v8765_v50 }
 0x379   : > { %v4366_v19 = vsub.f32 1.0, %v4365_v40  ;;  %5500 = vrsqrt.f32 %v8794_v17  ;;  %v8804_v30 = vpop.eup %5496  ;;  %v8806_v0 = vadd.f32 1.0, %v5495_v56  ;;  %v2501_v40 = vor.u32 1.1754944e-38, %v2500_v26 }
 0x37a   : > { %5502 = vpow2.f32 %v4981_v59  ;;  %vm4204_vm12 = vweird.f32 %v8765_v50 }
 0x37b   : > { %v4367_v7 = vmul.f32 %v5491_v39, %v4366_v19  ;;  %5504 = vrcp.f32 %v8806_v0  ;;  %v8830_v19 = vmul.f32 %v3209_v12, %v7996_v41  ;;  %v2502_v1 = vsel %vm2499_vm8, %v2501_v40, %v2497_v29 }
 0x37c   : > { %v2588_v12 = vmul.f32 %v2502_v1, %v2173_v33  ;;  %vm4459_vm6 = vweird.f32 %v8806_v0 }
 0x37d   : > { %v4368_v32 = vadd.f32 %v5491_v39, %v4367_v7  ;;  %v4208_v7 = vand.u32 2147483647, %v8765_v50 }
 0x37e   : > { %v5499_v55 = vpop.eup %5498  ;;  %2605 = vrot.lane.b32.xlu0 %v2588_v12, %s5664_s6 }
 0x37f   : > { %v4200_v18 = vmul.f32 %v5499_v55, %v8765_v50  ;;  %v4372_v24 = vsel %vm4371_vm4, %v5491_v39, %v4368_v32  ;;  %v8835_v23 = vpop.eup %5500  ;;  %v8840_v39 = vmul.f32 %v3179_v5, %v7996_v41  ;;  %vm4205_vm10 = vweird.f32 %v5499_v55  ;;  %v10253_v32 = vld [vmem:[#allocation25_spill] sm:$0xff] }
 0x380   : > { %v4377_v59 = vsel %vm4374_vm7, %v4376_v36, %v4372_v24  ;;  %v5503_v25 = vpop.eup %5502  ;;  %v3739_v9 = vmul.f32 %v8835_v23, %v8794_v17  ;;  %vm4209_vm11 = vcmp.eq.f32.partialorder %v4208_v7, 8.507059e+37  ;;  %vm4206_vm14 = vmor %vm4204_vm12, %vm4205_vm10  ;;  %vm3745_vm1 = vweird.f32 %v8835_v23 }
 0x381   : > { %v4201_v56 = vsub.f32 1.0, %v4200_v18  ;;  %v4592_v6 = vmul.f32 %v4377_v59, %v8657_v34  ;;  %v8845_v36 = vadd.f32 1.0, %v5503_v25  ;;  %v3503_v34 = vsub.f32 %v10196_v42, %v8753_v62  ;;  %v5505_v5 = vpop.eup %5504  ;;  %vm8877_vm3 = vmor %vm3744_vm15, %vm3745_vm1 }
 0x382   : > { %v3445_v18 = vmul.f32 %v8830_v19, %v8830_v19  ;;  %v3740_v24 = vmul.f32 %v8835_v23, %v3739_v9  ;;  %v4455_v33 = vmul.f32 %v5505_v5, %v8806_v0  ;;  %v4463_v62 = vand.u32 2147483647, %v8806_v0 }
 0x383   : > { %v4202_v26 = vmul.f32 %v5499_v55, %v4201_v56  ;;  %v4624_v58 = vadd.f32 %v4592_v6, %v10253_v32  ;;  %v4211_v6 = vor.u32 1.1754944e-38, %v4210_v10  ;;  %5506 = vrcp.f32 %v8845_v36 }
 0x384   : > { %v3741_v50 = vmul.f32 0.5, %v3740_v24  ;;  %v4456_v59 = vsub.f32 1.0, %v4455_v33  ;;  %v3477_v56 = vsub.f32 %v8784_v46, %v3445_v18  ;;  %v10254_v7 = vsub.f32 1.0, %v8737_v22  ;;  %v8883_v18 = vpop.xlane.xlu0 %3211  ;;  %v3336_v33 = vpop.xlane.xlu2 %3335 }
 0x385   : > { %v4203_v29 = vadd.f32 %v5499_v55, %v4202_v26  ;;  %4656 = vst.msk [vmem:[%s8115_s12 + $0x90] sm:$0xff] %vm413_vm0, %v4624_v58  ;;  %vm4460_vm9 = vweird.f32 %v5505_v5  ;;  %v4465_v25 = vand.u32 2147483648, %v8806_v0  ;;  %v2512_v58 = vand.u32 2147483647, %v8618_v8 }
 0x386   : > { %v2506_v10 = vmul.f32 %v8672_v27, %v10254_v7  ;;  %v4457_v26 = vmul.f32 %v5505_v5, %v4456_v59  ;;  %v8867_v9 = vadd.f32 1e-05, %v3477_v56  ;;  %v2514_v17 = vand.u32 2147483648, %v8618_v8  ;;  %vm4461_vm4 = vmor %vm4459_vm6, %vm4460_vm9 }
 0x387   : > { %v4207_v42 = vsel %vm4206_vm14, %v5499_v55, %v4203_v29  ;;  %v3742_v55 = vsub.f32 1.5, %v3741_v50  ;;  %vm4464_vm7 = vcmp.eq.f32.partialorder %v4463_v62, 8.507059e+37  ;;  %vm2513_vm8 = vcmp.eq.f32.partialorder %v2512_v58, 8.507059e+37  ;;  %v10259_v62 = vld [vmem:[#allocation31_spill] sm:$0xff] }
 0x388   : > { %v4212_v40 = vsel %vm4209_vm11, %v4211_v6, %v4207_v42  ;;  %v2507_v12 = vadd.f32 %v8672_v27, %v2506_v10  ;;  %v4458_v24 = vadd.f32 %v5505_v5, %v4457_v26  ;;  %5508 = vrsqrt.f32 %v8867_v9 }
 0x389   : > { %v4581_v1 = vmul.f32 %v4212_v40, %v8704_v35  ;;  %v3743_v22 = vmul.f32 %v8835_v23, %v3742_v55  ;;  %v5507_v29 = vpop.eup %5506  ;;  %v4466_v42 = vor.u32 1.1754944e-38, %v4465_v25  ;;  %v2515_v8 = vor.u32 1.1754944e-38, %v2514_v17  ;;  %v3197_v17 = vpop.xlane.xlu1 %3196 }
 0x38a   : > { %v4290_v50 = vmul.f32 %v5507_v29, %v8845_v36  ;;  %v2511_v40 = vsel %vm8887_vm2, %v8672_v27, %v2507_v12  ;;  %v4462_v59 = vsel %vm4461_vm4, %v5505_v5, %v4458_v24  ;;  %v4300_v55 = vand.u32 2147483648, %v8845_v36 }
 0x38b   : > { %v3747_v0 = vsel %vm8877_vm3, %v8835_v23, %v3743_v22  ;;  %v4467_v7 = vsel %vm4464_vm7, %v4466_v42, %v4462_v59  ;;  %v2516_v23 = vsel %vm2513_vm8, %v2515_v8, %v2511_v40  ;;  %vm4295_vm10 = vweird.f32 %v5507_v29 }
 0x38c   : > { %v5650_v32 = vld [vmem:[%s5909_s19 + $0x38] sm:$0xff]  ;;  %v3887_v56 = vmul.f32 %v3747_v0, %v3503_v34  ;;  %v4291_v10 = vsub.f32 1.0, %v4290_v50  ;;  %v4598_v25 = vmul.f32 %v4467_v7, %v8744_v52  ;;  %v4298_v27 = vand.u32 2147483647, %v8845_v36  ;;  %v3339_v0 = vpop.xlane.xlu0 %3338 }
 0x38d   : > { %v4613_v46 = vadd.f32 %v5650_v32, %v4581_v1  ;;  %v3402_v1 = vmul.f32 %v3336_v33, %v7996_v41  ;;  %v2589_v34 = vmul.f32 %v2516_v23, %v8215_v63  ;;  %v3435_v52 = vmul.f32 %v8840_v39, %v8840_v39 }
 0x38e   : > { %v3920_v26 = vmul.f32 %v8056_v15, %v3887_v56  ;;  %v4292_v32 = vmul.f32 %v5507_v29, %v4291_v10  ;;  %v5509_v5 = vpop.eup %5508  ;;  %v4630_v12 = vadd.f32 %v4598_v25, %v10259_v62  ;;  %vm4294_vm12 = vweird.f32 %v8845_v36  ;;  %v10263_v25 = vld [vmem:[#allocation20_spill] sm:$0xff] }
 0x38f   : > { %4645 = vst.msk [vmem:[%s8115_s12 + $0x38] sm:$0xff] %vm413_vm0, %v4613_v46  ;;  %v3466_v22 = vsub.f32 %v3402_v1, %v8792_v45  ;;  %v3499_v58 = vsub.f32 %v10203_v49, %v8840_v39  ;;  %v3799_v24 = vmul.f32 %v5509_v5, %v8867_v9  ;;  %2607 = vrot.lane.b32.xlu0 %v2589_v34, %s5664_s6  ;;  %vm4296_vm11 = vmor %vm4294_vm12, %vm4295_vm10  ;;  %v4301_v63 = vor.u32 1.1754944e-38, %v4300_v55 }
 0x390   : > { %v8910_v46 = vadd.f32 %v8061_v38, %v3920_v26  ;;  %v4293_v35 = vadd.f32 %v5507_v29, %v4292_v32  ;;  %4662 = vst.msk [vmem:[%s8115_s12 + $0xc0] sm:$0xff] %vm413_vm0, %v4630_v12  ;;  %v10260_v45 = vsub.f32 1.0, %v8759_v20  ;;  %vm4299_vm14 = vcmp.eq.f32.partialorder %v4298_v27, 8.507059e+37 }
 0x391   : > { %v8923_v33 = vadd.f32 1e-05, %v3466_v22  ;;  %v3800_v50 = vmul.f32 %v5509_v5, %v3799_v24  ;;  %vm2523_vm15 = vweird.f32 %v8725_v14  ;;  %vm2522_vm1 = vweird.f32 %v8669_v57 }
 0x392   : > { %v4987_v6 = vmul.f32 -1.442695, %v8910_v46  ;;  %v2520_v36 = vmul.f32 %v8725_v14, %v10260_v45  ;;  %v4297_v42 = vsel %vm4296_vm11, %v5507_v29, %v4293_v35  ;;  %v2526_v20 = vand.u32 2147483647, %v8669_v57  ;;  %vm8938_vm9 = vmor %vm2522_vm1, %vm2523_vm15 }
 0x393   : > { %v4302_v40 = vsel %vm4299_vm14, %v4301_v63, %v4297_v42  ;;  %v3801_v8 = vmul.f32 0.5, %v3800_v50  ;;  %v8936_v29 = vmul.f32 %v8833_v53, %v7996_v41  ;;  %v2528_v10 = vand.u32 2147483648, %v8669_v57 }
 0x394   : > { %5510 = vpow2.f32 %v4987_v6  ;;  %v2521_v59 = vadd.f32 %v8725_v14, %v2520_v36  ;;  %v4587_v56 = vmul.f32 %v4302_v40, %v8781_v44  ;;  %v3403_v1 = vmul.f32 %v3339_v0, %v7996_v41  ;;  %v3354_v36 = vpop.xlane.xlu2 %3353 }
 0x395   : > { %5512 = vrsqrt.f32 %v8923_v33  ;;  %v2560_v44 = vmul.f32 %v8804_v30, %v8732_v28  ;;  %v3802_v26 = vsub.f32 1.5, %v3801_v8  ;;  %vm3805_vm13 = vweird.f32 %v5509_v5  ;;  %v2377_v8 = vpop.f32.mrf.mxu2 }
 0x396   : > { %v4619_v55 = vadd.f32 %v4587_v56, %v10263_v25  ;;  %v2525_v53 = vsel %vm8938_vm9, %v8725_v14, %v2521_v59  ;;  %v8951_v23 = vmul.f32 %v3197_v17, %v7996_v41  ;;  %v2529_v32 = vor.u32 1.1754944e-38, %v2528_v10  ;;  %v3215_v17 = vpop.xlane.xlu1 %3214 }
 0x397   : > { %v3467_v27 = vsub.f32 %v3403_v1, %v3435_v52  ;;  %v2561_v34 = vsub.f32 1.0, %v2560_v44  ;;  %v3509_v57 = vsub.f32 %v10198_v61, %v8830_v19  ;;  %v3803_v62 = vmul.f32 %v5509_v5, %v3802_v26  ;;  %v3357_v44 = vpop.xlane.xlu0 %3356 }
 0x398   : > { %4651 = vst.msk [vmem:[%s8115_s12 + $0x68] sm:$0xff] %vm413_vm0, %v4619_v55  ;;  %vm3804_vm3 = vweird.f32 %v8867_v9  ;;  %vm2527_vm5 = vcmp.eq.f32.partialorder %v2526_v20, 8.507059e+37  ;;  %vm2565_vm2 = vweird.f32 %v8804_v30  ;;  %v2570_v61 = vand.u32 2147483648, %v8732_v28 }
 0x399   : > { %vm3806_vm6 = vmor %vm3804_vm3, %vm3805_vm13  ;;  %v2530_v22 = vsel %vm2527_vm5, %v2529_v32, %v2525_v53  ;;  %v8958_v35 = vadd.f32 1e-05, %v3467_v27  ;;  %v2562_v14 = vmul.f32 %v8804_v30, %v2561_v34  ;;  %v2568_v45 = vand.u32 2147483647, %v8732_v28 }
 0x39a   : > { %v5511_v12 = vpop.eup %5510  ;;  %v3807_v63 = vsel %vm3806_vm6, %v5509_v5, %v3803_v62  ;;  %v2590_v6 = vmul.f32 %v2530_v22, %v8248_v4  ;;  %v3440_v42 = vmul.f32 %v8936_v29, %v8936_v29  ;;  %v3504_v5 = vsub.f32 %v10205_v51, %v8936_v29 }
 0x39b   : > { %v5513_v52 = vpop.eup %5512  ;;  %v8962_v24 = vadd.f32 1.0, %v5511_v12  ;;  %v3893_v19 = vmul.f32 %v3807_v63, %v3509_v57  ;;  %5514 = vrsqrt.f32 %v8958_v35  ;;  %v3441_v4 = vmul.f32 %v8951_v23, %v8951_v23 }
 0x39c   : > { %v3689_v9 = vmul.f32 %v5513_v52, %v8923_v33  ;;  %2609 = vrot.lane.b32.xlu0 %v2590_v6, %s5664_s6  ;;  %v2563_v40 = vadd.f32 %v8804_v30, %v2562_v14  ;;  %vm2564_vm4 = vweird.f32 %v8732_v28  ;;  %v8982_v59 = vmul.f32 %v8883_v18, %v7996_v41 }
 0x39d   : > { %5516 = vrcp.f32 %v8962_v24  ;;  %v3926_v50 = vmul.f32 %v8056_v15, %v3893_v19  ;;  %v8985_v56 = vmul.f32 %v3215_v17, %v7996_v41  ;;  %vm2566_vm7 = vmor %vm2564_vm4, %vm2565_vm2  ;;  %v2571_v20 = vor.u32 1.1754944e-38, %v2570_v61 }
 0x39e   : > { %v3690_v0 = vmul.f32 %v5513_v52, %v3689_v9  ;;  %v3408_v7 = vmul.f32 %v3354_v36, %v7996_v41  ;;  %v2567_v28 = vsel %vm2566_vm7, %v8804_v30, %v2563_v40  ;;  %vm2569_vm8 = vcmp.eq.f32.partialorder %v2568_v45, 8.507059e+37 }
 0x39f   : > { %v8991_v10 = vadd.f32 %v8061_v38, %v3926_v50  ;;  %v2572_v18 = vsel %vm2569_vm8, %v2571_v20, %v2567_v28  ;;  %v3409_v55 = vmul.f32 %v3357_v44, %v7996_v41  ;;  %v2575_v26 = vsub.f32 1.0, %v8813_v21 }
 0x3a0   : > { %v3691_v1 = vmul.f32 0.5, %v3690_v0  ;;  %v3472_v25 = vsub.f32 %v3408_v7, %v3440_v42  ;;  %vm3695_vm10 = vweird.f32 %v5513_v52  ;;  %v2593_v34 = vmul.f32 %v2572_v18, %v2377_v8  ;;  %v3372_v7 = vpop.xlane.xlu2 %3371 }
 0x3a1   : > { %v8996_v53 = vpop.eup %5514  ;;  %v4993_v32 = vmul.f32 -1.442695, %v8991_v10  ;;  %v9001_v62 = vmul.f32 %v8982_v59, %v8982_v59  ;;  %v3473_v22 = vsub.f32 %v3409_v55, %v3441_v4  ;;  %vm3694_vm12 = vweird.f32 %v8923_v33 }
 0x3a2   : > { %v3692_v27 = vsub.f32 1.5, %v3691_v1  ;;  %v3699_v30 = vmul.f32 %v8996_v53, %v8958_v35  ;;  %v9005_v12 = vadd.f32 1e-05, %v3472_v25  ;;  %vm3696_vm11 = vmor %vm3694_vm12, %vm3695_vm10  ;;  %v2576_v61 = vmul.f32 %v8796_v3, %v2575_v26  ;;  %v2380_v26 = vpop.f32.mrf.mxu2 }
 0x3a3   : > { %v5517_v57 = vpop.eup %5516  ;;  %5518 = vpow2.f32 %v4993_v32  ;;  %v9012_v6 = vadd.f32 1e-05, %v3473_v22  ;;  %v4390_v9 = vand.u32 2147483648, %v8962_v24  ;;  %v9018_v45 = vmul.f32 %v8985_v56, %v8985_v56 }
 0x3a4   : > { %v4380_v21 = vmul.f32 %v5517_v57, %v8962_v24  ;;  %v3693_v14 = vmul.f32 %v5513_v52, %v3692_v27  ;;  %v3700_v63 = vmul.f32 %v8996_v53, %v3699_v30  ;;  %5520 = vrsqrt.f32 %v9005_v12  ;;  %2615 = vrot.lane.b32.xlu0 %v2593_v34, %s5664_s6 }
 0x3a5   : > { %v10264_v33 = vsub.f32 %v10199_v16, %v8768_v47  ;;  %5522 = vrsqrt.f32 %v9012_v6  ;;  %vm2578_vm14 = vweird.f32 %v8740_v37  ;;  %vm4385_vm15 = vweird.f32 %v5517_v57 }
 0x3a6   : > { %v4381_v19 = vsub.f32 1.0, %v4380_v21  ;;  %v3697_v17 = vsel %vm3696_vm11, %v5513_v52, %v3693_v14  ;;  %v3701_v42 = vmul.f32 0.5, %v3700_v63  ;;  %v4388_v50 = vand.u32 2147483647, %v8962_v24 }
 0x3a7   : > { %v3882_v36 = vmul.f32 %v3697_v17, %v10264_v33  ;;  %vm2579_vm1 = vweird.f32 %v8796_v3  ;;  %v2577_v40 = vadd.f32 %v8796_v3, %v2576_v61  ;;  %v2584_v8 = vand.u32 2147483648, %v8740_v37 }
 0x3a8   : > { %v4382_v4 = vmul.f32 %v5517_v57, %v4381_v19  ;;  %v3702_v0 = vsub.f32 1.5, %v3701_v42  ;;  %vm4384_vm9 = vweird.f32 %v8962_v24  ;;  %v4391_v20 = vor.u32 1.1754944e-38, %v4390_v9  ;;  %vm9048_vm2 = vmor %vm2578_vm14, %vm2579_vm1  ;;  %v10267_v19 = vld [vmem:[#allocation26_spill] sm:$0xff] }
 0x3a9   : > { %v3915_v52 = vmul.f32 %v8056_v15, %v3882_v36  ;;  %v5519_v16 = vpop.eup %5518  ;;  %vm3705_vm13 = vweird.f32 %v8996_v53  ;;  %vm4386_vm3 = vmor %vm4384_vm9, %vm4385_vm15  ;;  %v2582_v25 = vand.u32 2147483647, %v8740_v37  ;;  %vm4389_vm5 = vcmp.eq.f32.partialorder %v4388_v50, 8.507059e+37 }
 0x3aa   : > { %v4383_v47 = vadd.f32 %v5517_v57, %v4382_v4  ;;  %v9032_v1 = vpop.eup %5520  ;;  %v9034_v28 = vadd.f32 1.0, %v5519_v16  ;;  %v3703_v18 = vmul.f32 %v8996_v53, %v3702_v0  ;;  %vm3704_vm6 = vweird.f32 %v8958_v35 }
 0x3ab   : > { %v9037_v44 = vadd.f32 %v8061_v38, %v3915_v52  ;;  %v3749_v24 = vmul.f32 %v9032_v1, %v9005_v12  ;;  %v9052_v27 = vpop.eup %5522  ;;  %vm3706_vm4 = vmor %vm3704_vm6, %vm3705_vm13  ;;  %v2581_v35 = vsel %vm9048_vm2, %v8796_v3, %v2577_v40  ;;  %v3414_v21 = vmul.f32 %v3372_v7, %v7996_v41  ;;  %v3375_v3 = vpop.xlane.xlu0 %3374 }
 0x3ac   : > { %v4387_v55 = vsel %vm4386_vm3, %v5517_v57, %v4383_v47  ;;  %5524 = vrcp.f32 %v9034_v28  ;;  %v2585_v57 = vor.u32 1.1754944e-38, %v2584_v8  ;;  %v3707_v22 = vsel %vm3706_vm4, %v8996_v53, %v3703_v18  ;;  %v3360_v52 = vpop.xlane.xlu1 %3359  ;;  %v3200_v40 = vpop.xlane.xlu2 %3199 }
 0x3ad   : > { %v4392_v34 = vsel %vm4389_vm5, %v4391_v20, %v4387_v55  ;;  %v4982_v37 = vmul.f32 -1.442695, %v9037_v44  ;;  %v3883_v14 = vmul.f32 %v3707_v22, %v3499_v58  ;;  %v3750_v63 = vmul.f32 %v9032_v1, %v3749_v24 }
 0x3ae   : > { %v4593_v30 = vmul.f32 %v4392_v34, %v8910_v46  ;;  %v3759_v61 = vmul.f32 %v9052_v27, %v9012_v6  ;;  %vm2583_vm7 = vcmp.eq.f32.partialorder %v2582_v25, 8.507059e+37  ;;  %vm3754_vm8 = vweird.f32 %v9005_v12 }
 0x3af   : > { %5526 = vpow2.f32 %v4982_v37  ;;  %v2586_v9 = vsel %vm2583_vm7, %v2585_v57, %v2581_v35  ;;  %v3916_v53 = vmul.f32 %v8056_v15, %v3883_v14  ;;  %v3751_v17 = vmul.f32 0.5, %v3750_v63 }
 0x3b0   : > { %v4625_v46 = vadd.f32 %v4593_v30, %v10267_v19  ;;  %v3760_v33 = vmul.f32 %v9052_v27, %v3759_v61  ;;  %v2594_v49 = vmul.f32 %v2586_v9, %v2380_v26  ;;  %vm3755_vm10 = vweird.f32 %v9032_v1  ;;  %v2446_v26 = vpop.f32.mrf.mxu2 }
 0x3b1   : > { %vm3764_vm12 = vweird.f32 %v9012_v6  ;;  %v3478_v39 = vsub.f32 %v3414_v21, %v9001_v62  ;;  %v3415_v58 = vmul.f32 %v3375_v3, %v7996_v41  ;;  %v4478_v42 = vand.u32 2147483647, %v9034_v28  ;;  %vm3756_vm14 = vmor %vm3754_vm8, %vm3755_vm10 }
 0x3b2   : > { %4657 = vst.msk [vmem:[%s8115_s12 + $0x98] sm:$0xff] %vm413_vm0, %v4625_v46  ;;  %v5525_v36 = vpop.eup %5524  ;;  %v9082_v4 = vadd.f32 %v8061_v38, %v3916_v53  ;;  %v3752_v50 = vsub.f32 1.5, %v3751_v17  ;;  %v3761_v0 = vmul.f32 0.5, %v3760_v33  ;;  %2617 = vrot.lane.b32.xlu0 %v2594_v49, %s5664_s6  ;;  %v4480_v16 = vand.u32 2147483648, %v9034_v28 }
 0x3b3   : > { %v4470_v8 = vmul.f32 %v5525_v36, %v9034_v28  ;;  %v9087_v47 = vadd.f32 1e-05, %v3478_v39  ;;  %v3479_v62 = vsub.f32 %v3415_v58, %v9018_v45  ;;  %vm3765_vm11 = vweird.f32 %v9052_v27 }
 0x3b4   : > { %v4983_v20 = vmul.f32 -1.442695, %v9082_v4  ;;  %v3753_v7 = vmul.f32 %v9032_v1, %v3752_v50  ;;  %v3762_v18 = vsub.f32 1.5, %v3761_v0  ;;  %v9101_v45 = vmul.f32 %v3200_v40, %v7996_v41  ;;  %vm3766_vm1 = vmor %vm3764_vm12, %vm3765_vm11  ;;  %v3378_v19 = vpop.xlane.xlu1 %3377  ;;  %v10268_v50 = vld [vmem:[#allocation32_spill] sm:$0xff] }
 0x3b5   : > { %v5527_v25 = vpop.eup %5526  ;;  %v4471_v55 = vsub.f32 1.0, %v4470_v8  ;;  %5528 = vrsqrt.f32 %v9087_v47  ;;  %v9098_v24 = vadd.f32 1e-05, %v3479_v62  ;;  %vm4475_vm15 = vweird.f32 %v5525_v36 }
 0x3b6   : > { %v9103_v32 = vadd.f32 1.0, %v5527_v25  ;;  %5530 = vpow2.f32 %v4983_v20  ;;  %v3757_v34 = vsel %vm3756_vm14, %v9032_v1, %v3753_v7  ;;  %v3763_v35 = vmul.f32 %v9052_v27, %v3762_v18 }
 0x3b7   : > { %v4472_v57 = vmul.f32 %v5525_v36, %v4471_v55  ;;  %v3888_v12 = vmul.f32 %v3757_v34, %v3504_v5  ;;  %5532 = vrsqrt.f32 %v9098_v24  ;;  %v3505_v30 = vsub.f32 %v10206_v31, %v8951_v23 }
 0x3b8   : > { %5534 = vrcp.f32 %v9103_v32  ;;  %v9118_v1 = vadd.f32 1e-06, %v2446_v26  ;;  %vm4474_vm9 = vweird.f32 %v9034_v28  ;;  %v3767_v29 = vsel %vm3766_vm1, %v9052_v27, %v3763_v35 }
 0x3b9   : > { %v4473_v37 = vadd.f32 %v5525_v36, %v4472_v57  ;;  %v3921_v51 = vmul.f32 %v8056_v15, %v3888_v12  ;;  %vm4476_vm13 = vmor %vm4474_vm9, %vm4475_vm15  ;;  %v4481_v5 = vor.u32 1.1754944e-38, %v4480_v16  ;;  %v3510_v31 = vsub.f32 %v10208_v54, %v8982_v59  ;;  %v10273_v59 = vld [vmem:[#allocation21_spill] sm:$0xff] }
 0x3ba   : > { %v3889_v23 = vmul.f32 %v3767_v29, %v3505_v30  ;;  %v3442_v22 = vmul.f32 %v9101_v45, %v9101_v45  ;;  %vm4479_vm3 = vcmp.eq.f32.partialorder %v4478_v42, 8.507059e+37  ;;  %v3410_v28 = vmul.f32 %v3360_v52, %v7996_v41 }
 0x3bb   : > { %v9127_v6 = vpop.eup %5528  ;;  %v4477_v21 = vsel %vm4476_vm13, %v5525_v36, %v4473_v37  ;;  %v9130_v14 = vadd.f32 %v8061_v38, %v3921_v51  ;;  %5536 = vrcp.f32 %v9118_v1  ;;  %v3511_v53 = vsub.f32 %v10209_v48, %v8985_v56 }
 0x3bc   : > { %v5531_v63 = vpop.eup %5530  ;;  %v4482_v27 = vsel %vm4479_vm3, %v4481_v5, %v4477_v21  ;;  %v3922_v61 = vmul.f32 %v8056_v15, %v3889_v23  ;;  %v3809_v3 = vmul.f32 %v9127_v6, %v9087_v47  ;;  %v3474_v42 = vsub.f32 %v3410_v28, %v3442_v22 }
 0x3bd   : > { %v9137_v46 = vpop.eup %5532  ;;  %v4599_v9 = vmul.f32 %v4482_v27, %v8991_v10  ;;  %v9142_v17 = vadd.f32 1.0, %v5531_v63  ;;  %v4988_v33 = vmul.f32 -1.442695, %v9130_v14  ;;  %v9155_v0 = vmul.f32 %v3378_v19, %v7996_v41 }
 0x3be   : > { %v5535_v49 = vpop.eup %5534  ;;  %v9146_v39 = vadd.f32 %v8061_v38, %v3922_v61  ;;  %v3810_v58 = vmul.f32 %v9127_v6, %v3809_v3  ;;  %v3819_v36 = vmul.f32 %v9137_v46, %v9098_v24  ;;  %v4313_v40 = vand.u32 2147483647, %v9103_v32  ;;  %v3218_v61 = vpop.xlane.xlu2 %3217 }
 0x3bf   : > { %v4631_v10 = vadd.f32 %v4599_v9, %v10268_v50  ;;  %v4305_v52 = vmul.f32 %v5535_v49, %v9103_v32  ;;  %5538 = vrcp.f32 %v9142_v17  ;;  %v4315_v8 = vand.u32 2147483648, %v9103_v32 }
 0x3c0   : > { %5540 = vpow2.f32 %v4988_v33  ;;  %vm3814_vm5 = vweird.f32 %v9087_v47  ;;  %v4989_v62 = vmul.f32 -1.442695, %v9146_v39  ;;  %v3811_v20 = vmul.f32 0.5, %v3810_v58 }
 0x3c1   : > { %4663 = vst.msk [vmem:[%s8115_s12 + $0xc8] sm:$0xff] %vm413_vm0, %v4631_v10  ;;  %v4306_v16 = vsub.f32 1.0, %v4305_v52  ;;  %v3820_v7 = vmul.f32 %v9137_v46, %v3819_v36  ;;  %v9164_v18 = vpop.eup %5536  ;;  %vm4310_vm6 = vweird.f32 %v5535_v49  ;;  %vm3815_vm2 = vweird.f32 %v9127_v6 }
 0x3c2   : > { %vm3824_vm4 = vweird.f32 %v9098_v24  ;;  %v9168_v25 = vadd.f32 1e-05, %v3474_v42  ;;  %5542 = vpow2.f32 %v4989_v62  ;;  %v3812_v26 = vsub.f32 1.5, %v3811_v20  ;;  %vm9179_vm10 = vmor %vm3814_vm5, %vm3815_vm2  ;;  %v2449_v62 = vpop.f32.mrf.mxu2 }
 0x3c3   : > { %v4307_v55 = vmul.f32 %v5535_v49, %v4306_v16  ;;  %v3821_v34 = vmul.f32 0.5, %v3820_v7  ;;  %vm4309_vm7 = vweird.f32 %v9103_v32  ;;  %vm9171_vm8 = vcmp.eq.f32.partialorder %v4313_v40, 8.507059e+37 }
 0x3c4   : > { %v4316_v57 = vor.u32 1.1754944e-38, %v4315_v8  ;;  %5544 = vrsqrt.f32 %v9168_v25  ;;  %v3813_v37 = vmul.f32 %v9127_v6, %v3812_v26  ;;  %v9185_v32 = vmul.f32 %v9164_v18, %v9118_v1  ;;  %vm4311_vm12 = vmor %vm4309_vm7, %vm4310_vm6 }
 0x3c5   : > { %v5539_v12 = vpop.eup %5538  ;;  %v4308_v30 = vadd.f32 %v5535_v49, %v4307_v55  ;;  %v3822_v29 = vsub.f32 1.5, %v3821_v34  ;;  %v4328_v22 = vand.u32 2147483647, %v9142_v17  ;;  %vm3825_vm11 = vweird.f32 %v9137_v46 }
 0x3c6   : > { %v5541_v5 = vpop.eup %5540  ;;  %v4320_v23 = vmul.f32 %v5539_v12, %v9142_v17  ;;  %v3506_v47 = vsub.f32 %v10210_v11, %v9101_v45  ;;  %v3817_v63 = vsel %vm9179_vm10, %v9127_v6, %v3813_v37  ;;  %v4330_v9 = vand.u32 2147483648, %v9142_v17  ;;  %vm3826_vm1 = vmor %vm3824_vm4, %vm3825_vm11 }
 0x3c7   : > { %v4312_v21 = vsel %vm4311_vm12, %v5535_v49, %v4308_v30  ;;  %v9193_v28 = vadd.f32 1.0, %v5541_v5  ;;  %v3823_v27 = vmul.f32 %v9137_v46, %v3822_v29  ;;  %v3894_v33 = vmul.f32 %v3817_v63, %v3510_v31  ;;  %v3203_v49 = vpop.xlane.xlu0 %3202  ;;  %v3363_v5 = vpop.xlane.xlu2 %3362 }
 0x3c8   : > { %v4317_v3 = vsel %vm9171_vm8, %v4316_v57, %v4312_v21  ;;  %v4321_v19 = vsub.f32 1.0, %v4320_v23  ;;  %v5543_v58 = vpop.eup %5542  ;;  %vm4324_vm14 = vweird.f32 %v9142_v17  ;;  %v2533_v6 = vsub.f32 1.0, %v9185_v32  ;;  %v10278_v32 = vld [vmem:[#allocation28_spill] sm:$0xff] }
 0x3c9   : > { %v4588_v36 = vmul.f32 %v4317_v3, %v9037_v44  ;;  %5546 = vrcp.f32 %v9193_v28  ;;  %vm4325_vm15 = vweird.f32 %v5539_v12  ;;  %v9211_v10 = vadd.f32 1.0, %v5543_v58 }
 0x3ca   : > { %v9209_v42 = vpop.eup %5544  ;;  %v4322_v50 = vmul.f32 %v5539_v12, %v4321_v19  ;;  %v3927_v54 = vmul.f32 %v8056_v15, %v3894_v33  ;;  %v3827_v31 = vsel %vm3826_vm1, %v9137_v46, %v3823_v27  ;;  %v9223_v40 = vmul.f32 %v3203_v49, %v7996_v41  ;;  %vm4326_vm13 = vmor %vm4324_vm14, %vm4325_vm15 }
 0x3cb   : > { %v4620_v44 = vadd.f32 %v4588_v36, %v10273_v59  ;;  %v3769_v52 = vmul.f32 %v9209_v42, %v9168_v25  ;;  %vm4329_vm9 = vcmp.eq.f32.partialorder %v4328_v22, 8.507059e+37  ;;  %v4331_v16 = vor.u32 1.1754944e-38, %v4330_v9  ;;  %v10276_v22 = vld [vmem:[#allocation22_spill] sm:$0xff] }
 0x3cc   : > { %v4323_v8 = vadd.f32 %v5539_v12, %v4322_v50  ;;  %5548 = vrcp.f32 %v9211_v10  ;;  %v4403_v24 = vand.u32 2147483647, %v9193_v28  ;;  %v9232_v46 = vadd.f32 %v8061_v38, %v3927_v54 }
 0x3cd   : > { %4652 = vst.msk [vmem:[%s8115_s12 + $0x70] sm:$0xff] %vm413_vm0, %v4620_v44  ;;  %v3895_v20 = vmul.f32 %v3827_v31, %v3511_v53  ;;  %v9238_v7 = vmul.f32 %v3218_v61, %v7996_v41  ;;  %v4405_v26 = vand.u32 2147483648, %v9193_v28  ;;  %v3770_v34 = vmul.f32 %v9209_v42, %v3769_v52 }
 0x3ce   : > { %v4327_v55 = vsel %vm4326_vm13, %v5539_v12, %v4323_v8  ;;  %vm3774_vm3 = vweird.f32 %v9168_v25  ;;  %v4994_v57 = vmul.f32 -1.442695, %v9232_v46  ;;  %v3443_v30 = vmul.f32 %v9223_v40, %v9223_v40 }
 0x3cf   : > { %v5547_v17 = vpop.eup %5546  ;;  %v4332_v35 = vsel %vm4329_vm9, %v4331_v16, %v4327_v55  ;;  %v9246_v37 = vadd.f32 1e-06, %v2449_v62  ;;  %vm4399_vm5 = vweird.f32 %v9193_v28  ;;  %v3928_v53 = vmul.f32 %v8056_v15, %v3895_v20 }
 0x3d0   : > { %v4589_v48 = vmul.f32 %v4332_v35, %v9082_v4  ;;  %v4395_v56 = vmul.f32 %v5547_v17, %v9193_v28  ;;  %vm9252_vm6 = vcmp.eq.f32.partialorder %v4403_v24, 8.507059e+37  ;;  %5550 = vpow2.f32 %v4994_v57 }
 0x3d1   : > { %v3771_v51 = vmul.f32 0.5, %v3770_v34  ;;  %v3448_v29 = vmul.f32 %v9238_v7, %v9238_v7  ;;  %v4406_v63 = vor.u32 1.1754944e-38, %v4405_v26  ;;  %v9260_v27 = vadd.f32 %v8061_v38, %v3928_v53 }
 0x3d2   : > { %v5549_v23 = vpop.eup %5548  ;;  %v4621_v4 = vadd.f32 %v4589_v48, %v10276_v22  ;;  %v4396_v21 = vsub.f32 1.0, %v4395_v56  ;;  %vm3775_vm2 = vweird.f32 %v9209_v42  ;;  %vm4400_vm4 = vweird.f32 %v5547_v17 }
 0x3d3   : > { %v4410_v61 = vmul.f32 %v5549_v23, %v9211_v10  ;;  %v3772_v3 = vsub.f32 1.5, %v3771_v51  ;;  %v3480_v19 = vsub.f32 %v9155_v0, %v3448_v29  ;;  %v4995_v33 = vmul.f32 -1.442695, %v9260_v27  ;;  %vm3776_vm7 = vmor %vm3774_vm3, %vm3775_vm2 }
 0x3d4   : > { %4653 = vst.msk [vmem:[%s8115_s12 + $0x78] sm:$0xff] %vm413_vm0, %v4621_v4  ;;  %v4397_v9 = vmul.f32 %v5547_v17, %v4396_v21  ;;  %v3411_v49 = vmul.f32 %v3363_v5, %v7996_v41  ;;  %5552 = vrcp.f32 %v9246_v37  ;;  %v4418_v59 = vand.u32 2147483647, %v9211_v10  ;;  %vm4401_vm8 = vmor %vm4399_vm5, %vm4400_vm4 }
 0x3d5   : > { %v4411_v58 = vsub.f32 1.0, %v4410_v61  ;;  %v3773_v36 = vmul.f32 %v9209_v42, %v3772_v3  ;;  %v9271_v50 = vadd.f32 1e-05, %v3480_v19  ;;  %v4420_v0 = vand.u32 2147483648, %v9211_v10 }
 0x3d6   : > { %v4398_v54 = vadd.f32 %v5547_v17, %v4397_v9  ;;  %5554 = vpow2.f32 %v4995_v33  ;;  %v5551_v44 = vpop.eup %5550  ;;  %vm4415_vm10 = vweird.f32 %v5549_v23  ;;  %v3475_v24 = vsub.f32 %v3411_v49, %v3443_v30 }
 0x3d7   : > { %v4412_v31 = vmul.f32 %v5549_v23, %v4411_v58  ;;  %v3777_v52 = vsel %vm3776_vm7, %v9209_v42, %v3773_v36  ;;  %5556 = vrsqrt.f32 %v9271_v50  ;;  %v9283_v16 = vadd.f32 1.0, %v5551_v44 }
 0x3d8   : > { %v4402_v8 = vsel %vm4401_vm8, %v5547_v17, %v4398_v54  ;;  %v3890_v62 = vmul.f32 %v3777_v52, %v3506_v47  ;;  %vm4414_vm12 = vweird.f32 %v9211_v10  ;;  %v4421_v42 = vor.u32 1.1754944e-38, %v4420_v0  ;;  %v10277_v47 = vld [vmem:[#allocation27_spill] sm:$0xff] }
 0x3d9   : > { %v4407_v25 = vsel %vm9252_vm6, %v4406_v63, %v4402_v8  ;;  %v4413_v20 = vadd.f32 %v5549_v23, %v4412_v31  ;;  %vm4416_vm11 = vmor %vm4414_vm12, %vm4415_vm10  ;;  %5558 = vrcp.f32 %v9283_v16  ;;  %vm4419_vm14 = vcmp.eq.f32.partialorder %v4418_v59, 8.507059e+37 }
 0x3da   : > { %v4594_v28 = vmul.f32 %v4407_v25, %v9130_v14  ;;  %v9293_v55 = vpop.eup %5552  ;;  %v3923_v11 = vmul.f32 %v8056_v15, %v3890_v62  ;;  %v9297_v35 = vadd.f32 1e-05, %v3475_v24  ;;  %v2534_v14 = vmul.f32 %v9164_v18, %v2533_v6 }
 0x3db   : > { %v4417_v26 = vsel %vm4416_vm11, %v5549_v23, %v4413_v20  ;;  %v3512_v56 = vsub.f32 %v10211_v13, %v9238_v7  ;;  %v4493_v12 = vand.u32 2147483647, %v9283_v16  ;;  %v4495_v29 = vand.u32 2147483648, %v9283_v16 }
 0x3dc   : > { %v5555_v45 = vpop.eup %5554  ;;  %v4626_v34 = vadd.f32 %v4594_v28, %v10277_v47  ;;  %v4422_v17 = vsel %vm4419_vm14, %v4421_v42, %v4417_v26  ;;  %v9306_v48 = vadd.f32 %v8061_v38, %v3923_v11  ;;  %5560 = vrsqrt.f32 %v9297_v35 }
 0x3dd   : > { %v5557_v10 = vpop.eup %5556  ;;  %v4595_v57 = vmul.f32 %v4422_v17, %v9146_v39  ;;  %v9303_v30 = vadd.f32 1.0, %v5555_v45  ;;  %v2546_v39 = vmul.f32 %v9293_v55, %v9246_v37  ;;  %v2535_v13 = vadd.f32 %v9164_v18, %v2534_v14 }
 0x3de   : > { %4658 = vst.msk [vmem:[%s8115_s12 + $0xa0] sm:$0xff] %vm413_vm0, %v4626_v34  ;;  %v3829_v53 = vmul.f32 %v5557_v10, %v9271_v50  ;;  %v4990_v5 = vmul.f32 -1.442695, %v9306_v48  ;;  %vm4489_vm15 = vweird.f32 %v9283_v16  ;;  %vm3834_vm1 = vweird.f32 %v9271_v50 }
 0x3df   : > { %v4627_v6 = vadd.f32 %v4595_v57, %v10278_v32  ;;  %5562 = vrcp.f32 %v9303_v30  ;;  %v5559_v51 = vpop.eup %5558  ;;  %vm2537_vm9 = vweird.f32 %v9164_v18  ;;  %vm2536_vm13 = vweird.f32 %v9118_v1  ;;  %v10283_v57 = vld [vmem:[#allocation33_spill] sm:$0xff] }
 0x3e0   : > { %v3830_v23 = vmul.f32 %v5557_v10, %v3829_v53  ;;  %v4485_v7 = vmul.f32 %v5559_v51, %v9283_v16  ;;  %5564 = vpow2.f32 %v4990_v5  ;;  %v2540_v4 = vand.u32 2147483647, %v9118_v1  ;;  %vm9334_vm5 = vmor %vm2536_vm13, %vm2537_vm9 }
 0x3e1   : > { %4659 = vst.msk [vmem:[%s8115_s12 + $0xa8] sm:$0xff] %vm413_vm0, %v4627_v6  ;;  %vm9330_vm3 = vcmp.eq.f32.partialorder %v4493_v12, 8.507059e+37  ;;  %v2547_v61 = vsub.f32 1.0, %v2546_v39  ;;  %v2542_v19 = vand.u32 2147483648, %v9118_v1  ;;  %v4496_v33 = vor.u32 1.1754944e-38, %v4495_v29 }
 0x3e2   : > { %v3831_v22 = vmul.f32 0.5, %v3830_v23  ;;  %v4486_v21 = vsub.f32 1.0, %v4485_v7  ;;  %v9339_v9 = vpop.eup %5560  ;;  %vm3835_vm6 = vweird.f32 %v5557_v10  ;;  %v2539_v58 = vsel %vm9334_vm5, %v9164_v18, %v2535_v13 }
 0x3e3   : > { %vm4490_vm2 = vweird.f32 %v5559_v51  ;;  %v3779_v59 = vmul.f32 %v9339_v9, %v9297_v35  ;;  %vm3784_vm4 = vweird.f32 %v9297_v35  ;;  %v2543_v0 = vor.u32 1.1754944e-38, %v2542_v19  ;;  %vm3836_vm8 = vmor %vm3834_vm1, %vm3835_vm6 }
 0x3e4   : > { %v3832_v49 = vsub.f32 1.5, %v3831_v22  ;;  %v4487_v54 = vmul.f32 %v5559_v51, %v4486_v21  ;;  %v4508_v44 = vand.u32 2147483647, %v9303_v30  ;;  %vm2541_vm7 = vcmp.eq.f32.partialorder %v2540_v4, 8.507059e+37  ;;  %vm4491_vm10 = vmor %vm4489_vm15, %vm4490_vm2 }
 0x3e5   : > { %v5563_v36 = vpop.eup %5562  ;;  %v3780_v18 = vmul.f32 %v9339_v9, %v3779_v59  ;;  %v2544_v8 = vsel %vm2541_vm7, %v2543_v0, %v2539_v58  ;;  %v2548_v62 = vmul.f32 %v9293_v55, %v2547_v61  ;;  %v4510_v20 = vand.u32 2147483648, %v9303_v30  ;;  %v10285_v0 = vld [vmem:[#allocation7_spill] sm:$0xff] }
 0x3e6   : > { %v4500_v1 = vmul.f32 %v5563_v36, %v9303_v30  ;;  %v3833_v31 = vmul.f32 %v5557_v10, %v3832_v49  ;;  %v4488_v52 = vadd.f32 %v5559_v51, %v4487_v54  ;;  %v5565_v24 = vpop.eup %5564  ;;  %v2591_v42 = vmul.f32 %v2544_v8, %v8494_v2 }
 0x3e7   : > { %v9357_v11 = vadd.f32 1.0, %v5565_v24  ;;  %v3781_v45 = vmul.f32 0.5, %v3780_v18  ;;  %vm4504_vm12 = vweird.f32 %v9303_v30  ;;  %vm4505_vm11 = vweird.f32 %v5563_v36 }
 0x3e8   : > { %v4501_v25 = vsub.f32 1.0, %v4500_v1  ;;  %v3837_v28 = vsel %vm3836_vm8, %v5557_v10, %v3833_v31  ;;  %v4492_v26 = vsel %vm4491_vm10, %v5559_v51, %v4488_v52  ;;  %2611 = vrot.lane.b32.xlu0 %v2591_v42, %s5664_s6  ;;  %vm3785_vm14 = vweird.f32 %v9339_v9  ;;  %vm4506_vm1 = vmor %vm4504_vm12, %vm4505_vm11  ;;  %v9382_v51 = vpop.xlane.xlu0 %3223  ;;  %v10286_v52 = vld [vmem:[#allocation29_spill] sm:$0xff] }
 0x3e9   : > { %v3896_v50 = vmul.f32 %v3837_v28, %v3512_v56  ;;  %v4497_v47 = vsel %vm9330_vm3, %v4496_v33, %v4492_v26  ;;  %5566 = vrcp.f32 %v9357_v11  ;;  %v2549_v2 = vadd.f32 %v9293_v55, %v2548_v62  ;;  %vm3786_vm3 = vmor %vm3784_vm4, %vm3785_vm14 }
 0x3ea   : > { %v4502_v34 = vmul.f32 %v5563_v36, %v4501_v25  ;;  %v4600_v16 = vmul.f32 %v4497_v47, %v9232_v46  ;;  %v3782_v10 = vsub.f32 1.5, %v3781_v45  ;;  %vm2551_vm15 = vweird.f32 %v9293_v55 }
 0x3eb   : > { %v3929_v14 = vmul.f32 %v8056_v15, %v3896_v50  ;;  %vm4509_vm9 = vcmp.eq.f32.partialorder %v4508_v44, 8.507059e+37  ;;  %v4511_v56 = vor.u32 1.1754944e-38, %v4510_v20  ;;  %vm2550_vm13 = vweird.f32 %v9246_v37 }
 0x3ec   : > { %v4503_v17 = vadd.f32 %v5563_v36, %v4502_v34  ;;  %v4632_v30 = vadd.f32 %v4600_v16, %v10283_v57  ;;  %v3783_v32 = vmul.f32 %v9339_v9, %v3782_v10  ;;  %v2554_v6 = vand.u32 2147483647, %v9246_v37  ;;  %vm2552_vm5 = vmor %vm2550_vm13, %vm2551_vm15 }
 0x3ed   : > { %v9372_v53 = vadd.f32 %v8061_v38, %v3929_v14  ;;  %v3507_v39 = vsub.f32 %v10214_v43, %v9223_v40  ;;  %v2556_v29 = vand.u32 2147483648, %v9246_v37  ;;  %v2553_v13 = vsel %vm2552_vm5, %v9293_v55, %v2549_v2  ;;  %v10284_v43 = vld [vmem:[#allocation34_spill] sm:$0xff] }
 0x3ee   : > { %v4507_v46 = vsel %vm4506_vm1, %v5563_v36, %v4503_v17  ;;  %4664 = vst.msk [vmem:[%s8115_s12 + $0xd0] sm:$0xff] %vm413_vm0, %v4632_v30  ;;  %v3787_v23 = vsel %vm3786_vm3, %v9339_v9, %v3783_v32  ;;  %vm2555_vm6 = vcmp.eq.f32.partialorder %v2554_v6, 8.507059e+37  ;;  %v4435_v3 = vand.u32 2147483648, %v9357_v11  ;;  %v10287_v30 = vld [vmem:[#allocation8_spill] sm:$0xff]  ;;  %v10288_v6 = vld [vmem:[#allocation35_spill] sm:$0xff] }
 0x3ef   : > { %v4512_v12 = vsel %vm4509_vm9, %v4511_v56, %v4507_v46  ;;  %v4996_v35 = vmul.f32 -1.442695, %v9372_v53  ;;  %v5567_v7 = vpop.eup %5566  ;;  %v3891_v22 = vmul.f32 %v3787_v23, %v3507_v39  ;;  %v2557_v4 = vor.u32 1.1754944e-38, %v2556_v29 }
 0x3f0   : > { %v4601_v5 = vmul.f32 %v4512_v12, %v9260_v27  ;;  %v4425_v21 = vmul.f32 %v5567_v7, %v9357_v11  ;;  %vm4430_vm2 = vweird.f32 %v5567_v7  ;;  %v4433_v9 = vand.u32 2147483647, %v9357_v11  ;;  %v2604_v49 = vpop.permute.xlu0 %2603 }
 0x3f1   : > { %5568 = vpow2.f32 %v4996_v35  ;;  %v3924_v63 = vmul.f32 %v8056_v15, %v3891_v22  ;;  %v2558_v37 = vsel %vm2555_vm6, %v2557_v4, %v2553_v13  ;;  %vm4429_vm4 = vweird.f32 %v9357_v11  ;;  %v10290_v22 = vld [vmem:[#allocation9_spill] sm:$0xff] }
 0x3f2   : > { %v4633_v40 = vadd.f32 %v4601_v5, %v10284_v43  ;;  %v4426_v27 = vsub.f32 1.0, %v4425_v21  ;;  %v2592_v61 = vmul.f32 %v2558_v37, %v8553_v60  ;;  %vm4431_vm7 = vmor %vm4429_vm4, %vm4430_vm2  ;;  %v4436_v60 = vor.u32 1.1754944e-38, %v4435_v3  ;;  %v10289_v5 = vld [vmem:[#allocation10_spill] sm:$0xff] }
 0x3f3   : > { %v9399_v55 = vadd.f32 %v8061_v38, %v3924_v63  ;;  %vm4434_vm8 = vcmp.eq.f32.partialorder %v4433_v9, 8.507059e+37  ;;  %v9406_v1 = vadd.f32 %v2604_v49, %v10285_v0  ;;  %v10291_v43 = vld [vmem:[#allocation30_spill] sm:$0xff]  ;;  %v10292_v63 = vld [vmem:[#allocation15_spill] sm:$0xff]  ;;  %v10293_v9 = vld [vmem:[#allocation17_spill] sm:$0xff] }
 0x3f4   : > { %4665 = vst.msk [vmem:[%s8115_s12 + $0xd8] sm:$0xff] %vm413_vm0, %v4633_v40  ;;  %v4427_v19 = vmul.f32 %v5567_v7, %v4426_v27  ;;  %2613 = vrot.lane.b32.xlu0 %v2592_v61, %s5664_s6  ;;  %v10295_v0 = vld [vmem:[#allocation12_spill] sm:$0xff] }
 0x3f5   : > { %v4991_v33 = vmul.f32 -1.442695, %v9399_v55  ;;  %v2706_v42 = vmul.f32 %v9406_v1, %v9406_v1 }
 0x3f6   : > { %v4428_v36 = vadd.f32 %v5567_v7, %v4427_v19 }
 0x3f7   : > { %v5569_v58 = vpop.eup %5568  ;;  %5570 = vpow2.f32 %v4991_v33 }
 0x3f8   : > { %v4090_v54 = vadd.f32 1.0, %v5569_v58  ;;  %v4432_v59 = vsel %vm4431_vm7, %v5567_v7, %v4428_v36  ;;  %v2606_v62 = vpop.permute.xlu0 %2605  ;;  %v10294_v36 = vld [vmem:[#allocation13_spill] sm:$0xff] }
 0x3f9   : > { %v4437_v44 = vsel %vm4434_vm8, %v4436_v60, %v4432_v59  ;;  %v9419_v56 = vadd.f32 %v2606_v62, %v10287_v30 }
 0x3fa   : > { %5572 = vrcp.f32 %v4090_v54  ;;  %v4596_v31 = vmul.f32 %v4437_v44, %v9306_v48  ;;  %v4525_v26 = vand.u32 2147483648, %v4090_v54  ;;  %v4523_v11 = vand.u32 2147483647, %v4090_v54 }
 0x3fb   : > { %vm4519_vm12 = vweird.f32 %v4090_v54  ;;  %v2707_v27 = vmul.f32 %v9419_v56, %v9419_v56 }
 0x3fc   : > { %v4628_v18 = vadd.f32 %v4596_v31, %v10286_v52  ;;  %2643 = vrot.lane.b32.xlu0 %v9406_v1, %s5666_s13  ;;  %v4526_v34 = vor.u32 1.1754944e-38, %v4525_v26  ;;  %vm4524_vm14 = vcmp.eq.f32.partialorder %v4523_v11, 8.507059e+37 }
 0x3fd   : > { %v5571_v8 = vpop.eup %5570 }
 0x3fe   : > { %4660 = vst.msk [vmem:[%s8115_s12 + $0xb0] sm:$0xff] %vm413_vm0, %v4628_v18  ;;  %v4085_v24 = vadd.f32 1.0, %v5571_v8 }
 0x400   : > { %v5573_v25 = vpop.eup %5572  ;;  %5574 = vrcp.f32 %v4085_v24  ;;  %v4450_v57 = vand.u32 2147483648, %v4085_v24  ;;  %v4448_v32 = vand.u32 2147483647, %v4085_v24  ;;  %vm4444_vm1 = vweird.f32 %v4085_v24 }
 0x401   : > { %v4515_v20 = vmul.f32 %v5573_v25, %v4090_v54  ;;  %vm4520_vm10 = vweird.f32 %v5573_v25  ;;  %v2608_v50 = vpop.permute.xlu0 %2607 }
 0x402   : > { %vm4521_vm11 = vmor %vm4519_vm12, %vm4520_vm10  ;;  %vm4449_vm13 = vcmp.eq.f32.partialorder %v4448_v32, 8.507059e+37  ;;  %v9433_v4 = vadd.f32 %v2608_v50, %v10290_v22 }
 0x403   : > { %v4516_v28 = vsub.f32 1.0, %v4515_v20 }
 0x404   : > { %2722 = vrot.lane.b32.xlu0 %v2706_v42, %s5666_s13  ;;  %v2708_v61 = vmul.f32 %v9433_v4, %v9433_v4 }
 0x405   : > { %v4517_v48 = vmul.f32 %v5573_v25, %v4516_v28  ;;  %v9483_v28 = vpop.xlane.xlu1 %3226 }
 0x406   : > { %v5575_v45 = vpop.eup %5574 }
 0x407   : > { %v4518_v47 = vadd.f32 %v5573_v25, %v4517_v48  ;;  %v4440_v16 = vmul.f32 %v5575_v45, %v4085_v24  ;;  %vm4445_vm15 = vweird.f32 %v5575_v45 }
 0x408   : > { %vm4446_vm9 = vmor %vm4444_vm1, %vm4445_vm15 }
 0x409   : > { %v4522_v2 = vsel %vm4521_vm11, %v5573_v25, %v4518_v47  ;;  %v4441_v14 = vsub.f32 1.0, %v4440_v16  ;;  %v9489_v16 = vpop.xlane.xlu2 %3220 }
 0x40a   : > { %v4527_v17 = vsel %vm4524_vm14, %v4526_v34, %v4522_v2 }
 0x40b   : > { %v4602_v10 = vmul.f32 %v4527_v17, %v9372_v53  ;;  %v4442_v46 = vmul.f32 %v5575_v45, %v4441_v14  ;;  %v4451_v53 = vor.u32 1.1754944e-38, %v4450_v57 }
 0x40c   : > { %2645 = vrot.lane.b32.xlu0 %v9419_v56, %s5666_s13 }
 0x40d   : > { %v4634_v12 = vadd.f32 %v4602_v10, %v10288_v6  ;;  %v4443_v39 = vadd.f32 %v5575_v45, %v4442_v46 }
 0x40e   : > { %v2610_v29 = vpop.permute.xlu0 %2609 }
 0x40f   : > { %4666 = vst.msk [vmem:[%s8115_s12 + $0xe0] sm:$0xff] %vm413_vm0, %v4634_v12  ;;  %v9427_v35 = vadd.f32 %v2610_v29, %v10289_v5  ;;  %v4447_v23 = vsel %vm4446_vm9, %v5575_v45, %v4443_v39 }
 0x410   : > { %v4452_v13 = vsel %vm4449_vm13, %v4451_v53, %v4447_v23 }
 0x411   : > { %2649 = vrot.lane.b32.xlu2 %v9427_v35, %s5666_s13  ;;  %v4597_v7 = vmul.f32 %v4452_v13, %v9399_v55  ;;  %v2709_v3 = vmul.f32 %v9427_v35, %v9427_v35 }
 0x413   : > { %v4629_v40 = vadd.f32 %v4597_v7, %v10291_v43 }
 0x414   : > { %2647 = vrot.lane.b32.xlu0 %v9433_v4, %s5666_s13 }
 0x415   : > { %4661 = vst.msk [vmem:[%s8115_s12 + $0xb8] sm:$0xff] %vm413_vm0, %v4629_v40 }
 0x416   : > { %v2616_v21 = vpop.permute.xlu0 %2615 }
 0x417   : > { %v9441_v37 = vadd.f32 %v2616_v21, %v10292_v63 }
 0x419   : > { %2655 = vrot.lane.b32.xlu1 %v9441_v37, %s5666_s13  ;;  %v2712_v55 = vmul.f32 %v9441_v37, %v9441_v37 }
 0x41c   : > { %2724 = vrot.lane.b32.xlu0 %v2707_v27, %s5666_s13 }
 0x424   : > { %2726 = vrot.lane.b32.xlu0 %v2708_v61, %s5666_s13  ;;  %v2618_v19 = vpop.permute.xlu0 %2617 }
 0x425   : > { %v9458_v33 = vadd.f32 %v2618_v19, %v10293_v9 }
 0x427   : > { %v2713_v49 = vmul.f32 %v9458_v33, %v9458_v33 }
 0x42c   : > { %2728 = vrot.lane.b32.xlu0 %v2709_v3, %s5666_s13 }
 0x434   : > { %2734 = vrot.lane.b32.xlu0 %v2712_v55, %s5666_s13 }
 0x43c   : > { %2657 = vrot.lane.b32.xlu0 %v9458_v33, %s5666_s13 }
 0x444   : > { %2736 = vrot.lane.b32.xlu0 %v2713_v49, %s5666_s13 }
 0x45a   : > { %v2612_v58 = vpop.permute.xlu0 %2611 }
 0x45b   : > { %v9466_v60 = vadd.f32 %v2612_v58, %v10294_v36 }
 0x45d   : > { %v2710_v54 = vmul.f32 %v9466_v60, %v9466_v60  ;;  %2651 = vrot.lane.b32.xlu0 %v9466_v60, %s5666_s13 }
 0x45f   : > { %2730 = vrot.lane.b32.xlu2 %v2710_v54, %s5666_s13 }
 0x466   : > { %v2614_v59 = vpop.permute.xlu0 %2613 }
 0x467   : > { %v9474_v44 = vadd.f32 %v2614_v59, %v10295_v0 }
 0x469   : > { %v2711_v31 = vmul.f32 %v9474_v44, %v9474_v44  ;;  %2653 = vrot.lane.b32.xlu0 %v9474_v44, %s5666_s13 }
 0x46b   : > { %2732 = vrot.lane.b32.xlu1 %v2711_v31, %s5666_s13  ;;  %v2650_v14 = vpop.permute.xlu2 %2649 }
 0x46c   : > { %v2676_v57 = vsel %vm413_vm0, %v2650_v14, 0.0 }
 0x46e   : > { %v2644_v52 = vpop.permute.xlu0 %2643 }
 0x46f   : > { %v2667_v20 = vsel %vm413_vm0, %v2644_v52, 0.0 }
 0x476   : > { %v2723_v18 = vpop.permute.xlu0 %2722 }
 0x477   : > { %v2746_v48 = vsel %vm413_vm0, %v2723_v18, 0.0 }
 0x47e   : > { %v2646_v8 = vpop.permute.xlu0 %2645 }
 0x47f   : > { %v2670_v47 = vsel %vm413_vm0, %v2646_v8, 0.0 }
 0x486   : > { %v2648_v62 = vpop.permute.xlu0 %2647 }
 0x487   : > { %v2673_v2 = vsel %vm413_vm0, %v2648_v62, 0.0 }
 0x48b   : > { %v2656_v11 = vpop.permute.xlu1 %2655 }
 0x48c   : > { %v2685_v45 = vsel %vm413_vm0, %v2656_v11, 0.0 }
 0x48e   : > { %v2725_v24 = vpop.permute.xlu0 %2724 }
 0x48f   : > { %v2749_v25 = vsel %vm413_vm0, %v2725_v24, 0.0 }
 0x490   : > { %2750 = vadd.xlane.f32.xlu2 %v2749_v25 }
 0x493   : > { %2668 = vadd.xlane.f32.xlu0 %v2667_v20 }
 0x496   : > { %v2727_v42 = vpop.permute.xlu0 %2726 }
 0x497   : > { %v2752_v26 = vsel %vm413_vm0, %v2727_v42, 0.0 }
 0x498   : > { %2753 = vadd.xlane.f32.xlu1 %v2752_v26 }
 0x49b   : > { %2747 = vadd.xlane.f32.xlu0 %v2746_v48 }
 0x49e   : > { %v2729_v50 = vpop.permute.xlu0 %2728 }
 0x49f   : > { %v2755_v32 = vsel %vm413_vm0, %v2729_v50, 0.0 }
 0x4a0   : > { %2686 = vadd.xlane.f32.xlu1 %v2685_v45 }
 0x4a3   : > { %2671 = vadd.xlane.f32.xlu0 %v2670_v47 }
 0x4a6   : > { %v2735_v34 = vpop.permute.xlu0 %2734 }
 0x4a7   : > { %v2764_v39 = vsel %vm413_vm0, %v2735_v34, 0.0 }
 0x4ab   : > { %2674 = vadd.xlane.f32.xlu0 %v2673_v2 }
 0x4ae   : > { %v2658_v17 = vpop.permute.xlu0 %2657 }
 0x4af   : > { %v2688_v10 = vsel %vm413_vm0, %v2658_v17, 0.0  ;;  %v10296_v17 = vld [vmem:[#allocation67_spill] sm:$0xff] }
 0x4b0   : > { %2689 = vadd.xlane.f32.xlu2 %v2688_v10 }
 0x4b3   : > { %2677 = vadd.xlane.f32.xlu0 %v2676_v57 }
 0x4b6   : > { %v2737_v30 = vpop.permute.xlu0 %2736 }
 0x4b7   : > { %v2767_v46 = vsel %vm413_vm0, %v2737_v30, 0.0  ;;  %v10297_v30 = vld [vmem:[#allocation52_spill] sm:$0xff] }
 0x4b8   : > { %2768 = vadd.xlane.f32.xlu2 %v2767_v46 }
 0x4b9   : > { %v2731_v6 = vpop.permute.xlu2 %2730 }
 0x4ba   : > { %v2758_v12 = vsel %vm413_vm0, %v2731_v6, 0.0 }
 0x4bb   : > { %2756 = vadd.xlane.f32.xlu0 %v2755_v32 }
 0x4c0   : > { %2759 = vadd.xlane.f32.xlu2 %v2758_v12 }
 0x4c3   : > { %2765 = vadd.xlane.f32.xlu0 %v2764_v39 }
 0x4cf   : > { %v2652_v29 = vpop.permute.xlu0 %2651 }
 0x4d0   : > { %v2679_v53 = vsel %vm413_vm0, %v2652_v29, 0.0 }
 0x4d1   : > { %2680 = vadd.xlane.f32.xlu0 %v2679_v53 }
 0x4db   : > { %v2654_v5 = vpop.permute.xlu0 %2653 }
 0x4dc   : > { %v2682_v23 = vsel %vm413_vm0, %v2654_v5, 0.0 }
 0x4dd   : > { %v2733_v13 = vpop.permute.xlu1 %2732  ;;  %2683 = vadd.xlane.f32.xlu0 %v2682_v23 }
 0x4de   : > { %v2761_v7 = vsel %vm413_vm0, %v2733_v13, 0.0 }
 0x4df   : > { %2762 = vadd.xlane.f32.xlu1 %v2761_v7 }
 0x503   : > { %v2751_v3 = vpop.xlane.xlu2 %2750 }
 0x504   : > { %v2771_v9 = vmul.f32 %v2751_v3, %v7996_v41 }
 0x506   : > { %v2669_v22 = vpop.xlane.xlu0 %2668 }
 0x507   : > { %v2698_v43 = vmul.f32 %v7996_v41, %v2669_v22 }
 0x509   : > { %v2778_v21 = vmul.f32 %v2698_v43, %v2698_v43  ;;  %v2794_v48 = vsub.f32 %v9406_v1, %v2698_v43 }
 0x50b   : > { %v2754_v59 = vpop.xlane.xlu1 %2753 }
 0x50c   : > { %v2772_v8 = vmul.f32 %v2754_v59, %v7996_v41 }
 0x50e   : > { %v2748_v40 = vpop.xlane.xlu0 %2747 }
 0x50f   : > { %v2770_v63 = vmul.f32 %v2748_v40, %v7996_v41 }
 0x511   : > { %v2786_v27 = vsub.f32 %v2770_v63, %v2778_v21 }
 0x513   : > { %v2802_v61 = vadd.f32 1e-05, %v2786_v27  ;;  %v2687_v13 = vpop.xlane.xlu1 %2686 }
 0x514   : > { %v9525_v27 = vmul.f32 %v7996_v41, %v2687_v13 }
 0x515   : > { %5576 = vrsqrt.f32 %v2802_v61  ;;  %vm2816_vm5 = vweird.f32 %v2802_v61 }
 0x516   : > { %v2672_v55 = vpop.xlane.xlu0 %2671 }
 0x517   : > { %v2699_v19 = vmul.f32 %v7996_v41, %v2672_v55 }
 0x519   : > { %v2779_v49 = vmul.f32 %v2699_v19, %v2699_v19  ;;  %v2795_v5 = vsub.f32 %v9419_v56, %v2699_v19 }
 0x51b   : > { %v5577_v58 = vpop.eup %5576  ;;  %v2787_v36 = vsub.f32 %v2771_v9, %v2779_v49 }
 0x51c   : > { %v2811_v54 = vmul.f32 %v5577_v58, %v2802_v61  ;;  %vm2817_vm3 = vweird.f32 %v5577_v58 }
 0x51d   : > { %v2803_v0 = vadd.f32 1e-05, %v2787_v36  ;;  %vm2818_vm6 = vmor %vm2816_vm5, %vm2817_vm3 }
 0x51e   : > { %v2812_v31 = vmul.f32 %v5577_v58, %v2811_v54  ;;  %v2675_v52 = vpop.xlane.xlu0 %2674 }
 0x51f   : > { %5578 = vrsqrt.f32 %v2803_v0  ;;  %v9506_v18 = vmul.f32 %v7996_v41, %v2675_v52  ;;  %vm2826_vm4 = vweird.f32 %v2803_v0 }
 0x520   : > { %v2813_v62 = vmul.f32 0.5, %v2812_v31 }
 0x521   : > { %v2780_v24 = vmul.f32 %v9506_v18, %v9506_v18 }
 0x522   : > { %v2814_v25 = vsub.f32 1.5, %v2813_v62  ;;  %v2796_v62 = vsub.f32 %v9433_v4, %v9506_v18 }
 0x523   : > { %v2788_v20 = vsub.f32 %v2772_v8, %v2780_v24  ;;  %v2690_v53 = vpop.xlane.xlu2 %2689 }
 0x524   : > { %v2815_v42 = vmul.f32 %v5577_v58, %v2814_v25  ;;  %v9528_v3 = vmul.f32 %v7996_v41, %v2690_v53 }
 0x525   : > { %v5579_v26 = vpop.eup %5578  ;;  %v2804_v11 = vadd.f32 1e-05, %v2788_v20 }
 0x526   : > { %v2819_v50 = vsel %vm2818_vm6, %v5577_v58, %v2815_v42  ;;  %v2821_v45 = vmul.f32 %v5579_v26, %v2803_v0  ;;  %v2678_v47 = vpop.xlane.xlu0 %2677  ;;  %vm2827_vm2 = vweird.f32 %v5579_v26  ;;  %v2784_v58 = vmul.f32 %v9525_v27, %v9525_v27 }
 0x527   : > { %5580 = vrsqrt.f32 %v2804_v11  ;;  %v2890_v34 = vmul.f32 %v2819_v50, %v2794_v48  ;;  %v9514_v57 = vmul.f32 %v7996_v41, %v2678_v47  ;;  %vm2828_vm7 = vmor %vm2826_vm4, %vm2827_vm2  ;;  %vm2836_vm10 = vweird.f32 %v2804_v11 }
 0x528   : > { %v2822_v2 = vmul.f32 %v5579_v26, %v2821_v45  ;;  %v2785_v31 = vmul.f32 %v9528_v3, %v9528_v3 }
 0x529   : > { %v2903_v14 = vmul.f32 %v10296_v17, %v2890_v34  ;;  %v2781_v23 = vmul.f32 %v9514_v57, %v9514_v57 }
 0x52a   : > { %v2823_v10 = vmul.f32 0.5, %v2822_v2 }
 0x52b   : > { %v9517_v46 = vadd.f32 %v10297_v30, %v2903_v14  ;;  %v2769_v54 = vpop.xlane.xlu2 %2768 }
 0x52c   : > { %v2824_v32 = vsub.f32 1.5, %v2823_v10  ;;  %v2777_v52 = vmul.f32 %v2769_v54, %v7996_v41 }
 0x52d   : > { %v5581_v1 = vpop.eup %5580  ;;  %v4960_v6 = vmul.f32 -1.442695, %v9517_v46 }
 0x52e   : > { %v2825_v12 = vmul.f32 %v5579_v26, %v2824_v32  ;;  %v2831_v39 = vmul.f32 %v5581_v1, %v2804_v11  ;;  %v2757_v29 = vpop.xlane.xlu0 %2756  ;;  %vm2837_vm8 = vweird.f32 %v5581_v1  ;;  %v2793_v20 = vsub.f32 %v2777_v52, %v2785_v31 }
 0x52f   : > { %v2773_v7 = vmul.f32 %v2757_v29, %v7996_v41  ;;  %5582 = vpow2.f32 %v4960_v6  ;;  %vm2838_vm12 = vmor %vm2836_vm10, %vm2837_vm8 }
 0x530   : > { %v2829_v22 = vsel %vm2828_vm7, %v5579_v26, %v2825_v12  ;;  %v2832_v43 = vmul.f32 %v5581_v1, %v2831_v39  ;;  %v9545_v11 = vadd.f32 1e-05, %v2793_v20 }
 0x531   : > { %v2891_v40 = vmul.f32 %v2829_v22, %v2795_v5  ;;  %v2789_v21 = vsub.f32 %v2773_v7, %v2781_v23  ;;  %v2797_v5 = vsub.f32 %v9427_v35, %v9514_v57 }
 0x532   : > { %v2833_v63 = vmul.f32 0.5, %v2832_v43  ;;  %vm2886_vm6 = vweird.f32 %v9545_v11 }
 0x533   : > { %v2805_v61 = vadd.f32 1e-05, %v2789_v21  ;;  %v2904_v56 = vmul.f32 %v10296_v17, %v2891_v40  ;;  %v2760_v43 = vpop.xlane.xlu2 %2759 }
 0x534   : > { %v2834_v55 = vsub.f32 1.5, %v2833_v63 }
 0x535   : > { %v5583_v19 = vpop.eup %5582  ;;  %5584 = vrsqrt.f32 %v2805_v61  ;;  %v9532_v9 = vadd.f32 %v10297_v30, %v2904_v56  ;;  %vm2846_vm15 = vweird.f32 %v2805_v61 }
 0x536   : > { %v2835_v49 = vmul.f32 %v5581_v1, %v2834_v55  ;;  %v2766_v36 = vpop.xlane.xlu0 %2765  ;;  %v2948_v59 = vadd.f32 1.0, %v5583_v19 }
 0x537   : > { %v2776_v0 = vmul.f32 %v2766_v36, %v7996_v41  ;;  %v4961_v8 = vmul.f32 -1.442695, %v9532_v9 }
 0x538   : > { %v2839_v24 = vsel %vm2838_vm12, %v5581_v1, %v2835_v49  ;;  %5586 = vrcp.f32 %v2948_v59  ;;  %v2800_v1 = vsub.f32 %v9441_v37, %v9525_v27  ;;  %v2965_v12 = vand.u32 2147483647, %v2948_v59 }
 0x539   : > { %v2792_v25 = vsub.f32 %v2776_v0, %v2784_v58  ;;  %5588 = vpow2.f32 %v4961_v8  ;;  %v2892_v42 = vmul.f32 %v2839_v24, %v2796_v62  ;;  %v2967_v29 = vand.u32 2147483648, %v2948_v59 }
 0x53a   : > { %vm2961_vm1 = vweird.f32 %v2948_v59  ;;  %vm2966_vm13 = vcmp.eq.f32.partialorder %v2965_v12, 8.507059e+37  ;;  %v2774_v49 = vmul.f32 %v2760_v43, %v7996_v41 }
 0x53b   : > { %v5585_v26 = vpop.eup %5584  ;;  %v9543_v48 = vadd.f32 1e-05, %v2792_v25  ;;  %v2905_v45 = vmul.f32 %v10296_v17, %v2892_v42  ;;  %v2968_v55 = vor.u32 1.1754944e-38, %v2967_v29 }
 0x53c   : > { %v2841_v50 = vmul.f32 %v5585_v26, %v2805_v61  ;;  %vm2847_vm11 = vweird.f32 %v5585_v26 }
 0x53d   : > { %5590 = vrsqrt.f32 %v9543_v48  ;;  %v9551_v4 = vadd.f32 %v10297_v30, %v2905_v45  ;;  %vm9565_vm9 = vmor %vm2846_vm15, %vm2847_vm11  ;;  %vm2876_vm3 = vweird.f32 %v9543_v48 }
 0x53e   : > { %v5587_v47 = vpop.eup %5586  ;;  %v2842_v34 = vmul.f32 %v5585_v26, %v2841_v50  ;;  %5592 = vrsqrt.f32 %v9545_v11 }
 0x53f   : > { %v5589_v18 = vpop.eup %5588  ;;  %v2957_v2 = vmul.f32 %v5587_v47, %v2948_v59  ;;  %v4962_v32 = vmul.f32 -1.442695, %v9551_v4  ;;  %vm2962_vm14 = vweird.f32 %v5587_v47 }
 0x540   : > { %v2843_v14 = vmul.f32 0.5, %v2842_v34  ;;  %v9553_v10 = vadd.f32 1.0, %v5589_v18  ;;  %vm2963_vm5 = vmor %vm2961_vm1, %vm2962_vm14 }
 0x541   : > { %v2958_v6 = vsub.f32 1.0, %v2957_v2 }
 0x542   : > { %v2844_v39 = vsub.f32 1.5, %v2843_v14  ;;  %5594 = vrcp.f32 %v9553_v10  ;;  %v2980_v18 = vand.u32 2147483647, %v9553_v10  ;;  %vm2976_vm12 = vweird.f32 %v9553_v10 }
 0x543   : > { %v5591_v53 = vpop.eup %5590  ;;  %v2959_v23 = vmul.f32 %v5587_v47, %v2958_v6  ;;  %5596 = vpow2.f32 %v4962_v32  ;;  %v2801_v6 = vsub.f32 %v9458_v33, %v9528_v3 }
 0x544   : > { %v9561_v13 = vpop.eup %5592  ;;  %v2845_v7 = vmul.f32 %v5585_v26, %v2844_v39  ;;  %v2871_v22 = vmul.f32 %v5591_v53, %v9543_v48  ;;  %v2681_v40 = vpop.xlane.xlu0 %2680  ;;  %vm2877_vm2 = vweird.f32 %v5591_v53  ;;  %vm2981_vm14 = vcmp.eq.f32.partialorder %v2980_v18, 8.507059e+37 }
 0x545   : > { %v2881_v35 = vmul.f32 %v9561_v13, %v9545_v11  ;;  %v9572_v57 = vmul.f32 %v7996_v41, %v2681_v40  ;;  %v2960_v63 = vadd.f32 %v5587_v47, %v2959_v23  ;;  %vm2887_vm4 = vweird.f32 %v9561_v13  ;;  %vm2878_vm7 = vmor %vm2876_vm3, %vm2877_vm2 }
 0x546   : > { %v2849_v61 = vsel %vm9565_vm9, %v5585_v26, %v2845_v7  ;;  %v2872_v56 = vmul.f32 %v5591_v53, %v2871_v22  ;;  %vm2888_vm10 = vmor %vm2886_vm6, %vm2887_vm4 }
 0x547   : > { %v2882_v19 = vmul.f32 %v9561_v13, %v2881_v35  ;;  %v2782_v58 = vmul.f32 %v9572_v57, %v9572_v57  ;;  %v2964_v36 = vsel %vm2963_vm5, %v5587_v47, %v2960_v63  ;;  %v2893_v31 = vmul.f32 %v2849_v61, %v2797_v5 }
 0x548   : > { %v5595_v54 = vpop.eup %5594  ;;  %v2873_v59 = vmul.f32 0.5, %v2872_v56  ;;  %v2969_v0 = vsel %vm2966_vm13, %v2968_v55, %v2964_v36 }
 0x549   : > { %v5597_v52 = vpop.eup %5596  ;;  %v2883_v8 = vmul.f32 0.5, %v2882_v19  ;;  %v2790_v62 = vsub.f32 %v2774_v49, %v2782_v58  ;;  %v3076_v24 = vmul.f32 %v2969_v0, %v9517_v46  ;;  %v2972_v25 = vmul.f32 %v5595_v54, %v9553_v10 }
 0x54a   : > { %v2874_v20 = vsub.f32 1.5, %v2873_v59  ;;  %v9585_v42 = vadd.f32 1.0, %v5597_v52  ;;  %v2906_v26 = vmul.f32 %v10296_v17, %v2893_v31  ;;  %v2982_v46 = vand.u32 2147483648, %v9553_v10 }
 0x54b   : > { %v2884_v50 = vsub.f32 1.5, %v2883_v8  ;;  %v9589_v45 = vadd.f32 1e-05, %v2790_v62  ;;  %3092 = vrot.lane.b32.xlu2 %v3076_v24, %s5666_s13  ;;  %v2973_v47 = vsub.f32 1.0, %v2972_v25  ;;  %vm2977_vm8 = vweird.f32 %v5595_v54 }
 0x54c   : > { %v2875_v34 = vmul.f32 %v5591_v53, %v2874_v20  ;;  %5598 = vrcp.f32 %v9585_v42  ;;  %v9606_v12 = vadd.f32 %v10297_v30, %v2906_v26  ;;  %vm2978_vm11 = vmor %vm2976_vm12, %vm2977_vm8  ;;  %v2983_v33 = vor.u32 1.1754944e-38, %v2982_v46 }
 0x54d   : > { %v2885_v2 = vmul.f32 %v9561_v13, %v2884_v50  ;;  %5600 = vrsqrt.f32 %v9589_v45  ;;  %v2974_v14 = vmul.f32 %v5595_v54, %v2973_v47  ;;  %v2997_v49 = vand.u32 2147483648, %v9585_v42 }
 0x54e   : > { %v2879_v32 = vsel %vm2878_vm7, %v5591_v53, %v2875_v34  ;;  %v4963_v3 = vmul.f32 -1.442695, %v9606_v12  ;;  %v2995_v0 = vand.u32 2147483647, %v9585_v42  ;;  %vm2991_vm1 = vweird.f32 %v9585_v42 }
 0x54f   : > { %v2889_v48 = vsel %vm2888_vm10, %v9561_v13, %v2885_v2  ;;  %v2975_v39 = vadd.f32 %v5595_v54, %v2974_v14  ;;  %v2896_v29 = vmul.f32 %v2879_v32, %v2800_v1  ;;  %vm2856_vm13 = vweird.f32 %v9589_v45 }
 0x550   : > { %v2684_v53 = vpop.xlane.xlu0 %2683  ;;  %v2897_v11 = vmul.f32 %v2889_v48, %v2801_v6  ;;  %5602 = vpow2.f32 %v4963_v3  ;;  %v2998_v24 = vor.u32 1.1754944e-38, %v2997_v49  ;;  %vm2996_vm5 = vcmp.eq.f32.partialorder %v2995_v0, 8.507059e+37 }
 0x551   : > { %v9615_v5 = vmul.f32 %v7996_v41, %v2684_v53  ;;  %v2979_v23 = vsel %vm2978_vm11, %v5595_v54, %v2975_v39  ;;  %v2909_v13 = vmul.f32 %v10296_v17, %v2896_v29  ;;  %v2798_v26 = vsub.f32 %v9466_v60, %v9572_v57 }
 0x552   : > { %v5599_v7 = vpop.eup %5598  ;;  %v2763_v22 = vpop.xlane.xlu1 %2762  ;;  %v2984_v10 = vsel %vm2981_vm14, %v2983_v33, %v2979_v23  ;;  %v2910_v61 = vmul.f32 %v10296_v17, %v2897_v11 }
 0x553   : > { %v5601_v43 = vpop.eup %5600  ;;  %v2775_v37 = vmul.f32 %v2763_v22, %v7996_v41  ;;  %v2783_v27 = vmul.f32 %v9615_v5, %v9615_v5  ;;  %v3077_v1 = vmul.f32 %v2984_v10, %v9532_v9  ;;  %v2987_v21 = vmul.f32 %v5599_v7, %v9585_v42 }
 0x554   : > { %v2851_v40 = vmul.f32 %v5601_v43, %v9589_v45  ;;  %v9626_v63 = vadd.f32 %v10297_v30, %v2909_v13  ;;  %v9632_v9 = vadd.f32 %v10297_v30, %v2910_v61  ;;  %vm2992_vm15 = vweird.f32 %v5599_v7 }
 0x555   : > { %v2791_v35 = vsub.f32 %v2775_v37, %v2783_v27  ;;  %3094 = vrot.lane.b32.xlu0 %v3077_v1, %s5666_s13  ;;  %v2988_v55 = vsub.f32 1.0, %v2987_v21  ;;  %vm2857_vm9 = vweird.f32 %v5601_v43  ;;  %vm2993_vm3 = vmor %vm2991_vm1, %vm2992_vm15  ;;  %v2799_v10 = vsub.f32 %v9474_v44, %v9615_v5 }
 0x556   : > { %v2852_v56 = vmul.f32 %v5601_v43, %v2851_v40  ;;  %v4966_v58 = vmul.f32 -1.442695, %v9626_v63  ;;  %v5603_v36 = vpop.eup %5602  ;;  %v4967_v52 = vmul.f32 -1.442695, %v9632_v9  ;;  %vm2858_vm6 = vmor %vm2856_vm13, %vm2857_vm9 }
 0x557   : > { %v2807_v19 = vadd.f32 1e-05, %v2791_v35  ;;  %v2989_v59 = vmul.f32 %v5599_v7, %v2988_v55  ;;  %v2951_v31 = vadd.f32 1.0, %v5603_v36 }
 0x558   : > { %v2853_v54 = vmul.f32 0.5, %v2852_v56 }
 0x559   : > { %5604 = vrsqrt.f32 %v2807_v19  ;;  %v2990_v62 = vadd.f32 %v5599_v7, %v2989_v59  ;;  %v3010_v33 = vand.u32 2147483647, %v2951_v31  ;;  %v3012_v3 = vand.u32 2147483648, %v2951_v31 }
 0x55a   : > { %v2854_v8 = vsub.f32 1.5, %v2853_v54  ;;  %5606 = vpow2.f32 %v4966_v58  ;;  %vm2866_vm7 = vweird.f32 %v2807_v19  ;;  %vm3006_vm10 = vweird.f32 %v2951_v31 }
 0x55b   : > { %5608 = vrcp.f32 %v2951_v31  ;;  %v2994_v20 = vsel %vm2993_vm3, %v5599_v7, %v2990_v62  ;;  %vm3011_vm11 = vcmp.eq.f32.partialorder %v3010_v33, 8.507059e+37 }
 0x55c   : > { %v2855_v25 = vmul.f32 %v5601_v43, %v2854_v8  ;;  %5610 = vpow2.f32 %v4967_v52  ;;  %v2999_v42 = vsel %vm2996_vm5, %v2998_v24, %v2994_v20 }
 0x55d   : > { %v3078_v47 = vmul.f32 %v2999_v42, %v9551_v4 }
 0x55e   : > { %v2859_v50 = vsel %vm2858_vm6, %v5601_v43, %v2855_v25  ;;  %v3013_v43 = vor.u32 1.1754944e-38, %v3012_v3 }
 0x55f   : > { %v5605_v34 = vpop.eup %5604  ;;  %v2894_v18 = vmul.f32 %v2859_v50, %v2798_v26  ;;  %3096 = vrot.lane.b32.xlu1 %v3078_v47, %s5666_s13 }
 0x560   : > { %v5607_v46 = vpop.eup %5606  ;;  %v2861_v2 = vmul.f32 %v5605_v34, %v2807_v19  ;;  %vm2867_vm2 = vweird.f32 %v5605_v34 }
 0x561   : > { %v5609_v45 = vpop.eup %5608  ;;  %v2907_v14 = vmul.f32 %v10296_v17, %v2894_v18  ;;  %v2954_v32 = vadd.f32 1.0, %v5607_v46  ;;  %vm2868_vm8 = vmor %vm2866_vm7, %vm2867_vm2 }
 0x562   : > { %v5611_v6 = vpop.eup %5610  ;;  %v2862_v48 = vmul.f32 %v5605_v34, %v2861_v2  ;;  %v3002_v39 = vmul.f32 %v5609_v45, %v2951_v31  ;;  %vm3007_vm4 = vweird.f32 %v5609_v45 }
 0x563   : > { %v9644_v60 = vadd.f32 %v10297_v30, %v2907_v14  ;;  %5612 = vrcp.f32 %v2954_v32  ;;  %v2955_v4 = vadd.f32 1.0, %v5611_v6  ;;  %vm3008_vm12 = vmor %vm3006_vm10, %vm3007_vm4  ;;  %v3057_v55 = vand.u32 2147483648, %v2954_v32 }
 0x564   : > { %v2863_v57 = vmul.f32 0.5, %v2862_v48  ;;  %v3003_v29 = vsub.f32 1.0, %v3002_v39  ;;  %v3055_v5 = vand.u32 2147483647, %v2954_v32  ;;  %vm3051_vm15 = vweird.f32 %v2954_v32 }
 0x565   : > { %v4964_v53 = vmul.f32 -1.442695, %v9644_v60  ;;  %5614 = vrcp.f32 %v2955_v4  ;;  %v3058_v31 = vor.u32 1.1754944e-38, %v3057_v55  ;;  %v3070_v8 = vand.u32 2147483647, %v2955_v4 }
 0x566   : > { %v2864_v11 = vsub.f32 1.5, %v2863_v57  ;;  %v3004_v23 = vmul.f32 %v5609_v45, %v3003_v29  ;;  %vm3056_vm13 = vcmp.eq.f32.partialorder %v3055_v5, 8.507059e+37  ;;  %vm3066_vm3 = vweird.f32 %v2955_v4 }
 0x567   : > { %5616 = vpow2.f32 %v4964_v53  ;;  %vm3071_vm6 = vcmp.eq.f32.partialorder %v3070_v8, 8.507059e+37  ;;  %v10304_v8 = vld [vmem:[#allocation3_spill] sm:$0xff] }
 0x568   : > { %v2865_v13 = vmul.f32 %v5605_v34, %v2864_v11  ;;  %v3005_v7 = vadd.f32 %v5609_v45, %v3004_v23 }
 0x569   : > { %v5613_v22 = vpop.eup %5612 }
 0x56a   : > { %v2869_v37 = vsel %vm2868_vm8, %v5605_v34, %v2865_v13  ;;  %v3009_v27 = vsel %vm3008_vm12, %v5609_v45, %v3005_v7  ;;  %v3047_v1 = vmul.f32 %v5613_v22, %v2954_v32  ;;  %vm3052_vm14 = vweird.f32 %v5613_v22 }
 0x56b   : > { %v2895_v40 = vmul.f32 %v2869_v37, %v2799_v10  ;;  %v3014_v21 = vsel %vm3011_vm11, %v3013_v43, %v3009_v27  ;;  %v5615_v35 = vpop.eup %5614  ;;  %vm3053_vm1 = vmor %vm3051_vm15, %vm3052_vm14  ;;  %v5651_v27 = vld [vmem:[%s5725_s7] sm:$0xff] }
 0x56c   : > { %v3079_v61 = vmul.f32 %v3014_v21, %v9606_v12  ;;  %v3048_v56 = vsub.f32 1.0, %v3047_v1  ;;  %v3062_v58 = vmul.f32 %v5615_v35, %v2955_v4  ;;  %v3072_v12 = vand.u32 2147483648, %v2955_v4 }
 0x56d   : > { %v5617_v19 = vpop.eup %5616  ;;  %v2908_v49 = vmul.f32 %v10296_v17, %v2895_v40  ;;  %vm3067_vm9 = vweird.f32 %v5615_v35  ;;  %v10301_v40 = vld [vmem:[#allocation80_spill] sm:$0xff] }
 0x56e   : > { %v2952_v36 = vadd.f32 1.0, %v5617_v19  ;;  %3098 = vrot.lane.b32.xlu2 %v3079_v61, %s5666_s13  ;;  %v3049_v44 = vmul.f32 %v5613_v22, %v3048_v56  ;;  %v3063_v54 = vsub.f32 1.0, %v3062_v58  ;;  %vm3068_vm5 = vmor %vm3066_vm3, %vm3067_vm9  ;;  %v3073_v26 = vor.u32 1.1754944e-38, %v3072_v12  ;;  %v10302_v61 = vld [vmem:[#allocation59_spill] sm:$0xff] }
 0x56f   : > { %v2921_v59 = vadd.f32 %v10297_v30, %v2908_v49  ;;  %v3290_v21 = vmul.f32 %v10301_v40, %v10301_v40  ;;  %v3291_v56 = vmul.f32 %v10302_v61, %v10302_v61 }
 0x570   : > { %5618 = vrcp.f32 %v2952_v36  ;;  %v3050_v0 = vadd.f32 %v5613_v22, %v3049_v44  ;;  %v3064_v52 = vmul.f32 %v5615_v35, %v3063_v54  ;;  %v3027_v2 = vand.u32 2147483648, %v2952_v36 }
 0x571   : > { %v4965_v17 = vmul.f32 -1.442695, %v2921_v59  ;;  %vm3021_vm4 = vweird.f32 %v2952_v36  ;;  %v3385_v55 = vsel %vm413_vm0, %v3291_v56, 0.0 }
 0x572   : > { %v3054_v62 = vsel %vm3053_vm1, %v5613_v22, %v3050_v0  ;;  %v3065_v25 = vadd.f32 %v5615_v35, %v3064_v52  ;;  %v3028_v6 = vor.u32 1.1754944e-38, %v3027_v2 }
 0x573   : > { %v3059_v24 = vsel %vm3056_vm13, %v3058_v31, %v3054_v62  ;;  %5620 = vpow2.f32 %v4965_v17  ;;  %v10305_v62 = vld [vmem:[#allocation5_spill] sm:$0xff] }
 0x574   : > { %v3082_v20 = vmul.f32 %v3059_v24, %v9626_v63  ;;  %v3069_v30 = vsel %vm3068_vm5, %v5615_v35, %v3065_v25  ;;  %v3025_v63 = vand.u32 2147483647, %v2952_v36  ;;  %v3382_v35 = vsel %vm413_vm0, %v3290_v21, 0.0 }
 0x575   : > { %v3074_v50 = vsel %vm3071_vm6, %v3073_v26, %v3069_v30  ;;  %v10307_v30 = vld [vmem:[#allocation6_spill] sm:$0xff] }
 0x576   : > { %v5619_v42 = vpop.eup %5618  ;;  %3104 = vrot.lane.b32.xlu2 %v3082_v20, %s5666_s13  ;;  %v3083_v47 = vmul.f32 %v3074_v50, %v9632_v9  ;;  %vm3026_vm8 = vcmp.eq.f32.partialorder %v3025_v63, 8.507059e+37  ;;  %v10306_v20 = vld [vmem:[#allocation4_spill] sm:$0xff]  ;;  %v3257_v50 = vmul.f32 %v9489_v16, %v7996_v41 }
 0x577   : > { %v3017_v34 = vmul.f32 %v5619_v42, %v2952_v36  ;;  %vm3022_vm2 = vweird.f32 %v5619_v42 }
 0x578   : > { %3106 = vrot.lane.b32.xlu0 %v3083_v47, %s5666_s13  ;;  %vm3023_vm7 = vmor %vm3021_vm4, %vm3022_vm2 }
 0x579   : > { %v5621_v18 = vpop.eup %5620  ;;  %v3018_v46 = vsub.f32 1.0, %v3017_v34  ;;  %v3449_v34 = vmul.f32 %v3257_v50, %v3257_v50 }
 0x57a   : > { %v2953_v45 = vadd.f32 1.0, %v5621_v18 }
 0x57b   : > { %v3019_v14 = vmul.f32 %v5619_v42, %v3018_v46 }
 0x57c   : > { %5622 = vrcp.f32 %v2953_v45  ;;  %v3042_v53 = vand.u32 2147483648, %v2953_v45  ;;  %v3040_v3 = vand.u32 2147483647, %v2953_v45  ;;  %vm3036_vm12 = vweird.f32 %v2953_v45 }
 0x57d   : > { %v3020_v32 = vadd.f32 %v5619_v42, %v3019_v14 }
 0x57e   : > { %v3043_v23 = vor.u32 1.1754944e-38, %v3042_v53  ;;  %vm3041_vm14 = vcmp.eq.f32.partialorder %v3040_v3, 8.507059e+37  ;;  %v3259_v53 = vmul.f32 %v9483_v28, %v7996_v41 }
 0x57f   : > { %v3024_v48 = vsel %vm3023_vm7, %v5619_v42, %v3020_v32 }
 0x580   : > { %v3029_v39 = vsel %vm3026_vm8, %v3028_v6, %v3024_v48 }
 0x581   : > { %v3080_v9 = vmul.f32 %v3029_v39, %v9644_v60  ;;  %v10300_v60 = vld [vmem:[#allocation94_spill] sm:$0xff] }
 0x582   : > { %v5623_v57 = vpop.eup %5622  ;;  %v3289_v10 = vmul.f32 %v10300_v60, %v10300_v60 }
 0x583   : > { %3100 = vrot.lane.b32.xlu0 %v3080_v9, %s5666_s13  ;;  %v3032_v29 = vmul.f32 %v5623_v57, %v2953_v45  ;;  %vm3037_vm10 = vweird.f32 %v5623_v57  ;;  %v3258_v45 = vmul.f32 %v9382_v51, %v7996_v41  ;;  %v3513_v51 = vsub.f32 %v10300_v60, %v3257_v50 }
 0x584   : > { %vm3038_vm11 = vmor %vm3036_vm12, %vm3037_vm10  ;;  %v3379_v43 = vsel %vm413_vm0, %v3289_v10, 0.0 }
 0x585   : > { %v3033_v4 = vsub.f32 1.0, %v3032_v29  ;;  %v3450_v6 = vmul.f32 %v3258_v45, %v3258_v45  ;;  %v3514_v56 = vsub.f32 %v10301_v40, %v3258_v45 }
 0x587   : > { %v3034_v33 = vmul.f32 %v5623_v57, %v3033_v4 }
 0x589   : > { %v3035_v11 = vadd.f32 %v5623_v57, %v3034_v33 }
 0x58b   : > { %v3039_v13 = vsel %vm3038_vm11, %v5623_v57, %v3035_v11 }
 0x58c   : > { %v3044_v7 = vsel %vm3041_vm14, %v3043_v23, %v3039_v13  ;;  %v3451_v13 = vmul.f32 %v3259_v53, %v3259_v53 }
 0x58d   : > { %v3081_v22 = vmul.f32 %v3044_v7, %v2921_v59  ;;  %v10303_v59 = vld [vmem:[#allocation2_spill] sm:$0xff] }
 0x58f   : > { %3102 = vrot.lane.b32.xlu1 %v3081_v22, %s5666_s13 }
 0x59f   : > { %3380 = vadd.xlane.f32.xlu2 %v3379_v43 }
 0x5a5   : > { %v3093_v37 = vpop.permute.xlu2 %3092 }
 0x5a6   : > { %v3116_v1 = vadd.f32 %v5651_v27, %v3093_v37 }
 0x5a8   : > { %3124 = vst.msk [vmem:[%s9668_s16] sm:$0xff] %vm413_vm0, %v3116_v1 }
 0x5ad   : > { %3383 = vadd.xlane.f32.xlu0 %v3382_v35 }
 0x5af   : > { %v5652_v58 = vld [vmem:[%s5725_s7 + $0x8] sm:$0xff]  ;;  %v5653_v44 = vld [vmem:[%s5725_s7 + $0x18] sm:$0xff] }
 0x5b9   : > { %3386 = vadd.xlane.f32.xlu1 %v3385_v55 }
 0x5c7   : > { %v3095_v19 = vpop.permute.xlu0 %3094 }
 0x5c8   : > { %v3099_v49 = vpop.permute.xlu2 %3098  ;;  %v3117_v36 = vadd.f32 %v5652_v58, %v3095_v19 }
 0x5c9   : > { %v3119_v5 = vadd.f32 %v5653_v44, %v3099_v49 }
 0x5ca   : > { %3125 = vst.msk [vmem:[%s9668_s16 + $0x8] sm:$0xff] %vm413_vm0, %v3117_v36 }
 0x5cb   : > { %3127 = vst.msk [vmem:[%s9668_s16 + $0x18] sm:$0xff] %vm413_vm0, %v3119_v5 }
 0x5d0   : > { %v3105_v12 = vpop.permute.xlu2 %3104 }
 0x5d1   : > { %v3097_v54 = vpop.permute.xlu1 %3096  ;;  %v3122_v24 = vadd.f32 %v3105_v12, %v10305_v62 }
 0x5d2   : > { %v3118_v0 = vadd.f32 %v3097_v54, %v10303_v59 }
 0x5d3   : > { %3130 = vst.msk [vmem:[%s9668_s16 + $0x30] sm:$0xff] %vm413_vm0, %v3122_v24 }
 0x5d4   : > { %3126 = vst.msk [vmem:[%s9668_s16 + $0x10] sm:$0xff] %vm413_vm0, %v3118_v0 }
 0x5ea   : > { %v3107_v31 = vpop.permute.xlu0 %3106 }
 0x5eb   : > { %v3123_v42 = vadd.f32 %v3107_v31, %v10307_v30 }
 0x5ed   : > { %3131 = vst.msk [vmem:[%s9668_s16 + $0x38] sm:$0xff] %vm413_vm0, %v3123_v42 }
 0x5f5   : > { %v3101_v52 = vpop.permute.xlu0 %3100 }
 0x5f6   : > { %v3120_v17 = vadd.f32 %v3101_v52, %v10304_v8  ;;  %v3515_v8 = vsub.f32 %v10302_v61, %v3259_v53 }
 0x5f8   : > { %3128 = vst.msk [vmem:[%s9668_s16 + $0x20] sm:$0xff] %vm413_vm0, %v3120_v17 }
 0x601   : > { %v3103_v25 = vpop.permute.xlu1 %3102 }
 0x602   : > { %v3121_v26 = vadd.f32 %v3103_v25, %v10306_v20 }
 0x604   : > { %3129 = vst.msk [vmem:[%s9668_s16 + $0x28] sm:$0xff] %vm413_vm0, %v3121_v26 }
 0x612   : > { %v3381_v47 = vpop.xlane.xlu2 %3380 }
 0x613   : > { %v3417_v18 = vmul.f32 %v3381_v47, %v7996_v41 }
 0x615   : > { %v3481_v46 = vsub.f32 %v3417_v18, %v3449_v34 }
 0x617   : > { %v3545_v2 = vadd.f32 1e-05, %v3481_v46 }
 0x619   : > { %5624 = vrsqrt.f32 %v3545_v2  ;;  %vm3844_vm1 = vweird.f32 %v3545_v2 }
 0x61f   : > { %v5625_v14 = vpop.eup %5624 }
 0x620   : > { %v3839_v63 = vmul.f32 %v5625_v14, %v3545_v2  ;;  %v3384_v32 = vpop.xlane.xlu0 %3383  ;;  %vm3845_vm15 = vweird.f32 %v5625_v14 }
 0x621   : > { %v3418_v48 = vmul.f32 %v3384_v32, %v7996_v41  ;;  %vm3846_vm9 = vmor %vm3844_vm1, %vm3845_vm15 }
 0x622   : > { %v3840_v39 = vmul.f32 %v5625_v14, %v3839_v63 }
 0x623   : > { %v3482_v9 = vsub.f32 %v3418_v48, %v3450_v6 }
 0x624   : > { %v3841_v57 = vmul.f32 0.5, %v3840_v39 }
 0x625   : > { %v3546_v16 = vadd.f32 1e-05, %v3482_v9 }
 0x626   : > { %v3842_v29 = vsub.f32 1.5, %v3841_v57 }
 0x627   : > { %5626 = vrsqrt.f32 %v3546_v16  ;;  %vm3854_vm3 = vweird.f32 %v3546_v16 }
 0x628   : > { %v3843_v4 = vmul.f32 %v5625_v14, %v3842_v29 }
 0x62a   : > { %v3847_v33 = vsel %vm3846_vm9, %v5625_v14, %v3843_v4  ;;  %v10308_v14 = vld [vmem:[#allocation36_spill] sm:$0xff] }
 0x62b   : > { %v3897_v3 = vmul.f32 %v3847_v33, %v3513_v51  ;;  %v10309_v33 = vld [vmem:[#allocation37_spill] sm:$0xff] }
 0x62c   : > { %v3387_v11 = vpop.xlane.xlu1 %3386 }
 0x62d   : > { %v5627_v23 = vpop.eup %5626  ;;  %v3930_v7 = vmul.f32 %v8056_v15, %v3897_v3  ;;  %v3419_v22 = vmul.f32 %v3387_v11, %v7996_v41 }
 0x62e   : > { %v3849_v10 = vmul.f32 %v5627_v23, %v3546_v16  ;;  %vm3855_vm13 = vweird.f32 %v5627_v23 }
 0x62f   : > { %v3963_v43 = vadd.f32 %v8061_v38, %v3930_v7  ;;  %v3483_v37 = vsub.f32 %v3419_v22, %v3451_v13  ;;  %vm3856_vm5 = vmor %vm3854_vm3, %vm3855_vm13 }
 0x630   : > { %v3850_v27 = vmul.f32 %v5627_v23, %v3849_v10 }
 0x631   : > { %v4997_v1 = vmul.f32 -1.442695, %v3963_v43  ;;  %v3547_v21 = vadd.f32 1e-05, %v3483_v37 }
 0x632   : > { %v3851_v28 = vmul.f32 0.5, %v3850_v27 }
 0x633   : > { %5628 = vpow2.f32 %v4997_v1  ;;  %vm3864_vm2 = vweird.f32 %v3547_v21 }
 0x634   : > { %v3852_v60 = vsub.f32 1.5, %v3851_v28  ;;  %5630 = vrsqrt.f32 %v3547_v21  ;;  %v10310_v28 = vld [vmem:[#allocation39_spill] sm:$0xff] }
 0x636   : > { %v3853_v35 = vmul.f32 %v5627_v23, %v3852_v60 }
 0x638   : > { %v3857_v55 = vsel %vm3856_vm5, %v5627_v23, %v3853_v35 }
 0x639   : > { %v5629_v19 = vpop.eup %5628  ;;  %v3898_v41 = vmul.f32 %v3857_v55, %v3514_v56 }
 0x63a   : > { %v5631_v49 = vpop.eup %5630  ;;  %v4091_v58 = vadd.f32 1.0, %v5629_v19 }
 0x63b   : > { %v3931_v36 = vmul.f32 %v8056_v15, %v3898_v41  ;;  %v3859_v44 = vmul.f32 %v5631_v49, %v3547_v21  ;;  %vm3865_vm6 = vweird.f32 %v5631_v49 }
 0x63c   : > { %5632 = vrcp.f32 %v4091_v58  ;;  %vm3866_vm4 = vmor %vm3864_vm2, %vm3865_vm6  ;;  %v4540_v24 = vand.u32 2147483648, %v4091_v58  ;;  %v4538_v30 = vand.u32 2147483647, %v4091_v58  ;;  %vm4534_vm8 = vweird.f32 %v4091_v58 }
 0x63d   : > { %v3964_v5 = vadd.f32 %v8061_v38, %v3931_v36  ;;  %v3860_v54 = vmul.f32 %v5631_v49, %v3859_v44 }
 0x63e   : > { %v4541_v34 = vor.u32 1.1754944e-38, %v4540_v24  ;;  %vm4539_vm12 = vcmp.eq.f32.partialorder %v4538_v30, 8.507059e+37 }
 0x63f   : > { %v4998_v59 = vmul.f32 -1.442695, %v3964_v5  ;;  %v3861_v0 = vmul.f32 0.5, %v3860_v54 }
 0x641   : > { %5634 = vpow2.f32 %v4998_v59  ;;  %v3862_v31 = vsub.f32 1.5, %v3861_v0 }
 0x642   : > { %v5633_v12 = vpop.eup %5632 }
 0x643   : > { %v4530_v40 = vmul.f32 %v5633_v12, %v4091_v58  ;;  %v3863_v52 = vmul.f32 %v5631_v49, %v3862_v31  ;;  %vm4535_vm7 = vweird.f32 %v5633_v12 }
 0x644   : > { %vm4536_vm10 = vmor %vm4534_vm8, %vm4535_vm7 }
 0x645   : > { %v4531_v17 = vsub.f32 1.0, %v4530_v40  ;;  %v3867_v62 = vsel %vm3866_vm4, %v5631_v49, %v3863_v52 }
 0x646   : > { %v3899_v25 = vmul.f32 %v3867_v62, %v3515_v8 }
 0x647   : > { %v5635_v20 = vpop.eup %5634  ;;  %v4532_v26 = vmul.f32 %v5633_v12, %v4531_v17 }
 0x648   : > { %v4092_v42 = vadd.f32 1.0, %v5635_v20  ;;  %v3932_v50 = vmul.f32 %v8056_v15, %v3899_v25 }
 0x649   : > { %v4533_v47 = vadd.f32 %v5633_v12, %v4532_v26 }
 0x64a   : > { %5636 = vrcp.f32 %v4092_v42  ;;  %v3965_v61 = vadd.f32 %v8061_v38, %v3932_v50  ;;  %v4555_v48 = vand.u32 2147483648, %v4092_v42  ;;  %v4553_v57 = vand.u32 2147483647, %v4092_v42 }
 0x64b   : > { %v4537_v18 = vsel %vm4536_vm10, %v5633_v12, %v4533_v47  ;;  %vm4549_vm14 = vweird.f32 %v4092_v42 }
 0x64c   : > { %v4542_v46 = vsel %vm4539_vm12, %v4541_v34, %v4537_v18  ;;  %v4999_v45 = vmul.f32 -1.442695, %v3965_v61  ;;  %v4556_v38 = vor.u32 1.1754944e-38, %v4555_v48  ;;  %vm4554_vm1 = vcmp.eq.f32.partialorder %v4553_v57, 8.507059e+37 }
 0x64d   : > { %v4603_v2 = vmul.f32 %v4542_v46, %v3963_v43 }
 0x64e   : > { %5638 = vpow2.f32 %v4999_v45 }
 0x64f   : > { %v4635_v63 = vadd.f32 %v4603_v2, %v10308_v14 }
 0x650   : > { %v5637_v32 = vpop.eup %5636 }
 0x651   : > { %4667 = vst.msk [vmem:[%s8115_s12 + $0xe8] sm:$0xff] %vm413_vm0, %v4635_v63  ;;  %v4545_v6 = vmul.f32 %v5637_v32, %v4092_v42  ;;  %vm4550_vm11 = vweird.f32 %v5637_v32 }
 0x652   : > { %vm4551_vm15 = vmor %vm4549_vm14, %vm4550_vm11 }
 0x653   : > { %v4546_v15 = vsub.f32 1.0, %v4545_v6 }
 0x654   : > { %v5639_v39 = vpop.eup %5638 }
 0x655   : > { %v4547_v9 = vmul.f32 %v5637_v32, %v4546_v15  ;;  %v4093_v16 = vadd.f32 1.0, %v5639_v39 }
 0x657   : > { %v4548_v29 = vadd.f32 %v5637_v32, %v4547_v9  ;;  %5640 = vrcp.f32 %v4093_v16  ;;  %v4570_v7 = vand.u32 2147483648, %v4093_v16  ;;  %v4568_v10 = vand.u32 2147483647, %v4093_v16 }
 0x658   : > { %vm4564_vm13 = vweird.f32 %v4093_v16 }
 0x659   : > { %v4552_v4 = vsel %vm4551_vm15, %v5637_v32, %v4548_v29  ;;  %v4571_v37 = vor.u32 1.1754944e-38, %v4570_v7  ;;  %vm4569_vm5 = vcmp.eq.f32.partialorder %v4568_v10, 8.507059e+37 }
 0x65a   : > { %v4557_v53 = vsel %vm4554_vm1, %v4556_v38, %v4552_v4 }
 0x65b   : > { %v4604_v51 = vmul.f32 %v4557_v53, %v3964_v5 }
 0x65d   : > { %v4636_v3 = vadd.f32 %v4604_v51, %v10309_v33  ;;  %v5641_v11 = vpop.eup %5640 }
 0x65e   : > { %v4560_v23 = vmul.f32 %v5641_v11, %v4093_v16  ;;  %vm4565_vm9 = vweird.f32 %v5641_v11 }
 0x65f   : > { %4668 = vst.msk [vmem:[%s8115_s12 + $0xf0] sm:$0xff] %vm413_vm0, %v4636_v3  ;;  %vm4566_vm3 = vmor %vm4564_vm13, %vm4565_vm9 }
 0x660   : > { %v4561_v13 = vsub.f32 1.0, %v4560_v23 }
 0x662   : > { %v4562_v22 = vmul.f32 %v5641_v11, %v4561_v13 }
 0x664   : > { %v4563_v43 = vadd.f32 %v5641_v11, %v4562_v22 }
 0x666   : > { %v4567_v27 = vsel %vm4566_vm3, %v5641_v11, %v4563_v43 }
 0x667   : > { %v4572_v1 = vsel %vm4569_vm5, %v4571_v37, %v4567_v27 }
 0x668   : > { %v4605_v21 = vmul.f32 %v4572_v1, %v3965_v61 }
 0x66a   : > { %v4637_v60 = vadd.f32 %v4605_v21, %v10310_v28 }
 0x66c   : > { %4669 = vst.msk [vmem:[%s8115_s12 + $0xf8] sm:$0xff] %vm413_vm0, %v4637_v60 }
 0x66d PF: > { %s16_s18 = sadd.s32 1, %s5660_s18  }
 0x66e   : > { %p13_p4 = scmp.ge.s32.totalorder %s16_s18, 4  }
 0x670   :  { %15 = sbr.rel (!%p13_p4) target bundleno = 1 (0x1), region = 84 }

</bundles_post_ra>
